<compile_context>
chip_gen: v7x
topology: tpu7x:2x2x1
jax: 0.10.0
libtpu: 0.0.40
codegen_flags: <defaults>
</compile_context>

<pallas_src>
import jax
import jax.numpy as jnp
from jax.experimental import pallas as pl
from jax.experimental.pallas import tpu as pltpu

NUM_CLASSES = 101
EPS = 1e-5
LANE = 128                       # channel padding target -> lane-dense matmuls
BF16 = jnp.bfloat16
F32 = jnp.float32

# reduced-scale geometry: 32x32 input -> conv1/s2 16x16 -> pool1/s2 8x8
# -> pool2/s2 4x4 (stored W-padded as (4, 8): stored cols 4..7 are exact 0).
IN_HW = 32
C1_HW = 16
P1_HW = 8
P2_H, P2_W_REAL, P2_W = 4, 4, 8
K1_PAD = 2 * LANE                # conv1 im2col contraction 147 -> 256


# ----------------------------------------------------------------------------
# In-kernel helpers (traced into the single fused kernel body)
# ----------------------------------------------------------------------------
def _pad_hw1(x):
    """Zero-pad an (H, W, C) activation by 1 on each spatial side (in VMEM)."""
    H, W, C = x.shape
    zr = jnp.zeros((1, W, C), x.dtype)
    xh = jnp.concatenate([zr, x, zr], axis=0)
    zc = jnp.zeros((H + 2, 1, C), x.dtype)
    return jnp.concatenate([zc, xh, zc], axis=1)


def _taps3x3(x):
    """(H, W, C) -> (H*W, 9*C): the 9 conv taps folded into the contraction
    dim, so a 3x3 conv becomes ONE fat MXU matmul instead of 9 thin ones."""
    H, W, C = x.shape
    xp = _pad_hw1(x)
    slabs = [xp[di:di + H, dj:dj + W, :] for di in range(3) for dj in range(3)]
    return jnp.concatenate(slabs, axis=-1).reshape(H * W, 9 * C)


def _maxpool3x3_s1(x):
    """Stride-1 3x3 max, zero padding (exact for post-ReLU activations)."""
    H, W, C = x.shape
    xp = _pad_hw1(x)
    m = xp[0:H, 0:W, :]
    for di in range(3):
        for dj in range(3):
            if di or dj:
                m = jnp.maximum(m, xp[di:di + H, dj:dj + W, :])
    return m


def _avgpool3x3_s1(x):
    """Stride-1 3x3 average (count_include_pad=True), f32 VPU accumulation."""
    H, W, C = x.shape
    xp = _pad_hw1(x).astype(F32)
    s = jnp.zeros((H, W, C), F32)
    for di in range(3):
        for dj in range(3):
            s = s + xp[di:di + H, dj:dj + W, :]
    return (s * (1.0 / 9.0)).astype(BF16)


# ----------------------------------------------------------------------------
# The single fused kernel: whole BN-Inception forward for one image
# ----------------------------------------------------------------------------
def _bninception_kernel(patches_ref, sel1_ref, sel2_ref,
                        w1_ref, s1_ref, w2r_ref, s2r_ref, w2_ref, s2_ref,
                        wi1_ref, si1_ref, w33_ref, s33_ref,
                        wd1_ref, sd1_ref, wd2_ref, sd2_ref,
                        wpp_ref, spp_ref, wfc_ref, bfc_ref, out_ref):
    C = LANE

    def mm(a, b):
        return jnp.dot(a, b, preferred_element_type=jnp.float32)

    def cbr(x2d, w_ref, s_ref):
        # conv-as-matmul + folded BN/bias shift + ReLU; f32 epilogue -> bf16
        y = mm(x2d, w_ref[...]) + s_ref[...]
        return jnp.maximum(y, 0.0).astype(BF16)

    # ---- conv1 7x7/s2 (host im2col, K padded 147 -> 256): one MXU matmul ----
    x = cbr(patches_ref[...], w1_ref, s1_ref)                        # (256, 128)

    # ---- pool1 3x3/s2: stride-1 max + exact even-row/col selection matmul ----
    m = _maxpool3x3_s1(x.reshape(C1_HW, C1_HW, C)).reshape(C1_HW * C1_HW, C)
    x = mm(sel1_ref[...], m).astype(BF16)                            # (64, 128)

    # ---- conv2_3x3_reduce (1x1) + conv2_3x3 (9 taps folded into K = 1152) ----
    x = cbr(x, w2r_ref, s2r_ref)                                     # (64, 128)
    x = cbr(_taps3x3(x.reshape(P1_HW, P1_HW, C)), w2_ref, s2_ref)    # (64, 128)

    # ---- pool2 3x3/s2 -> 4x4 stored W-padded (4, 8); padded cols exactly 0 ----
    m = _maxpool3x3_s1(x.reshape(P1_HW, P1_HW, C)).reshape(P1_HW * P1_HW, C)
    x = mm(sel2_ref[...], m).astype(BF16)                            # (32, 128)

    row = jax.lax.broadcasted_iota(jnp.int32, (P2_H * P2_W, LANE), 0)
    real_col = jnp.bitwise_and(row, P2_W - 1) < P2_W_REAL            # (32, 128)

    def keep_real(y):   # re-zero the W-padding columns after each conv epilogue
        return jnp.where(real_col, y, jnp.zeros_like(y))

    # ---- inception_3a: three same-input 1x1 reductions fused into one matmul ----
    r = cbr(x, wi1_ref, si1_ref)                                     # (32, 384)
    b1 = keep_real(r[:, 0:C])
    r2 = keep_real(r[:, C:2 * C])
    r3 = keep_real(r[:, 2 * C:3 * C])

    # branch 2: 3x3
    b2 = keep_real(cbr(_taps3x3(r2.reshape(P2_H, P2_W, C)), w33_ref, s33_ref))

    # branch 3: double 3x3
    t = keep_real(cbr(_taps3x3(r3.reshape(P2_H, P2_W, C)), wd1_ref, sd1_ref))
    b3 = keep_real(cbr(_taps3x3(t.reshape(P2_H, P2_W, C)), wd2_ref, sd2_ref))

    # branch 4: avg-pool (VPU) + 1x1 pool_proj (single matmul; no tap replicas)
    a = _avgpool3x3_s1(x.reshape(P2_H, P2_W, C)).reshape(P2_H * P2_W, C)
    b4 = keep_real(cbr(a, wpp_ref, spp_ref))

    # ---- Concat -> global average pool -> InnerProduct (one matmul) ----
    xc = jnp.concatenate([b1, b2, b3, b4], axis=-1)                  # (32, 512)
    y = mm(xc, wfc_ref[...])                                         # (32, 128) f32
    out_ref[...] = (jnp.sum(y, axis=0, keepdims=True)
                    * (1.0 / float(P2_H * P2_W_REAL)) + bfc_ref[...])


# ----------------------------------------------------------------------------
# Host glue: im2col for the stem conv only (~300 KB, review-endorsed)
# ----------------------------------------------------------------------------
def _im2col_conv1(x_nhwc):
    """(N, 32, 32, 3) -> (N, 256, 256) bf16 patch matrix for the 7x7/s2 conv."""
    N, H, W, Cin = x_nhwc.shape
    k, s, pad = 7, 2, 3
    Ho = (H + 2 * pad - k) // s + 1
    xp = jnp.pad(x_nhwc, ((0, 0), (pad, pad), (pad, pad), (0, 0)))
    slabs = [xp[:, i:i + s * Ho:s, j:j + s * Ho:s, :]
             for i in range(k) for j in range(k)]
    pm = jnp.stack(slabs, axis=3).reshape(N, Ho * Ho, k * k * Cin)
    pm = jnp.pad(pm, ((0, 0), (0, 0), (0, K1_PAD - k * k * Cin)))
    return pm.astype(BF16)


# ----------------------------------------------------------------------------
# Parameter initialization (deterministic, synthetic)
# ----------------------------------------------------------------------------
def make_conv_params(key, cin, cout, ksize):
    k1, k2, k3, k4, k5, k6 = jax.random.split(key, 6)
    fan_in = cin * ksize * ksize
    return dict(
        w=jax.random.normal(k1, (cout, cin, ksize, ksize), jnp.float32)
        * (1.0 / fan_in ** 0.5),
        b=0.1 * jax.random.normal(k2, (cout,), jnp.float32),
        gamma=1.0 + 0.1 * jax.random.normal(k3, (cout,), jnp.float32),
        beta=0.1 * jax.random.normal(k4, (cout,), jnp.float32),
        mean=0.1 * jax.random.normal(k5, (cout,), jnp.float32),
        var=0.5 + 0.5 * jnp.abs(jax.random.normal(k6, (cout,), jnp.float32)),
    )


CONV_DEFS = [
    # name                 cin cout k
    ("conv1_7x7_s2",        3, 16, 7),
    ("conv2_3x3_reduce",   16, 16, 1),
    ("conv2_3x3",          16, 32, 3),
    ("i3a_1x1",            32,  8, 1),
    ("i3a_3x3_reduce",     32,  8, 1),
    ("i3a_3x3",             8, 16, 3),
    ("i3a_double3x3_red",  32,  8, 1),
    ("i3a_double3x3_1",     8,  8, 3),
    ("i3a_double3x3_2",     8,  8, 3),
    ("i3a_pool_proj",      32,  8, 1),
]


def init_params(key):
    params = {}
    keys = jax.random.split(key, len(CONV_DEFS) + 2)
    for k, (name, cin, cout, ks) in zip(keys[:len(CONV_DEFS)], CONV_DEFS):
        params[name] = make_conv_params(k, cin, cout, ks)
    feat = 8 + 16 + 8 + 8  # inception_3a concat channels
    params["fc_w"] = jax.random.normal(
        keys[-2], (NUM_CLASSES, feat), jnp.float32) * (1.0 / feat ** 0.5)
    params["fc_b"] = 0.1 * jax.random.normal(
        keys[-1], (NUM_CLASSES,), jnp.float32)
    return params


# ----------------------------------------------------------------------------
# Host-side folding / packing of all weights into the fused-kernel layouts
# ----------------------------------------------------------------------------
def prepare_weights(params):
    """Returns the flat operand list consumed by the fused kernel."""
    CP = LANE

    def fold(p):
        g = p["gamma"] / jnp.sqrt(p["var"] + EPS)
        return g, p["beta"] + (p["b"] - p["mean"]) * g

    def pack_shift(shift, coutp):
        return jnp.pad(shift, (0, coutp - shift.shape[0])).reshape(1, coutp).astype(F32)

    def conv1x1(p, coutp=CP):
        g, shift = fold(p)
        cout, cin = p["w"].shape[:2]
        w = p["w"].reshape(cout, cin).T * g[None, :]
        w = jnp.pad(w, ((0, CP - cin), (0, coutp - cout)))
        return w.astype(BF16), pack_shift(shift, coutp)

    def conv3x3(p, coutp=CP):
        # taps folded into the contraction dim: K index = tap * 128 + cin
        g, shift = fold(p)
        cout, cin, kh, kw = p["w"].shape
        w = jnp.transpose(p["w"], (2, 3, 1, 0)) * g
        w = jnp.pad(w, ((0, 0), (0, 0), (0, CP - cin), (0, coutp - cout)))
        return w.reshape(kh * kw * CP, coutp).astype(BF16), pack_shift(shift, coutp)

    def conv1_7x7(p, coutp=CP):
        # im2col layout: K index = tap * 3 + cin, zero-padded 147 -> 256
        g, shift = fold(p)
        cout, cin, kh, kw = p["w"].shape
        w = jnp.transpose(p["w"], (2, 3, 1, 0)).reshape(kh * kw * cin, cout) * g[None, :]
        w = jnp.pad(w, ((0, K1_PAD - kh * kw * cin), (0, coutp - cout)))
        return w.astype(BF16), pack_shift(shift, coutp)

    w1, s1 = conv1_7x7(params["conv1_7x7_s2"])
    w2r, s2r = conv1x1(params["conv2_3x3_reduce"])
    w2, s2 = conv3x3(params["conv2_3x3"])

    # the three same-input 1x1 reductions of inception_3a -> one (128, 384) matmul
    pairs = [conv1x1(params[n]) for n in
             ("i3a_1x1", "i3a_3x3_reduce", "i3a_double3x3_red")]
    wi1 = jnp.concatenate([w for w, _ in pairs], axis=1)
    si1 = jnp.concatenate([s for _, s in pairs], axis=1)

    w33, s33 = conv3x3(params["i3a_3x3"])
    wd1, sd1 = conv3x3(params["i3a_double3x3_1"])
    wd2, sd2 = conv3x3(params["i3a_double3x3_2"])
    wpp, spp = conv1x1(params["i3a_pool_proj"])   # avg-pool done on the VPU in-kernel

    # classifier: scatter the real FC rows into the padded concat channel layout
    fc_w, fc_b = params["fc_w"], params["fc_b"]
    branch_real = [params[n]["w"].shape[0]
                   for n in ("i3a_1x1", "i3a_3x3", "i3a_double3x3_2", "i3a_pool_proj")]
    segs, start = [], 0
    for creal in branch_real:
        seg = fc_w[:, start:start + creal].T
        segs.append(jnp.pad(seg, ((0, CP - creal), (0, LANE - NUM_CLASSES))))
        start += creal
    wfc = jnp.concatenate(segs, axis=0).astype(BF16)              # (512, 128)
    bfc = jnp.pad(fc_b, (0, LANE - NUM_CLASSES)).reshape(1, LANE).astype(F32)

    # pool1 (16x16 -> 8x8): pick the even-row/col entries of the stride-1 max map
    r = jnp.arange(P1_HW * P1_HW)
    sel1 = jnp.zeros((P1_HW * P1_HW, C1_HW * C1_HW), F32)
    sel1 = sel1.at[r, (r // P1_HW) * 2 * C1_HW + (r % P1_HW) * 2].set(1.0)

    # pool2 (8x8 -> 4x4), emitting the W-padded (4, 8) layout (cols >= 4 stay 0)
    r = jnp.arange(P2_H * P2_W)
    q = r % P2_W
    src = (r // P2_W) * 2 * P1_HW + q * 2
    sel2 = jnp.zeros((P2_H * P2_W, P1_HW * P1_HW), F32)
    sel2 = sel2.at[r, jnp.where(q < P2_W_REAL, src, 0)].set(
        (q < P2_W_REAL).astype(F32))

    return [sel1.astype(BF16), sel2.astype(BF16),
            w1, s1, w2r, s2r, w2, s2, wi1, si1,
            w33, s33, wd1, sd1, wd2, sd2, wpp, spp, wfc, bfc]


# ----------------------------------------------------------------------------
# Forward pass: one pallas_call over the whole network, grid = (batch,)
# ----------------------------------------------------------------------------
def _forward_logits(x_nchw, ops):
    N, Cin, H, W = x_nchw.shape
    assert (Cin, H, W) == (3, IN_HW, IN_HW), "reduced-scale graph expects 3x32x32"
    patches = _im2col_conv1(jnp.transpose(x_nchw, (0, 2, 3, 1)))

    in_specs = [pl.BlockSpec((None, C1_HW * C1_HW, K1_PAD), lambda n: (n, 0, 0))]
    # weights / shifts / selection matrices: full-array blocks, constant index
    # maps (fetched once; tiny vs. VMEM so default double-buffering is fine).
    in_specs += [pl.BlockSpec(o.shape, lambda n: (0, 0)) for o in ops]

    out = pl.pallas_call(
        _bninception_kernel,
        out_shape=jax.ShapeDtypeStruct((N, 1, LANE), jnp.float32),
        grid_spec=pltpu.PrefetchScalarGridSpec(
            num_scalar_prefetch=0,
            grid=(N,),
            in_specs=in_specs,
            out_specs=pl.BlockSpec((None, 1, LANE), lambda n: (n, 0, 0)),
        ),
        compiler_params=pltpu.CompilerParams(
            dimension_semantics=("parallel",)),
    )(patches, *ops)
    return out.reshape(N, LANE)[:, :NUM_CLASSES]


_forward_jit = jax.jit(_forward_logits)


def bninception_forward(x_nchw, ops):
    logits = _forward_jit(x_nchw, ops)
    # forward() returns (last-op-type, tensor); the last op is the classifier.
    return ("InnerProduct", logits)


# ----------------------------------------------------------------------------
# Pure-JAX f32 reference (same graph, unfolded/unpadded) for a runtime check
# ----------------------------------------------------------------------------
def _ref_conv_bn_relu(x, p, stride, pad, relu=True):
    w = jnp.transpose(p["w"], (2, 3, 1, 0))                        # HWIO
    y = jax.lax.conv_general_dilated(
        x, w, (stride, stride), ((pad, pad), (pad, pad)),
        dimension_numbers=("NHWC", "HWIO", "NHWC"),
        precision=jax.lax.Precision.HIGHEST)
    y = y + p["b"]
    y = (y - p["mean"]) / jnp.sqrt(p["var"] + EPS) * p["gamma"] + p["beta"]
    return jnp.maximum(y, 0.0) if relu else y


def _ref_maxpool(x, k, stride, pad):
    return jax.lax.reduce_window(
        x, -jnp.inf, jax.lax.max, (1, k, k, 1), (1, stride, stride, 1),
        ((0, 0), (pad, pad), (pad, pad), (0, 0)))


def _ref_avgpool(x, k, stride, pad):
    s = jax.lax.reduce_window(
        x, 0.0, jax.lax.add, (1, k, k, 1), (1, stride, stride, 1),
        ((0, 0), (pad, pad), (pad, pad), (0, 0)))
    return s / float(k * k)


def _ref_forward(x_nchw, params):
    x = jnp.transpose(x_nchw, (0, 2, 3, 1)).astype(jnp.float32)
    x = _ref_conv_bn_relu(x, params["conv1_7x7_s2"], 2, 3)
    x = _ref_maxpool(x, 3, 2, 1)
    x = _ref_conv_bn_relu(x, params["conv2_3x3_reduce"], 1, 0)
    x = _ref_conv_bn_relu(x, params["conv2_3x3"], 1, 1)
    x = _ref_maxpool(x, 3, 2, 1)
    b1 = _ref_conv_bn_relu(x, params["i3a_1x1"], 1, 0)
    b2 = _ref_conv_bn_relu(x, params["i3a_3x3_reduce"], 1, 0)
    b2 = _ref_conv_bn_relu(b2, params["i3a_3x3"], 1, 1)
    b3 = _ref_conv_bn_relu(x, params["i3a_double3x3_red"], 1, 0)
    b3 = _ref_conv_bn_relu(b3, params["i3a_double3x3_1"], 1, 1)
    b3 = _ref_conv_bn_relu(b3, params["i3a_double3x3_2"], 1, 1)
    b4 = _ref_avgpool(x, 3, 1, 1)
    b4 = _ref_conv_bn_relu(b4, params["i3a_pool_proj"], 1, 0)
    xc = jnp.concatenate([b1, b2, b3, b4], axis=-1)
    feat = jnp.mean(xc, axis=(1, 2))
    return jnp.dot(feat, params["fc_w"].T,
                   precision=jax.lax.Precision.HIGHEST) + params["fc_b"]


if __name__ == "__main__":
    root = jax.random.PRNGKey(0)
    k_in, k_par = jax.random.split(root)
    # Small input consistent with the module's 3-channel NCHW images.
    x = jax.random.normal(k_in, (2, 3, 32, 32), jnp.float32)
    params = init_params(k_par)
    prep = prepare_weights(params)

    op_type, logits = bninception_forward(x, prep)
    jax.block_until_ready(logits)
    assert op_type == "InnerProduct"
    assert logits.shape == (2, NUM_CLASSES)
    assert bool(jnp.all(jnp.isfinite(logits)))

    # cross-check the fused bf16 Pallas path against a pure-JAX f32 reference
    ref = jax.jit(_ref_forward)(x, params)
    err = float(jnp.max(jnp.abs(logits - ref)))
    assert err < 0.2, f"kernel/reference mismatch: max abs err {err}"

    print("KERNEL_OK")
</pallas_src>

<mosaic_0001>
module attributes {stable_mosaic.version = 11 : i64} {
  func.func @_bninception_kernel(%arg0: i32, %arg1: memref<1x256x256xbf16, #tpu.memory_space<vmem>>, %arg2: memref<64x256xbf16, #tpu.memory_space<vmem>>, %arg3: memref<32x64xbf16, #tpu.memory_space<vmem>>, %arg4: memref<256x128xbf16, #tpu.memory_space<vmem>>, %arg5: memref<1x128xf32, #tpu.memory_space<vmem>>, %arg6: memref<128x128xbf16, #tpu.memory_space<vmem>>, %arg7: memref<1x128xf32, #tpu.memory_space<vmem>>, %arg8: memref<1152x128xbf16, #tpu.memory_space<vmem>>, %arg9: memref<1x128xf32, #tpu.memory_space<vmem>>, %arg10: memref<128x384xbf16, #tpu.memory_space<vmem>>, %arg11: memref<1x384xf32, #tpu.memory_space<vmem>>, %arg12: memref<1152x128xbf16, #tpu.memory_space<vmem>>, %arg13: memref<1x128xf32, #tpu.memory_space<vmem>>, %arg14: memref<1152x128xbf16, #tpu.memory_space<vmem>>, %arg15: memref<1x128xf32, #tpu.memory_space<vmem>>, %arg16: memref<1152x128xbf16, #tpu.memory_space<vmem>>, %arg17: memref<1x128xf32, #tpu.memory_space<vmem>>, %arg18: memref<128x128xbf16, #tpu.memory_space<vmem>>, %arg19: memref<1x128xf32, #tpu.memory_space<vmem>>, %arg20: memref<512x128xbf16, #tpu.memory_space<vmem>>, %arg21: memref<1x128xf32, #tpu.memory_space<vmem>>, %arg22: memref<1x1x128xf32, #tpu.memory_space<vmem>>) attributes {dimension_semantics = [#tpu.dimension_semantics<parallel>], iteration_bounds = array<i64: 2>, scalar_prefetch = 0 : i64, scratch_operands = 0 : i64, tpu.core_type = #tpu.core_type<tc>, window_params = [{transform_indices = @transform_0, window_bounds = array<i64: 1, 256, 256>}, {pipeline_mode = #tpu.pipeline_mode<synchronous>, transform_indices = @transform_1, window_bounds = array<i64: 64, 256>}, {pipeline_mode = #tpu.pipeline_mode<synchronous>, transform_indices = @transform_2, window_bounds = array<i64: 32, 64>}, {pipeline_mode = #tpu.pipeline_mode<synchronous>, transform_indices = @transform_3, window_bounds = array<i64: 256, 128>}, {pipeline_mode = #tpu.pipeline_mode<synchronous>, transform_indices = @transform_4, window_bounds = array<i64: 1, 128>}, {pipeline_mode = #tpu.pipeline_mode<synchronous>, transform_indices = @transform_5, window_bounds = array<i64: 128, 128>}, {pipeline_mode = #tpu.pipeline_mode<synchronous>, transform_indices = @transform_6, window_bounds = array<i64: 1, 128>}, {pipeline_mode = #tpu.pipeline_mode<synchronous>, transform_indices = @transform_7, window_bounds = array<i64: 1152, 128>}, {pipeline_mode = #tpu.pipeline_mode<synchronous>, transform_indices = @transform_8, window_bounds = array<i64: 1, 128>}, {pipeline_mode = #tpu.pipeline_mode<synchronous>, transform_indices = @transform_9, window_bounds = array<i64: 128, 384>}, {pipeline_mode = #tpu.pipeline_mode<synchronous>, transform_indices = @transform_10, window_bounds = array<i64: 1, 384>}, {pipeline_mode = #tpu.pipeline_mode<synchronous>, transform_indices = @transform_11, window_bounds = array<i64: 1152, 128>}, {pipeline_mode = #tpu.pipeline_mode<synchronous>, transform_indices = @transform_12, window_bounds = array<i64: 1, 128>}, {pipeline_mode = #tpu.pipeline_mode<synchronous>, transform_indices = @transform_13, window_bounds = array<i64: 1152, 128>}, {pipeline_mode = #tpu.pipeline_mode<synchronous>, transform_indices = @transform_14, window_bounds = array<i64: 1, 128>}, {pipeline_mode = #tpu.pipeline_mode<synchronous>, transform_indices = @transform_15, window_bounds = array<i64: 1152, 128>}, {pipeline_mode = #tpu.pipeline_mode<synchronous>, transform_indices = @transform_16, window_bounds = array<i64: 1, 128>}, {pipeline_mode = #tpu.pipeline_mode<synchronous>, transform_indices = @transform_17, window_bounds = array<i64: 128, 128>}, {pipeline_mode = #tpu.pipeline_mode<synchronous>, transform_indices = @transform_18, window_bounds = array<i64: 1, 128>}, {pipeline_mode = #tpu.pipeline_mode<synchronous>, transform_indices = @transform_19, window_bounds = array<i64: 512, 128>}, {pipeline_mode = #tpu.pipeline_mode<synchronous>, transform_indices = @transform_20, window_bounds = array<i64: 1, 128>}, {transform_indices = @transform_21, window_bounds = array<i64: 1, 1, 128>}]} {
    %c0 = arith.constant 0 : index
    %c0_0 = arith.constant 0 : index
    %c0_1 = arith.constant 0 : index
    %0 = vector.load %arg1[%c0, %c0_0, %c0_1] : memref<1x256x256xbf16, #tpu.memory_space<vmem>>, vector<1x256x256xbf16>
    %1 = vector.shape_cast %0 : vector<1x256x256xbf16> to vector<256x256xbf16>
    %c0_2 = arith.constant 0 : index
    %c0_3 = arith.constant 0 : index
    %2 = vector.load %arg4[%c0_2, %c0_3] : memref<256x128xbf16, #tpu.memory_space<vmem>>, vector<256x128xbf16>
    %cst = arith.constant dense<0.000000e+00> : vector<256x128xf32>
    %3 = tpu.matmul %1, %2, %cst {dimension_numbers = #tpu.dot_dimension_numbers<[1], [0], [0], [1], [0, 0, 1, 1], [], []>} : vector<256x256xbf16>, vector<256x128xbf16>, vector<256x128xf32> -> vector<256x128xf32>
    %c0_4 = arith.constant 0 : index
    %c0_5 = arith.constant 0 : index
    %4 = vector.load %arg5[%c0_4, %c0_5] : memref<1x128xf32, #tpu.memory_space<vmem>>, vector<1x128xf32>
    %5 = vector.broadcast %4 : vector<1x128xf32> to vector<256x128xf32>
    %6 = arith.addf %3, %5 : vector<256x128xf32>
    %cst_6 = arith.constant 0.000000e+00 : f32
    %7 = vector.broadcast %cst_6 : f32 to vector<256x128xf32>
    %8 = arith.maximumf %6, %7 : vector<256x128xf32>
    %9 = arith.truncf %8 : vector<256x128xf32> to vector<256x128xbf16>
    %10 = vector.shape_cast %9 : vector<256x128xbf16> to vector<16x16x128xbf16>
    %cst_7 = arith.constant 0.000000e+00 : bf16
    %11 = vector.broadcast %cst_7 : bf16 to vector<1x16x128xbf16>
    %12 = tpu.concatenate %11, %10, %11 in 0 : vector<1x16x128xbf16>, vector<16x16x128xbf16>, vector<1x16x128xbf16> -> vector<18x16x128xbf16>
    %cst_8 = arith.constant 0.000000e+00 : bf16
    %13 = vector.broadcast %cst_8 : bf16 to vector<18x1x128xbf16>
    %14 = tpu.concatenate %13, %12, %13 in 1 : vector<18x1x128xbf16>, vector<18x16x128xbf16>, vector<18x1x128xbf16> -> vector<18x18x128xbf16>
    %15 = vector.extract_strided_slice %14 {offsets = [0, 0, 0], sizes = [16, 16, 128], strides = [1, 1, 1]} : vector<18x18x128xbf16> to vector<16x16x128xbf16>
    %16 = vector.extract_strided_slice %14 {offsets = [0, 1, 0], sizes = [16, 16, 128], strides = [1, 1, 1]} : vector<18x18x128xbf16> to vector<16x16x128xbf16>
    %17 = arith.maximumf %15, %16 : vector<16x16x128xbf16>
    %18 = vector.extract_strided_slice %14 {offsets = [0, 2, 0], sizes = [16, 16, 128], strides = [1, 1, 1]} : vector<18x18x128xbf16> to vector<16x16x128xbf16>
    %19 = arith.maximumf %17, %18 : vector<16x16x128xbf16>
    %20 = vector.extract_strided_slice %14 {offsets = [1, 0, 0], sizes = [16, 16, 128], strides = [1, 1, 1]} : vector<18x18x128xbf16> to vector<16x16x128xbf16>
    %21 = arith.maximumf %19, %20 : vector<16x16x128xbf16>
    %22 = vector.extract_strided_slice %14 {offsets = [1, 1, 0], sizes = [16, 16, 128], strides = [1, 1, 1]} : vector<18x18x128xbf16> to vector<16x16x128xbf16>
    %23 = arith.maximumf %21, %22 : vector<16x16x128xbf16>
    %24 = vector.extract_strided_slice %14 {offsets = [1, 2, 0], sizes = [16, 16, 128], strides = [1, 1, 1]} : vector<18x18x128xbf16> to vector<16x16x128xbf16>
    %25 = arith.maximumf %23, %24 : vector<16x16x128xbf16>
    %26 = vector.extract_strided_slice %14 {offsets = [2, 0, 0], sizes = [16, 16, 128], strides = [1, 1, 1]} : vector<18x18x128xbf16> to vector<16x16x128xbf16>
    %27 = arith.maximumf %25, %26 : vector<16x16x128xbf16>
    %28 = vector.extract_strided_slice %14 {offsets = [2, 1, 0], sizes = [16, 16, 128], strides = [1, 1, 1]} : vector<18x18x128xbf16> to vector<16x16x128xbf16>
    %29 = arith.maximumf %27, %28 : vector<16x16x128xbf16>
    %30 = vector.extract_strided_slice %14 {offsets = [2, 2, 0], sizes = [16, 16, 128], strides = [1, 1, 1]} : vector<18x18x128xbf16> to vector<16x16x128xbf16>
    %31 = arith.maximumf %29, %30 : vector<16x16x128xbf16>
    %32 = vector.shape_cast %31 : vector<16x16x128xbf16> to vector<256x128xbf16>
    %c0_9 = arith.constant 0 : index
    %c0_10 = arith.constant 0 : index
    %33 = vector.load %arg2[%c0_9, %c0_10] : memref<64x256xbf16, #tpu.memory_space<vmem>>, vector<64x256xbf16>
    %cst_11 = arith.constant dense<0.000000e+00> : vector<64x128xf32>
    %34 = tpu.matmul %33, %32, %cst_11 {dimension_numbers = #tpu.dot_dimension_numbers<[1], [0], [0], [1], [0, 0, 1, 1], [], []>} : vector<64x256xbf16>, vector<256x128xbf16>, vector<64x128xf32> -> vector<64x128xf32>
    %35 = arith.truncf %34 : vector<64x128xf32> to vector<64x128xbf16>
    %c0_12 = arith.constant 0 : index
    %c0_13 = arith.constant 0 : index
    %36 = vector.load %arg6[%c0_12, %c0_13] : memref<128x128xbf16, #tpu.memory_space<vmem>>, vector<128x128xbf16>
    %cst_14 = arith.constant dense<0.000000e+00> : vector<64x128xf32>
    %37 = tpu.matmul %35, %36, %cst_14 {dimension_numbers = #tpu.dot_dimension_numbers<[1], [0], [0], [1], [0, 0, 1, 1], [], []>} : vector<64x128xbf16>, vector<128x128xbf16>, vector<64x128xf32> -> vector<64x128xf32>
    %c0_15 = arith.constant 0 : index
    %c0_16 = arith.constant 0 : index
    %38 = vector.load %arg7[%c0_15, %c0_16] : memref<1x128xf32, #tpu.memory_space<vmem>>, vector<1x128xf32>
    %39 = vector.broadcast %38 : vector<1x128xf32> to vector<64x128xf32>
    %40 = arith.addf %37, %39 : vector<64x128xf32>
    %cst_17 = arith.constant 0.000000e+00 : f32
    %41 = vector.broadcast %cst_17 : f32 to vector<64x128xf32>
    %42 = arith.maximumf %40, %41 : vector<64x128xf32>
    %43 = arith.truncf %42 : vector<64x128xf32> to vector<64x128xbf16>
    %44 = vector.shape_cast %43 : vector<64x128xbf16> to vector<8x8x128xbf16>
    %cst_18 = arith.constant 0.000000e+00 : bf16
    %45 = vector.broadcast %cst_18 : bf16 to vector<1x8x128xbf16>
    %46 = tpu.concatenate %45, %44, %45 in 0 : vector<1x8x128xbf16>, vector<8x8x128xbf16>, vector<1x8x128xbf16> -> vector<10x8x128xbf16>
    %cst_19 = arith.constant 0.000000e+00 : bf16
    %47 = vector.broadcast %cst_19 : bf16 to vector<10x1x128xbf16>
    %48 = tpu.concatenate %47, %46, %47 in 1 : vector<10x1x128xbf16>, vector<10x8x128xbf16>, vector<10x1x128xbf16> -> vector<10x10x128xbf16>
    %49 = vector.extract_strided_slice %48 {offsets = [0, 0, 0], sizes = [8, 8, 128], strides = [1, 1, 1]} : vector<10x10x128xbf16> to vector<8x8x128xbf16>
    %50 = vector.extract_strided_slice %48 {offsets = [0, 1, 0], sizes = [8, 8, 128], strides = [1, 1, 1]} : vector<10x10x128xbf16> to vector<8x8x128xbf16>
    %51 = vector.extract_strided_slice %48 {offsets = [0, 2, 0], sizes = [8, 8, 128], strides = [1, 1, 1]} : vector<10x10x128xbf16> to vector<8x8x128xbf16>
    %52 = vector.extract_strided_slice %48 {offsets = [1, 0, 0], sizes = [8, 8, 128], strides = [1, 1, 1]} : vector<10x10x128xbf16> to vector<8x8x128xbf16>
    %53 = vector.extract_strided_slice %48 {offsets = [1, 1, 0], sizes = [8, 8, 128], strides = [1, 1, 1]} : vector<10x10x128xbf16> to vector<8x8x128xbf16>
    %54 = vector.extract_strided_slice %48 {offsets = [1, 2, 0], sizes = [8, 8, 128], strides = [1, 1, 1]} : vector<10x10x128xbf16> to vector<8x8x128xbf16>
    %55 = vector.extract_strided_slice %48 {offsets = [2, 0, 0], sizes = [8, 8, 128], strides = [1, 1, 1]} : vector<10x10x128xbf16> to vector<8x8x128xbf16>
    %56 = vector.extract_strided_slice %48 {offsets = [2, 1, 0], sizes = [8, 8, 128], strides = [1, 1, 1]} : vector<10x10x128xbf16> to vector<8x8x128xbf16>
    %57 = vector.extract_strided_slice %48 {offsets = [2, 2, 0], sizes = [8, 8, 128], strides = [1, 1, 1]} : vector<10x10x128xbf16> to vector<8x8x128xbf16>
    %58 = tpu.concatenate %49, %50, %51, %52, %53, %54, %55, %56, %57 in 2 : vector<8x8x128xbf16>, vector<8x8x128xbf16>, vector<8x8x128xbf16>, vector<8x8x128xbf16>, vector<8x8x128xbf16>, vector<8x8x128xbf16>, vector<8x8x128xbf16>, vector<8x8x128xbf16>, vector<8x8x128xbf16> -> vector<8x8x1152xbf16>
    %59 = vector.shape_cast %58 : vector<8x8x1152xbf16> to vector<64x1152xbf16>
    %c0_20 = arith.constant 0 : index
    %c0_21 = arith.constant 0 : index
    %60 = vector.load %arg8[%c0_20, %c0_21] : memref<1152x128xbf16, #tpu.memory_space<vmem>>, vector<1152x128xbf16>
    %cst_22 = arith.constant dense<0.000000e+00> : vector<64x128xf32>
    %61 = tpu.matmul %59, %60, %cst_22 {dimension_numbers = #tpu.dot_dimension_numbers<[1], [0], [0], [1], [0, 0, 1, 1], [], []>} : vector<64x1152xbf16>, vector<1152x128xbf16>, vector<64x128xf32> -> vector<64x128xf32>
    %c0_23 = arith.constant 0 : index
    %c0_24 = arith.constant 0 : index
    %62 = vector.load %arg9[%c0_23, %c0_24] : memref<1x128xf32, #tpu.memory_space<vmem>>, vector<1x128xf32>
    %63 = vector.broadcast %62 : vector<1x128xf32> to vector<64x128xf32>
    %64 = arith.addf %61, %63 : vector<64x128xf32>
    %cst_25 = arith.constant 0.000000e+00 : f32
    %65 = vector.broadcast %cst_25 : f32 to vector<64x128xf32>
    %66 = arith.maximumf %64, %65 : vector<64x128xf32>
    %67 = arith.truncf %66 : vector<64x128xf32> to vector<64x128xbf16>
    %68 = vector.shape_cast %67 : vector<64x128xbf16> to vector<8x8x128xbf16>
    %cst_26 = arith.constant 0.000000e+00 : bf16
    %69 = vector.broadcast %cst_26 : bf16 to vector<1x8x128xbf16>
    %70 = tpu.concatenate %69, %68, %69 in 0 : vector<1x8x128xbf16>, vector<8x8x128xbf16>, vector<1x8x128xbf16> -> vector<10x8x128xbf16>
    %cst_27 = arith.constant 0.000000e+00 : bf16
    %71 = vector.broadcast %cst_27 : bf16 to vector<10x1x128xbf16>
    %72 = tpu.concatenate %71, %70, %71 in 1 : vector<10x1x128xbf16>, vector<10x8x128xbf16>, vector<10x1x128xbf16> -> vector<10x10x128xbf16>
    %73 = vector.extract_strided_slice %72 {offsets = [0, 0, 0], sizes = [8, 8, 128], strides = [1, 1, 1]} : vector<10x10x128xbf16> to vector<8x8x128xbf16>
    %74 = vector.extract_strided_slice %72 {offsets = [0, 1, 0], sizes = [8, 8, 128], strides = [1, 1, 1]} : vector<10x10x128xbf16> to vector<8x8x128xbf16>
    %75 = arith.maximumf %73, %74 : vector<8x8x128xbf16>
    %76 = vector.extract_strided_slice %72 {offsets = [0, 2, 0], sizes = [8, 8, 128], strides = [1, 1, 1]} : vector<10x10x128xbf16> to vector<8x8x128xbf16>
    %77 = arith.maximumf %75, %76 : vector<8x8x128xbf16>
    %78 = vector.extract_strided_slice %72 {offsets = [1, 0, 0], sizes = [8, 8, 128], strides = [1, 1, 1]} : vector<10x10x128xbf16> to vector<8x8x128xbf16>
    %79 = arith.maximumf %77, %78 : vector<8x8x128xbf16>
    %80 = vector.extract_strided_slice %72 {offsets = [1, 1, 0], sizes = [8, 8, 128], strides = [1, 1, 1]} : vector<10x10x128xbf16> to vector<8x8x128xbf16>
    %81 = arith.maximumf %79, %80 : vector<8x8x128xbf16>
    %82 = vector.extract_strided_slice %72 {offsets = [1, 2, 0], sizes = [8, 8, 128], strides = [1, 1, 1]} : vector<10x10x128xbf16> to vector<8x8x128xbf16>
    %83 = arith.maximumf %81, %82 : vector<8x8x128xbf16>
    %84 = vector.extract_strided_slice %72 {offsets = [2, 0, 0], sizes = [8, 8, 128], strides = [1, 1, 1]} : vector<10x10x128xbf16> to vector<8x8x128xbf16>
    %85 = arith.maximumf %83, %84 : vector<8x8x128xbf16>
    %86 = vector.extract_strided_slice %72 {offsets = [2, 1, 0], sizes = [8, 8, 128], strides = [1, 1, 1]} : vector<10x10x128xbf16> to vector<8x8x128xbf16>
    %87 = arith.maximumf %85, %86 : vector<8x8x128xbf16>
    %88 = vector.extract_strided_slice %72 {offsets = [2, 2, 0], sizes = [8, 8, 128], strides = [1, 1, 1]} : vector<10x10x128xbf16> to vector<8x8x128xbf16>
    %89 = arith.maximumf %87, %88 : vector<8x8x128xbf16>
    %90 = vector.shape_cast %89 : vector<8x8x128xbf16> to vector<64x128xbf16>
    %c0_28 = arith.constant 0 : index
    %c0_29 = arith.constant 0 : index
    %91 = vector.load %arg3[%c0_28, %c0_29] : memref<32x64xbf16, #tpu.memory_space<vmem>>, vector<32x64xbf16>
    %cst_30 = arith.constant dense<0.000000e+00> : vector<32x128xf32>
    %92 = tpu.matmul %91, %90, %cst_30 {dimension_numbers = #tpu.dot_dimension_numbers<[1], [0], [0], [1], [0, 0, 1, 1], [], []>} : vector<32x64xbf16>, vector<64x128xbf16>, vector<32x128xf32> -> vector<32x128xf32>
    %93 = arith.truncf %92 : vector<32x128xf32> to vector<32x128xbf16>
    %94 = tpu.iota {dimensions = array<i32: 0>} : vector<32x128xi32>
    %c7_i32 = arith.constant 7 : i32
    %95 = vector.broadcast %c7_i32 : i32 to vector<32x128xi32>
    %96 = arith.andi %94, %95 : vector<32x128xi32>
    %c4_i32 = arith.constant 4 : i32
    %97 = vector.broadcast %c4_i32 : i32 to vector<32x128xi32>
    %98 = arith.cmpi slt, %96, %97 : vector<32x128xi32>
    %c0_31 = arith.constant 0 : index
    %c0_32 = arith.constant 0 : index
    %99 = vector.load %arg10[%c0_31, %c0_32] : memref<128x384xbf16, #tpu.memory_space<vmem>>, vector<128x384xbf16>
    %cst_33 = arith.constant dense<0.000000e+00> : vector<32x384xf32>
    %100 = tpu.matmul %93, %99, %cst_33 {dimension_numbers = #tpu.dot_dimension_numbers<[1], [0], [0], [1], [0, 0, 1, 1], [], []>} : vector<32x128xbf16>, vector<128x384xbf16>, vector<32x384xf32> -> vector<32x384xf32>
    %c0_34 = arith.constant 0 : index
    %c0_35 = arith.constant 0 : index
    %101 = vector.load %arg11[%c0_34, %c0_35] : memref<1x384xf32, #tpu.memory_space<vmem>>, vector<1x384xf32>
    %102 = vector.broadcast %101 : vector<1x384xf32> to vector<32x384xf32>
    %103 = arith.addf %100, %102 : vector<32x384xf32>
    %cst_36 = arith.constant 0.000000e+00 : f32
    %104 = vector.broadcast %cst_36 : f32 to vector<32x384xf32>
    %105 = arith.maximumf %103, %104 : vector<32x384xf32>
    %106 = arith.truncf %105 : vector<32x384xf32> to vector<32x384xbf16>
    %107 = vector.extract_strided_slice %106 {offsets = [0, 0], sizes = [32, 128], strides = [1, 1]} : vector<32x384xbf16> to vector<32x128xbf16>
    %cst_37 = arith.constant 0.000000e+00 : bf16
    %108 = vector.broadcast %cst_37 : bf16 to vector<32x128xbf16>
    %109 = arith.select %98, %107, %108 : vector<32x128xi1>, vector<32x128xbf16>
    %110 = vector.extract_strided_slice %106 {offsets = [0, 128], sizes = [32, 128], strides = [1, 1]} : vector<32x384xbf16> to vector<32x128xbf16>
    %cst_38 = arith.constant 0.000000e+00 : bf16
    %111 = vector.broadcast %cst_38 : bf16 to vector<32x128xbf16>
    %112 = arith.select %98, %110, %111 : vector<32x128xi1>, vector<32x128xbf16>
    %113 = vector.extract_strided_slice %106 {offsets = [0, 256], sizes = [32, 128], strides = [1, 1]} : vector<32x384xbf16> to vector<32x128xbf16>
    %cst_39 = arith.constant 0.000000e+00 : bf16
    %114 = vector.broadcast %cst_39 : bf16 to vector<32x128xbf16>
    %115 = arith.select %98, %113, %114 : vector<32x128xi1>, vector<32x128xbf16>
    %116 = vector.shape_cast %112 : vector<32x128xbf16> to vector<4x8x128xbf16>
    %cst_40 = arith.constant 0.000000e+00 : bf16
    %117 = vector.broadcast %cst_40 : bf16 to vector<1x8x128xbf16>
    %118 = tpu.concatenate %117, %116, %117 in 0 : vector<1x8x128xbf16>, vector<4x8x128xbf16>, vector<1x8x128xbf16> -> vector<6x8x128xbf16>
    %cst_41 = arith.constant 0.000000e+00 : bf16
    %119 = vector.broadcast %cst_41 : bf16 to vector<6x1x128xbf16>
    %120 = tpu.concatenate %119, %118, %119 in 1 : vector<6x1x128xbf16>, vector<6x8x128xbf16>, vector<6x1x128xbf16> -> vector<6x10x128xbf16>
    %121 = vector.extract_strided_slice %120 {offsets = [0, 0, 0], sizes = [4, 8, 128], strides = [1, 1, 1]} : vector<6x10x128xbf16> to vector<4x8x128xbf16>
    %122 = vector.extract_strided_slice %120 {offsets = [0, 1, 0], sizes = [4, 8, 128], strides = [1, 1, 1]} : vector<6x10x128xbf16> to vector<4x8x128xbf16>
    %123 = vector.extract_strided_slice %120 {offsets = [0, 2, 0], sizes = [4, 8, 128], strides = [1, 1, 1]} : vector<6x10x128xbf16> to vector<4x8x128xbf16>
    %124 = vector.extract_strided_slice %120 {offsets = [1, 0, 0], sizes = [4, 8, 128], strides = [1, 1, 1]} : vector<6x10x128xbf16> to vector<4x8x128xbf16>
    %125 = vector.extract_strided_slice %120 {offsets = [1, 1, 0], sizes = [4, 8, 128], strides = [1, 1, 1]} : vector<6x10x128xbf16> to vector<4x8x128xbf16>
    %126 = vector.extract_strided_slice %120 {offsets = [1, 2, 0], sizes = [4, 8, 128], strides = [1, 1, 1]} : vector<6x10x128xbf16> to vector<4x8x128xbf16>
    %127 = vector.extract_strided_slice %120 {offsets = [2, 0, 0], sizes = [4, 8, 128], strides = [1, 1, 1]} : vector<6x10x128xbf16> to vector<4x8x128xbf16>
    %128 = vector.extract_strided_slice %120 {offsets = [2, 1, 0], sizes = [4, 8, 128], strides = [1, 1, 1]} : vector<6x10x128xbf16> to vector<4x8x128xbf16>
    %129 = vector.extract_strided_slice %120 {offsets = [2, 2, 0], sizes = [4, 8, 128], strides = [1, 1, 1]} : vector<6x10x128xbf16> to vector<4x8x128xbf16>
    %130 = tpu.concatenate %121, %122, %123, %124, %125, %126, %127, %128, %129 in 2 : vector<4x8x128xbf16>, vector<4x8x128xbf16>, vector<4x8x128xbf16>, vector<4x8x128xbf16>, vector<4x8x128xbf16>, vector<4x8x128xbf16>, vector<4x8x128xbf16>, vector<4x8x128xbf16>, vector<4x8x128xbf16> -> vector<4x8x1152xbf16>
    %131 = vector.shape_cast %130 : vector<4x8x1152xbf16> to vector<32x1152xbf16>
    %c0_42 = arith.constant 0 : index
    %c0_43 = arith.constant 0 : index
    %132 = vector.load %arg12[%c0_42, %c0_43] : memref<1152x128xbf16, #tpu.memory_space<vmem>>, vector<1152x128xbf16>
    %cst_44 = arith.constant dense<0.000000e+00> : vector<32x128xf32>
    %133 = tpu.matmul %131, %132, %cst_44 {dimension_numbers = #tpu.dot_dimension_numbers<[1], [0], [0], [1], [0, 0, 1, 1], [], []>} : vector<32x1152xbf16>, vector<1152x128xbf16>, vector<32x128xf32> -> vector<32x128xf32>
    %c0_45 = arith.constant 0 : index
    %c0_46 = arith.constant 0 : index
    %134 = vector.load %arg13[%c0_45, %c0_46] : memref<1x128xf32, #tpu.memory_space<vmem>>, vector<1x128xf32>
    %135 = vector.broadcast %134 : vector<1x128xf32> to vector<32x128xf32>
    %136 = arith.addf %133, %135 : vector<32x128xf32>
    %cst_47 = arith.constant 0.000000e+00 : f32
    %137 = vector.broadcast %cst_47 : f32 to vector<32x128xf32>
    %138 = arith.maximumf %136, %137 : vector<32x128xf32>
    %139 = arith.truncf %138 : vector<32x128xf32> to vector<32x128xbf16>
    %cst_48 = arith.constant 0.000000e+00 : bf16
    %140 = vector.broadcast %cst_48 : bf16 to vector<32x128xbf16>
    %141 = arith.select %98, %139, %140 : vector<32x128xi1>, vector<32x128xbf16>
    %142 = vector.shape_cast %115 : vector<32x128xbf16> to vector<4x8x128xbf16>
    %cst_49 = arith.constant 0.000000e+00 : bf16
    %143 = vector.broadcast %cst_49 : bf16 to vector<1x8x128xbf16>
    %144 = tpu.concatenate %143, %142, %143 in 0 : vector<1x8x128xbf16>, vector<4x8x128xbf16>, vector<1x8x128xbf16> -> vector<6x8x128xbf16>
    %cst_50 = arith.constant 0.000000e+00 : bf16
    %145 = vector.broadcast %cst_50 : bf16 to vector<6x1x128xbf16>
    %146 = tpu.concatenate %145, %144, %145 in 1 : vector<6x1x128xbf16>, vector<6x8x128xbf16>, vector<6x1x128xbf16> -> vector<6x10x128xbf16>
    %147 = vector.extract_strided_slice %146 {offsets = [0, 0, 0], sizes = [4, 8, 128], strides = [1, 1, 1]} : vector<6x10x128xbf16> to vector<4x8x128xbf16>
    %148 = vector.extract_strided_slice %146 {offsets = [0, 1, 0], sizes = [4, 8, 128], strides = [1, 1, 1]} : vector<6x10x128xbf16> to vector<4x8x128xbf16>
    %149 = vector.extract_strided_slice %146 {offsets = [0, 2, 0], sizes = [4, 8, 128], strides = [1, 1, 1]} : vector<6x10x128xbf16> to vector<4x8x128xbf16>
    %150 = vector.extract_strided_slice %146 {offsets = [1, 0, 0], sizes = [4, 8, 128], strides = [1, 1, 1]} : vector<6x10x128xbf16> to vector<4x8x128xbf16>
    %151 = vector.extract_strided_slice %146 {offsets = [1, 1, 0], sizes = [4, 8, 128], strides = [1, 1, 1]} : vector<6x10x128xbf16> to vector<4x8x128xbf16>
    %152 = vector.extract_strided_slice %146 {offsets = [1, 2, 0], sizes = [4, 8, 128], strides = [1, 1, 1]} : vector<6x10x128xbf16> to vector<4x8x128xbf16>
    %153 = vector.extract_strided_slice %146 {offsets = [2, 0, 0], sizes = [4, 8, 128], strides = [1, 1, 1]} : vector<6x10x128xbf16> to vector<4x8x128xbf16>
    %154 = vector.extract_strided_slice %146 {offsets = [2, 1, 0], sizes = [4, 8, 128], strides = [1, 1, 1]} : vector<6x10x128xbf16> to vector<4x8x128xbf16>
    %155 = vector.extract_strided_slice %146 {offsets = [2, 2, 0], sizes = [4, 8, 128], strides = [1, 1, 1]} : vector<6x10x128xbf16> to vector<4x8x128xbf16>
    %156 = tpu.concatenate %147, %148, %149, %150, %151, %152, %153, %154, %155 in 2 : vector<4x8x128xbf16>, vector<4x8x128xbf16>, vector<4x8x128xbf16>, vector<4x8x128xbf16>, vector<4x8x128xbf16>, vector<4x8x128xbf16>, vector<4x8x128xbf16>, vector<4x8x128xbf16>, vector<4x8x128xbf16> -> vector<4x8x1152xbf16>
    %157 = vector.shape_cast %156 : vector<4x8x1152xbf16> to vector<32x1152xbf16>
    %c0_51 = arith.constant 0 : index
    %c0_52 = arith.constant 0 : index
    %158 = vector.load %arg14[%c0_51, %c0_52] : memref<1152x128xbf16, #tpu.memory_space<vmem>>, vector<1152x128xbf16>
    %cst_53 = arith.constant dense<0.000000e+00> : vector<32x128xf32>
    %159 = tpu.matmul %157, %158, %cst_53 {dimension_numbers = #tpu.dot_dimension_numbers<[1], [0], [0], [1], [0, 0, 1, 1], [], []>} : vector<32x1152xbf16>, vector<1152x128xbf16>, vector<32x128xf32> -> vector<32x128xf32>
    %c0_54 = arith.constant 0 : index
    %c0_55 = arith.constant 0 : index
    %160 = vector.load %arg15[%c0_54, %c0_55] : memref<1x128xf32, #tpu.memory_space<vmem>>, vector<1x128xf32>
    %161 = vector.broadcast %160 : vector<1x128xf32> to vector<32x128xf32>
    %162 = arith.addf %159, %161 : vector<32x128xf32>
    %cst_56 = arith.constant 0.000000e+00 : f32
    %163 = vector.broadcast %cst_56 : f32 to vector<32x128xf32>
    %164 = arith.maximumf %162, %163 : vector<32x128xf32>
    %165 = arith.truncf %164 : vector<32x128xf32> to vector<32x128xbf16>
    %cst_57 = arith.constant 0.000000e+00 : bf16
    %166 = vector.broadcast %cst_57 : bf16 to vector<32x128xbf16>
    %167 = arith.select %98, %165, %166 : vector<32x128xi1>, vector<32x128xbf16>
    %168 = vector.shape_cast %167 : vector<32x128xbf16> to vector<4x8x128xbf16>
    %cst_58 = arith.constant 0.000000e+00 : bf16
    %169 = vector.broadcast %cst_58 : bf16 to vector<1x8x128xbf16>
    %170 = tpu.concatenate %169, %168, %169 in 0 : vector<1x8x128xbf16>, vector<4x8x128xbf16>, vector<1x8x128xbf16> -> vector<6x8x128xbf16>
    %cst_59 = arith.constant 0.000000e+00 : bf16
    %171 = vector.broadcast %cst_59 : bf16 to vector<6x1x128xbf16>
    %172 = tpu.concatenate %171, %170, %171 in 1 : vector<6x1x128xbf16>, vector<6x8x128xbf16>, vector<6x1x128xbf16> -> vector<6x10x128xbf16>
    %173 = vector.extract_strided_slice %172 {offsets = [0, 0, 0], sizes = [4, 8, 128], strides = [1, 1, 1]} : vector<6x10x128xbf16> to vector<4x8x128xbf16>
    %174 = vector.extract_strided_slice %172 {offsets = [0, 1, 0], sizes = [4, 8, 128], strides = [1, 1, 1]} : vector<6x10x128xbf16> to vector<4x8x128xbf16>
    %175 = vector.extract_strided_slice %172 {offsets = [0, 2, 0], sizes = [4, 8, 128], strides = [1, 1, 1]} : vector<6x10x128xbf16> to vector<4x8x128xbf16>
    %176 = vector.extract_strided_slice %172 {offsets = [1, 0, 0], sizes = [4, 8, 128], strides = [1, 1, 1]} : vector<6x10x128xbf16> to vector<4x8x128xbf16>
    %177 = vector.extract_strided_slice %172 {offsets = [1, 1, 0], sizes = [4, 8, 128], strides = [1, 1, 1]} : vector<6x10x128xbf16> to vector<4x8x128xbf16>
    %178 = vector.extract_strided_slice %172 {offsets = [1, 2, 0], sizes = [4, 8, 128], strides = [1, 1, 1]} : vector<6x10x128xbf16> to vector<4x8x128xbf16>
    %179 = vector.extract_strided_slice %172 {offsets = [2, 0, 0], sizes = [4, 8, 128], strides = [1, 1, 1]} : vector<6x10x128xbf16> to vector<4x8x128xbf16>
    %180 = vector.extract_strided_slice %172 {offsets = [2, 1, 0], sizes = [4, 8, 128], strides = [1, 1, 1]} : vector<6x10x128xbf16> to vector<4x8x128xbf16>
    %181 = vector.extract_strided_slice %172 {offsets = [2, 2, 0], sizes = [4, 8, 128], strides = [1, 1, 1]} : vector<6x10x128xbf16> to vector<4x8x128xbf16>
    %182 = tpu.concatenate %173, %174, %175, %176, %177, %178, %179, %180, %181 in 2 : vector<4x8x128xbf16>, vector<4x8x128xbf16>, vector<4x8x128xbf16>, vector<4x8x128xbf16>, vector<4x8x128xbf16>, vector<4x8x128xbf16>, vector<4x8x128xbf16>, vector<4x8x128xbf16>, vector<4x8x128xbf16> -> vector<4x8x1152xbf16>
    %183 = vector.shape_cast %182 : vector<4x8x1152xbf16> to vector<32x1152xbf16>
    %c0_60 = arith.constant 0 : index
    %c0_61 = arith.constant 0 : index
    %184 = vector.load %arg16[%c0_60, %c0_61] : memref<1152x128xbf16, #tpu.memory_space<vmem>>, vector<1152x128xbf16>
    %cst_62 = arith.constant dense<0.000000e+00> : vector<32x128xf32>
    %185 = tpu.matmul %183, %184, %cst_62 {dimension_numbers = #tpu.dot_dimension_numbers<[1], [0], [0], [1], [0, 0, 1, 1], [], []>} : vector<32x1152xbf16>, vector<1152x128xbf16>, vector<32x128xf32> -> vector<32x128xf32>
    %c0_63 = arith.constant 0 : index
    %c0_64 = arith.constant 0 : index
    %186 = vector.load %arg17[%c0_63, %c0_64] : memref<1x128xf32, #tpu.memory_space<vmem>>, vector<1x128xf32>
    %187 = vector.broadcast %186 : vector<1x128xf32> to vector<32x128xf32>
    %188 = arith.addf %185, %187 : vector<32x128xf32>
    %cst_65 = arith.constant 0.000000e+00 : f32
    %189 = vector.broadcast %cst_65 : f32 to vector<32x128xf32>
    %190 = arith.maximumf %188, %189 : vector<32x128xf32>
    %191 = arith.truncf %190 : vector<32x128xf32> to vector<32x128xbf16>
    %cst_66 = arith.constant 0.000000e+00 : bf16
    %192 = vector.broadcast %cst_66 : bf16 to vector<32x128xbf16>
    %193 = arith.select %98, %191, %192 : vector<32x128xi1>, vector<32x128xbf16>
    %194 = vector.shape_cast %93 : vector<32x128xbf16> to vector<4x8x128xbf16>
    %cst_67 = arith.constant 0.000000e+00 : bf16
    %195 = vector.broadcast %cst_67 : bf16 to vector<1x8x128xbf16>
    %196 = tpu.concatenate %195, %194, %195 in 0 : vector<1x8x128xbf16>, vector<4x8x128xbf16>, vector<1x8x128xbf16> -> vector<6x8x128xbf16>
    %cst_68 = arith.constant 0.000000e+00 : bf16
    %197 = vector.broadcast %cst_68 : bf16 to vector<6x1x128xbf16>
    %198 = tpu.concatenate %197, %196, %197 in 1 : vector<6x1x128xbf16>, vector<6x8x128xbf16>, vector<6x1x128xbf16> -> vector<6x10x128xbf16>
    %199 = arith.extf %198 : vector<6x10x128xbf16> to vector<6x10x128xf32>
    %cst_69 = arith.constant 0.000000e+00 : f32
    %200 = vector.broadcast %cst_69 : f32 to vector<4x8x128xf32>
    %201 = vector.extract_strided_slice %199 {offsets = [0, 0, 0], sizes = [4, 8, 128], strides = [1, 1, 1]} : vector<6x10x128xf32> to vector<4x8x128xf32>
    %202 = arith.addf %200, %201 : vector<4x8x128xf32>
    %203 = vector.extract_strided_slice %199 {offsets = [0, 1, 0], sizes = [4, 8, 128], strides = [1, 1, 1]} : vector<6x10x128xf32> to vector<4x8x128xf32>
    %204 = arith.addf %202, %203 : vector<4x8x128xf32>
    %205 = vector.extract_strided_slice %199 {offsets = [0, 2, 0], sizes = [4, 8, 128], strides = [1, 1, 1]} : vector<6x10x128xf32> to vector<4x8x128xf32>
    %206 = arith.addf %204, %205 : vector<4x8x128xf32>
    %207 = vector.extract_strided_slice %199 {offsets = [1, 0, 0], sizes = [4, 8, 128], strides = [1, 1, 1]} : vector<6x10x128xf32> to vector<4x8x128xf32>
    %208 = arith.addf %206, %207 : vector<4x8x128xf32>
    %209 = vector.extract_strided_slice %199 {offsets = [1, 1, 0], sizes = [4, 8, 128], strides = [1, 1, 1]} : vector<6x10x128xf32> to vector<4x8x128xf32>
    %210 = arith.addf %208, %209 : vector<4x8x128xf32>
    %211 = vector.extract_strided_slice %199 {offsets = [1, 2, 0], sizes = [4, 8, 128], strides = [1, 1, 1]} : vector<6x10x128xf32> to vector<4x8x128xf32>
    %212 = arith.addf %210, %211 : vector<4x8x128xf32>
    %213 = vector.extract_strided_slice %199 {offsets = [2, 0, 0], sizes = [4, 8, 128], strides = [1, 1, 1]} : vector<6x10x128xf32> to vector<4x8x128xf32>
    %214 = arith.addf %212, %213 : vector<4x8x128xf32>
    %215 = vector.extract_strided_slice %199 {offsets = [2, 1, 0], sizes = [4, 8, 128], strides = [1, 1, 1]} : vector<6x10x128xf32> to vector<4x8x128xf32>
    %216 = arith.addf %214, %215 : vector<4x8x128xf32>
    %217 = vector.extract_strided_slice %199 {offsets = [2, 2, 0], sizes = [4, 8, 128], strides = [1, 1, 1]} : vector<6x10x128xf32> to vector<4x8x128xf32>
    %218 = arith.addf %216, %217 : vector<4x8x128xf32>
    %cst_70 = arith.constant 0.111111112 : f32
    %219 = vector.broadcast %cst_70 : f32 to vector<4x8x128xf32>
    %220 = arith.mulf %218, %219 : vector<4x8x128xf32>
    %221 = arith.truncf %220 : vector<4x8x128xf32> to vector<4x8x128xbf16>
    %222 = vector.shape_cast %221 : vector<4x8x128xbf16> to vector<32x128xbf16>
    %c0_71 = arith.constant 0 : index
    %c0_72 = arith.constant 0 : index
    %223 = vector.load %arg18[%c0_71, %c0_72] : memref<128x128xbf16, #tpu.memory_space<vmem>>, vector<128x128xbf16>
    %cst_73 = arith.constant dense<0.000000e+00> : vector<32x128xf32>
    %224 = tpu.matmul %222, %223, %cst_73 {dimension_numbers = #tpu.dot_dimension_numbers<[1], [0], [0], [1], [0, 0, 1, 1], [], []>} : vector<32x128xbf16>, vector<128x128xbf16>, vector<32x128xf32> -> vector<32x128xf32>
    %c0_74 = arith.constant 0 : index
    %c0_75 = arith.constant 0 : index
    %225 = vector.load %arg19[%c0_74, %c0_75] : memref<1x128xf32, #tpu.memory_space<vmem>>, vector<1x128xf32>
    %226 = vector.broadcast %225 : vector<1x128xf32> to vector<32x128xf32>
    %227 = arith.addf %224, %226 : vector<32x128xf32>
    %cst_76 = arith.constant 0.000000e+00 : f32
    %228 = vector.broadcast %cst_76 : f32 to vector<32x128xf32>
    %229 = arith.maximumf %227, %228 : vector<32x128xf32>
    %230 = arith.truncf %229 : vector<32x128xf32> to vector<32x128xbf16>
    %cst_77 = arith.constant 0.000000e+00 : bf16
    %231 = vector.broadcast %cst_77 : bf16 to vector<32x128xbf16>
    %232 = arith.select %98, %230, %231 : vector<32x128xi1>, vector<32x128xbf16>
    %233 = tpu.concatenate %109, %141, %193, %232 in 1 : vector<32x128xbf16>, vector<32x128xbf16>, vector<32x128xbf16>, vector<32x128xbf16> -> vector<32x512xbf16>
    %c0_78 = arith.constant 0 : index
    %c0_79 = arith.constant 0 : index
    %234 = vector.load %arg20[%c0_78, %c0_79] : memref<512x128xbf16, #tpu.memory_space<vmem>>, vector<512x128xbf16>
    %cst_80 = arith.constant dense<0.000000e+00> : vector<32x128xf32>
    %235 = tpu.matmul %233, %234, %cst_80 {dimension_numbers = #tpu.dot_dimension_numbers<[1], [0], [0], [1], [0, 0, 1, 1], [], []>} : vector<32x512xbf16>, vector<512x128xbf16>, vector<32x128xf32> -> vector<32x128xf32>
    %cst_81 = arith.constant dense<0.000000e+00> : vector<128xf32>
    %236 = vector.multi_reduction <add>, %235, %cst_81 [0] : vector<32x128xf32> to vector<128xf32>
    %237 = vector.shape_cast %236 : vector<128xf32> to vector<1x128xf32>
    %cst_82 = arith.constant 6.250000e-02 : f32
    %238 = vector.broadcast %cst_82 : f32 to vector<1x128xf32>
    %239 = arith.mulf %237, %238 : vector<1x128xf32>
    %c0_83 = arith.constant 0 : index
    %c0_84 = arith.constant 0 : index
    %240 = vector.load %arg21[%c0_83, %c0_84] : memref<1x128xf32, #tpu.memory_space<vmem>>, vector<1x128xf32>
    %241 = arith.addf %239, %240 : vector<1x128xf32>
    %c0_85 = arith.constant 0 : index
    %c0_86 = arith.constant 0 : index
    %c0_87 = arith.constant 0 : index
    %242 = vector.load %arg22[%c0_85, %c0_86, %c0_87] : memref<1x1x128xf32, #tpu.memory_space<vmem>>, vector<1x1x128xf32>
    %243 = vector.shape_cast %242 : vector<1x1x128xf32> to vector<1x128xf32>
    %244 = vector.shape_cast %241 : vector<1x128xf32> to vector<1x1x128xf32>
    tpu.vector_store %arg22[%c0_85, %c0_86, %c0_87], %244 {strides = array<i32>} : memref<1x1x128xf32, #tpu.memory_space<vmem>>, vector<1x1x128xf32>,
    return
  }
  func.func @transform_0(%arg0: i32) -> (i32, i32, i32) {
    %c0_i32 = arith.constant 0 : i32
    %c0_i32_0 = arith.constant 0 : i32
    %c0_i32_1 = arith.constant 0 : i32
    return %arg0, %c0_i32, %c0_i32_0 : i32, i32, i32
  }
  func.func @transform_1(%arg0: i32) -> (i32, i32) {
    %c0_i32 = arith.constant 0 : i32
    %c0_i32_0 = arith.constant 0 : i32
    %c0_i32_1 = arith.constant 0 : i32
    return %c0_i32, %c0_i32_0 : i32, i32
  }
  func.func @transform_2(%arg0: i32) -> (i32, i32) {
    %c0_i32 = arith.constant 0 : i32
    %c0_i32_0 = arith.constant 0 : i32
    %c0_i32_1 = arith.constant 0 : i32
    return %c0_i32, %c0_i32_0 : i32, i32
  }
  func.func @transform_3(%arg0: i32) -> (i32, i32) {
    %c0_i32 = arith.constant 0 : i32
    %c0_i32_0 = arith.constant 0 : i32
    %c0_i32_1 = arith.constant 0 : i32
    return %c0_i32, %c0_i32_0 : i32, i32
  }
  func.func @transform_4(%arg0: i32) -> (i32, i32) {
    %c0_i32 = arith.constant 0 : i32
    %c0_i32_0 = arith.constant 0 : i32
    %c0_i32_1 = arith.constant 0 : i32
    return %c0_i32, %c0_i32_0 : i32, i32
  }
  func.func @transform_5(%arg0: i32) -> (i32, i32) {
    %c0_i32 = arith.constant 0 : i32
    %c0_i32_0 = arith.constant 0 : i32
    %c0_i32_1 = arith.constant 0 : i32
    return %c0_i32, %c0_i32_0 : i32, i32
  }
  func.func @transform_6(%arg0: i32) -> (i32, i32) {
    %c0_i32 = arith.constant 0 : i32
    %c0_i32_0 = arith.constant 0 : i32
    %c0_i32_1 = arith.constant 0 : i32
    return %c0_i32, %c0_i32_0 : i32, i32
  }
  func.func @transform_7(%arg0: i32) -> (i32, i32) {
    %c0_i32 = arith.constant 0 : i32
    %c0_i32_0 = arith.constant 0 : i32
    %c0_i32_1 = arith.constant 0 : i32
    return %c0_i32, %c0_i32_0 : i32, i32
  }
  func.func @transform_8(%arg0: i32) -> (i32, i32) {
    %c0_i32 = arith.constant 0 : i32
    %c0_i32_0 = arith.constant 0 : i32
    %c0_i32_1 = arith.constant 0 : i32
    return %c0_i32, %c0_i32_0 : i32, i32
  }
  func.func @transform_9(%arg0: i32) -> (i32, i32) {
    %c0_i32 = arith.constant 0 : i32
    %c0_i32_0 = arith.constant 0 : i32
    %c0_i32_1 = arith.constant 0 : i32
    return %c0_i32, %c0_i32_0 : i32, i32
  }
  func.func @transform_10(%arg0: i32) -> (i32, i32) {
    %c0_i32 = arith.constant 0 : i32
    %c0_i32_0 = arith.constant 0 : i32
    %c0_i32_1 = arith.constant 0 : i32
    return %c0_i32, %c0_i32_0 : i32, i32
  }
  func.func @transform_11(%arg0: i32) -> (i32, i32) {
    %c0_i32 = arith.constant 0 : i32
    %c0_i32_0 = arith.constant 0 : i32
    %c0_i32_1 = arith.constant 0 : i32
    return %c0_i32, %c0_i32_0 : i32, i32
  }
  func.func @transform_12(%arg0: i32) -> (i32, i32) {
    %c0_i32 = arith.constant 0 : i32
    %c0_i32_0 = arith.constant 0 : i32
    %c0_i32_1 = arith.constant 0 : i32
    return %c0_i32, %c0_i32_0 : i32, i32
  }
  func.func @transform_13(%arg0: i32) -> (i32, i32) {
    %c0_i32 = arith.constant 0 : i32
    %c0_i32_0 = arith.constant 0 : i32
    %c0_i32_1 = arith.constant 0 : i32
    return %c0_i32, %c0_i32_0 : i32, i32
  }
  func.func @transform_14(%arg0: i32) -> (i32, i32) {
    %c0_i32 = arith.constant 0 : i32
    %c0_i32_0 = arith.constant 0 : i32
    %c0_i32_1 = arith.constant 0 : i32
    return %c0_i32, %c0_i32_0 : i32, i32
  }
  func.func @transform_15(%arg0: i32) -> (i32, i32) {
    %c0_i32 = arith.constant 0 : i32
    %c0_i32_0 = arith.constant 0 : i32
    %c0_i32_1 = arith.constant 0 : i32
    return %c0_i32, %c0_i32_0 : i32, i32
  }
  func.func @transform_16(%arg0: i32) -> (i32, i32) {
    %c0_i32 = arith.constant 0 : i32
    %c0_i32_0 = arith.constant 0 : i32
    %c0_i32_1 = arith.constant 0 : i32
    return %c0_i32, %c0_i32_0 : i32, i32
  }
  func.func @transform_17(%arg0: i32) -> (i32, i32) {
    %c0_i32 = arith.constant 0 : i32
    %c0_i32_0 = arith.constant 0 : i32
    %c0_i32_1 = arith.constant 0 : i32
    return %c0_i32, %c0_i32_0 : i32, i32
  }
  func.func @transform_18(%arg0: i32) -> (i32, i32) {
    %c0_i32 = arith.constant 0 : i32
    %c0_i32_0 = arith.constant 0 : i32
    %c0_i32_1 = arith.constant 0 : i32
    return %c0_i32, %c0_i32_0 : i32, i32
  }
  func.func @transform_19(%arg0: i32) -> (i32, i32) {
    %c0_i32 = arith.constant 0 : i32
    %c0_i32_0 = arith.constant 0 : i32
    %c0_i32_1 = arith.constant 0 : i32
    return %c0_i32, %c0_i32_0 : i32, i32
  }
  func.func @transform_20(%arg0: i32) -> (i32, i32) {
    %c0_i32 = arith.constant 0 : i32
    %c0_i32_0 = arith.constant 0 : i32
    %c0_i32_1 = arith.constant 0 : i32
    return %c0_i32, %c0_i32_0 : i32, i32
  }
  func.func @transform_21(%arg0: i32) -> (i32, i32, i32) {
    %c0_i32 = arith.constant 0 : i32
    %c0_i32_0 = arith.constant 0 : i32
    %c0_i32_1 = arith.constant 0 : i32
    return %arg0, %c0_i32, %c0_i32_0 : i32, i32, i32
  }
}

</mosaic_0001>

<bundles_post_ra>
// kernel: _forward_logits.1
= control target key start
LH: loop header
LB: loop body
LE: loop exit
PB: predicated region body
PF: predicated region fallthrough
CT: control target
= control target key end

     0   :  { %s12090_s0 = inlined_call_operand.vmem [shape: bf16[2,256,256], index: 0, kind: input, shape index: {}]   ;;  %s12091_s1 = inlined_call_operand.vmem [shape: bf16[64,256], index: 1, kind: input, shape index: {}]   ;;  %s12092_s2 = inlined_call_operand.vmem [shape: bf16[32,64], index: 2, kind: input, shape index: {}]   ;;  %s12093_s3 = inlined_call_operand.vmem [shape: bf16[256,128], index: 3, kind: input, shape index: {}]   ;;  %s12094_s4 = inlined_call_operand.vmem [shape: f32[1,128], index: 4, kind: input, shape index: {}]   ;;  %s12095_s5 = inlined_call_operand.vmem [shape: bf16[128,128], index: 5, kind: input, shape index: {}]   ;;  %s12096_s6 = inlined_call_operand.vmem [shape: f32[1,128], index: 6, kind: input, shape index: {}]   ;;  %s12097_s7 = inlined_call_operand.vmem [shape: bf16[1152,128], index: 7, kind: input, shape index: {}]   ;;  %s12098_s8 = inlined_call_operand.vmem [shape: f32[1,128], index: 8, kind: input, shape index: {}]   ;;  %s12099_s9 = inlined_call_operand.vmem [shape: bf16[128,384], index: 9, kind: input, shape index: {}]   ;;  %s12100_s10 = inlined_call_operand.vmem [shape: f32[1,384], index: 10, kind: input, shape index: {}]   ;;  %s12101_s11 = inlined_call_operand.vmem [shape: bf16[1152,128], index: 11, kind: input, shape index: {}]   ;;  %s12102_s12 = inlined_call_operand.vmem [shape: f32[1,128], index: 12, kind: input, shape index: {}]   ;;  %s12103_s13 = inlined_call_operand.vmem [shape: bf16[1152,128], index: 13, kind: input, shape index: {}]   ;;  %s12104_s14 = inlined_call_operand.vmem [shape: f32[1,128], index: 14, kind: input, shape index: {}]   ;;  %s12105_s15 = inlined_call_operand.vmem [shape: bf16[1152,128], index: 15, kind: input, shape index: {}]   ;;  %s12106_s16 = inlined_call_operand.vmem [shape: f32[1,128], index: 16, kind: input, shape index: {}]   ;;  %s12107_s17 = inlined_call_operand.vmem [shape: bf16[128,128], index: 17, kind: input, shape index: {}]   ;;  %s12108_s18 = inlined_call_operand.vmem [shape: f32[1,128], index: 18, kind: input, shape index: {}]   ;;  %s12109_s19 = inlined_call_operand.vmem [shape: bf16[512,128], index: 19, kind: input, shape index: {}]   ;;  %s12110_s20 = inlined_call_operand.vmem [shape: f32[1,128], index: 20, kind: input, shape index: {}]   ;;  %s12111_s21 = inlined_call_operand.hbm [shape: f32[2,1,128], index: 21, kind: output, shape index: {}]  }
   0x1   :  { %12126 = sst [smem:[#allocation11_spill]] %s12090_s0 }
   0x2   :  { %12127 = sst [smem:[#allocation12_spill]] %s12091_s1 }
   0x3   :  { %12128 = sst [smem:[#allocation13_spill]] %s12092_s2 }
   0x4   :  { %12129 = sst [smem:[#allocation14_spill]] %s12093_s3 }
   0x5   :  { %12130 = sst [smem:[#allocation15_spill]] %s12094_s4 }
   0x6   :  { %12131 = sst [smem:[#allocation16_spill]] %s12095_s5 }
   0x7   :  { %12132 = sst [smem:[#allocation17_spill]] %s12096_s6 }
   0x8   :  { %12133 = sst [smem:[#allocation18_spill]] %s12097_s7 }
   0x9   :  { %12134 = sst [smem:[#allocation19_spill]] %s12111_s21 }
   0xa   :  { %26 = vsyncpa [#allocation3], 0 }
   0xb   :  { %28 = vsyncpa [#allocation3 + $0x1], 0  ;;  %s9778_s2 = smov 0   ;;  %s9780_s25 = smov 0  }
   0xc   :  { %s9782_s26 = smov 0   ;;  %s9784_s27 = smov 0  }
   0xd LB: > { %12135 = sst [smem:[#allocation5_spill]] %s9652_s2  ;;  %s9799_s3 = sadd.s32 4294967295, %s9664_s27   ;;  %s9664_s27 = sphi %s9784_s27, %s12172_s27   ;;  %s9660_s26 = sphi %s9782_s26, %s12174_s26   ;;  %s9656_s25 = sphi %s9780_s25, %s12176_s25   ;;  %s9652_s2 = sphi %s9778_s2, %s12175_s2  }
   0xe   : > { %12136 = sst [smem:[#allocation6_spill]] %s9660_s26  ;;  %s7592_s28 = sadd.s32 4294967294, %s9664_s27  }
   0xf   : > { %12137 = sst [smem:[#allocation7_spill]] %s9664_s27  ;;  %s9803_s29 = sadd.s32 1, %s9664_s27  }
  0x10   : > { %12138 = sst [smem:[#allocation8_spill]] %s9803_s29  ;;  %s487_s0 = sadd.s32 1, %s9660_s26 }
  0x11   : > { %s484_s4 = ssub.s32 %s9664_s27, %s9803_s29  ;;  %p497_p0 = scmp.ne.s32.totalorder %s9660_s26, %s9656_s25 }
  0x12   : > { %p485_p1 = scmp.eq.s32.totalorder %s484_s4, 0  ;;  %p498_p2 = scmp.eq.s32.totalorder %s9799_s3, 1 }
  0x13   : > { %p503_p3 = scmp.ne.s32.totalorder %s9656_s25, %s9652_s2  ;;  %p504_p4 = scmp.eq.s32.totalorder %s7592_s28, 1 }
  0x14   : > { %s9814_s30 = scalar_select %p485_p1, %s9660_s26, %s487_s0  }
  0x15   : > { %p9816_p5 = por %p498_p2, %p497_p0  ;;  %p9820_p6 = por %p504_p4, %p503_p3 }
  0x16   : > { %12139 = sst [smem:[#allocation9_spill]] %s9814_s30  ;;  %p7595_p7 = scmp.ge.s32.totalorder %s9664_s27, 1 }
  0x17   : > { %s12141_s22 = scalar_select %p9820_p6, 1, 0 }
  0x18   : > { %p590_p8 = scmp.lt.s32.totalorder %s9664_s27, 3 }
  0x19   : > { %12142 = sst [smem:[#allocation10_spill]] %s12141_s22 }
  0x1a   : > { %p591_p9 = pnand %p7595_p7, %p590_p8 }
  0x1b   : > { %s12143_s24 = sld [smem:[#allocation14_spill]] (!%p591_p9)  ;;  %p649_p10 = scmp.lt.s32.totalorder (!%p591_p9), %s9799_s3, 1  ;;  %vm1347_vm0 = vsmask.f32 (!%p591_p9), 256  ;;  %vm1346_vm1 = vcmask (!%p591_p9), 1040384   ;;  %v9666_v44 = vmov (!%p591_p9), 0  }
  0x1c   : > { %594 = sbr.rel (%p591_p9) target bundleno = 2627 (0xa43), region = 104  ;;  %s12144_s28 = sld [smem:[#allocation11_spill]] (!%p591_p9)  ;;  %vm9908_vm2 = vmand (!%p591_p9), %vm1346_vm1, %vm1347_vm0  ;;  %v1196_v45 = vrot.slane (!%p591_p9), %v9666_v44, 7  ;;  %vm1383_vm3 = vsmask.f32 (!%p591_p9), 7424  ;;  %vm1640_vm4 = vcmask (!%p591_p9), 1046528  }
  0x1d   : > { %s12147_s23 = sld [smem:[#allocation15_spill]] (!%p591_p9)  ;;  %s12148_s27 = sld [smem:[#allocation12_spill]] (!%p591_p9)  ;;  %vm2193_vm5 = vcmask (!%p591_p9), 1044480   ;;  %vm2194_vm6 = vsmask.f32 (!%p591_p9), 4352  ;;  %vm3579_vm8 = vcmask (!%p591_p9), 523264  }
  0x1e   : > { %v9917_v48 = vsel (!%p591_p9), %vm9908_vm2, 0, %v1196_v45  ;;  %v1366_v56 = vsel (!%p591_p9), %vm9908_vm2, %v1196_v45, 0  ;;  %s12150_s26 = sld [smem:[#allocation16_spill]] (!%p591_p9)  ;;  %s12152_s7 = sld [smem:[#allocation18_spill]] (!%p591_p9)  ;;  %vm10302_vm7 = vmand (!%p591_p9), %vm2193_vm5, %vm2194_vm6  ;;  %vm6954_vm9 = vcmask (!%p591_p9), 1045504  }
  0x1f   : > { %v1387_v52 = vshll.u32 (!%p591_p9), %v9917_v48, 16  ;;  %v1385_v59 = vshrl.u32 (!%p591_p9), %v9917_v48, 16  ;;  %s12153_s6 = sld [smem:[#allocation17_spill]] (!%p591_p9)  ;;  %s8145_s4 = sshll.u32 (!%p591_p9), %s9799_s3, 4 }
  0x21   : > { %v9155_v0 = vld [vmem:[%s12143_s24 + $0x40] sm:$0xff] (!%p591_p9)   ;;  %v9157_v2 = vld [vmem:[%s12143_s24 + $0x48] sm:$0xff] (!%p591_p9)   ;;  %v9159_v4 = vld [vmem:[%s12143_s24 + $0x50] sm:$0xff] (!%p591_p9)   ;;  %v1389_v61 = vrot.slane (!%p591_p9), %v1387_v52, 1 }
  0x22   : > { %v9156_v1 = vld [vmem:[%s12143_s24] sm:$0xff] (!%p591_p9)   ;;  %8171 = vmatprep.subr.bf16.mxu0 (!%p591_p9), %v9155_v0  ;;  %v9158_v3 = vld [vmem:[%s12143_s24 + $0x8] sm:$0xff] (!%p591_p9)   ;;  %v9160_v5 = vld [vmem:[%s12143_s24 + $0x10] sm:$0xff] (!%p591_p9)  }
  0x23   : > { %8172 = vmatpush3.bf16.msra.mxu0 %v9156_v1  ;;  %s650_s0 = scalar_select %p649_p10, %s9799_s3, 1  ;;  %v9161_v6 = vld [vmem:[%s12143_s24 + $0x58] sm:$0xff]   ;;  %v9163_v8 = vld [vmem:[%s12143_s24 + $0x60] sm:$0xff]   ;;  %v9165_v10 = vld [vmem:[%s12143_s24 + $0x68] sm:$0xff]  }
  0x24   : > { %8173 = vmatprep.subr.bf16.mxu0 %v9157_v2  ;;  %v9162_v7 = vld [vmem:[%s12143_s24 + $0x18] sm:$0xff]   ;;  %v9164_v9 = vld [vmem:[%s12143_s24 + $0x20] sm:$0xff]   ;;  %v9166_v12 = vld [vmem:[%s12143_s24 + $0x28] sm:$0xff]   ;;  %v1392_v2 = vshll.u32 %v1366_v56, 16  ;;  %s12149_s1 = smov %s12148_s27  ;;  %s9667_s3 = smov [#allocation2]  }
  0x25   : > { %s8148_s2 = sshll.u32 %s650_s0, 8  ;;  %v9167_v13 = vld [vmem:[%s12143_s24 + $0x70] sm:$0xff]   ;;  %v9169_v15 = vld [vmem:[%s12143_s24 + $0x78] sm:$0xff]   ;;  %v9926_v53 = vld [vmem:[%s12147_s23] ss:$0 sm:$0xff]  ;;  %s12151_s0 = smov %s12150_s26 }
  0x26   : > { %s9858_s21 = scalar_lea.vmem %s12144_s28, %s8148_s2  ;;  %v9168_v14 = vld [vmem:[%s12143_s24 + $0x30] sm:$0xff]   ;;  %v9170_v16 = vld [vmem:[%s12143_s24 + $0x38] sm:$0xff]   ;;  %s647_s28 = sand.u32 1, %s9656_s25  }
  0x27   : > { %8174 = vmatpush3.bf16.msra.mxu0 %v9158_v3  ;;  %v9173_v11 = vld [vmem:[%s9858_s21 + $0x4] ss:$8 sps:$4 sm:$0xff]   ;;  %v9171_v17 = vld [vmem:[%s9858_s21] ss:$8 sps:$4 sm:$0xff]   ;;  %v9174_v18 = vld [vmem:[%s9858_s21 + $0x14] ss:$8 sps:$4 sm:$0xff]  }
  0x28   : > { %8175 = vmatprep.subr.bf16.mxu0 %v9159_v4  ;;  %1016 = vmatprep.mubr.bf16.mxu0 %v9173_v11  ;;  %v9176_v19 = vld [vmem:[%s9858_s21 + $0x10] ss:$8 sps:$4 sm:$0xff]   ;;  %v9177_v20 = vld [vmem:[%s9858_s21 + $0x24] ss:$8 sps:$4 sm:$0xff]   ;;  %v9179_v21 = vld [vmem:[%s9858_s21 + $0x20] ss:$8 sps:$4 sm:$0xff]   ;;  %v1390_v11 = vor.u32 %v1389_v61, %v1385_v59 }
  0x29   : > { %v9180_v22 = vld [vmem:[%s9858_s21 + $0x34] ss:$8 sps:$4 sm:$0xff]   ;;  %v9182_v23 = vld [vmem:[%s9858_s21 + $0x30] ss:$8 sps:$4 sm:$0xff]   ;;  %v9183_v24 = vld [vmem:[%s9858_s21 + $0x44] ss:$8 sps:$4 sm:$0xff]  }
  0x2a   : > { %v9185_v25 = vld [vmem:[%s9858_s21 + $0x40] ss:$8 sps:$4 sm:$0xff]   ;;  %v9186_v26 = vld [vmem:[%s9858_s21 + $0x54] ss:$8 sps:$4 sm:$0xff]   ;;  %v9188_v27 = vld [vmem:[%s9858_s21 + $0x50] ss:$8 sps:$4 sm:$0xff]  }
  0x2b   : > { %8176 = vmatpush3.bf16.msra.mxu0 %v9160_v5  ;;  %v9189_v28 = vld [vmem:[%s9858_s21 + $0x64] ss:$8 sps:$4 sm:$0xff]   ;;  %v9191_v29 = vld [vmem:[%s9858_s21 + $0x60] ss:$8 sps:$4 sm:$0xff]   ;;  %v9192_v30 = vld [vmem:[%s9858_s21 + $0x74] ss:$8 sps:$4 sm:$0xff]  }
  0x2c   : > { %8177 = vmatprep.subr.bf16.mxu0 %v9161_v6  ;;  %v9194_v31 = vld [vmem:[%s9858_s21 + $0x70] ss:$8 sps:$4 sm:$0xff]   ;;  %v9195_v32 = vld [vmem:[%s9858_s21 + $0x84] ss:$8 sps:$4 sm:$0xff]   ;;  %v9197_v33 = vld [vmem:[%s9858_s21 + $0x80] ss:$8 sps:$4 sm:$0xff]  }
  0x2d   : > { %v9198_v34 = vld [vmem:[%s9858_s21 + $0x94] ss:$8 sps:$4 sm:$0xff]   ;;  %v9200_v35 = vld [vmem:[%s9858_s21 + $0x90] ss:$8 sps:$4 sm:$0xff]   ;;  %v9201_v36 = vld [vmem:[%s9858_s21 + $0xa4] ss:$8 sps:$4 sm:$0xff]  }
  0x2e   : > { %v9203_v37 = vld [vmem:[%s9858_s21 + $0xa0] ss:$8 sps:$4 sm:$0xff]   ;;  %v9204_v38 = vld [vmem:[%s9858_s21 + $0xb4] ss:$8 sps:$4 sm:$0xff]   ;;  %v9206_v39 = vld [vmem:[%s9858_s21 + $0xb0] ss:$8 sps:$4 sm:$0xff]  }
  0x2f   : > { %8178 = vmatpush3.bf16.msra.mxu0 %v9162_v7  ;;  %v9207_v40 = vld [vmem:[%s9858_s21 + $0xc4] ss:$8 sps:$4 sm:$0xff]   ;;  %v9209_v41 = vld [vmem:[%s9858_s21 + $0xc0] ss:$8 sps:$4 sm:$0xff]   ;;  %v9210_v42 = vld [vmem:[%s9858_s21 + $0xd4] ss:$8 sps:$4 sm:$0xff]  }
  0x30   : > { %8179 = vmatprep.subr.bf16.mxu0 %v9163_v8  ;;  %v9212_v46 = vld [vmem:[%s9858_s21 + $0xd0] ss:$8 sps:$4 sm:$0xff]   ;;  %v9213_v47 = vld [vmem:[%s9858_s21 + $0xe4] ss:$8 sps:$4 sm:$0xff]   ;;  %v9215_v49 = vld [vmem:[%s9858_s21 + $0xe0] ss:$8 sps:$4 sm:$0xff]  }
  0x31   : > { %v9216_v50 = vld [vmem:[%s9858_s21 + $0xf4] ss:$8 sps:$4 sm:$0xff]   ;;  %v9218_v51 = vld [vmem:[%s9858_s21 + $0xf0] ss:$8 sps:$4 sm:$0xff]  }
  0x33   : > { %8180 = vmatpush3.bf16.msra.mxu0 %v9164_v9  ;;  %v1394_v9 = vrot.slane %v1392_v2, 1 }
  0x34   : > { %8181 = vmatprep.subr.bf16.mxu0 %v9165_v10 }
  0x37   : > { %8182 = vmatpush3.bf16.msra.mxu0 %v9166_v12  ;;  %v1641_v12 = vrot.slane %v9917_v48, 1 }
  0x38   : > { %8183 = vmatprep.subr.bf16.mxu0 %v9167_v13 }
  0x3b   : > { %8184 = vmatpush3.bf16.msra.mxu0 %v9168_v14 }
  0x3c   : > { %8185 = vmatprep.subr.bf16.mxu0 %v9169_v15 }
  0x3f   : > { %8186 = vmatpush3.bf16.msra.mxu0 %v9170_v16  ;;  %v1642_v16 = vrot.slane %v1366_v56, 1 }
  0x42   : > { %1017 = vmatmul.mubr.bf16.vlgmr.msra.gmra.mrb[0].mxu0 %v9171_v17 }
  0x43   : > { %1024 = vmatprep.mubr.bf16.mxu0 %v9174_v18 }
  0x4a   : > { %1025 = vmatmul.mubr.bf16.gmra.mrb[4].mxu0 %v9176_v19 }
  0x4b   : > { %1032 = vmatprep.mubr.bf16.mxu0 %v9177_v20  ;;  %v9937_v20 = vsel %vm1383_vm3, %v1390_v11, %v1394_v9 }
  0x52   : > { %1033 = vmatmul.mubr.bf16.gmra.mrb[8].mxu0 %v9179_v21 }
  0x53   : > { %1040 = vmatprep.mubr.bf16.mxu0 %v9180_v22 }
  0x5a   : > { %1041 = vmatmul.mubr.bf16.gmra.mrb[12].mxu0 %v9182_v23 }
  0x5b   : > { %1048 = vmatprep.mubr.bf16.mxu0 %v9183_v24 }
  0x62   : > { %1049 = vmatmul.mubr.bf16.gmra.mrb[16].mxu0 %v9185_v25 }
  0x63   : > { %1056 = vmatprep.mubr.bf16.mxu0 %v9186_v26 }
  0x6a   : > { %1057 = vmatmul.mubr.bf16.gmra.mrb[20].mxu0 %v9188_v27 }
  0x6b   : > { %1064 = vmatprep.mubr.bf16.mxu0 %v9189_v28 }
  0x72   : > { %1065 = vmatmul.mubr.bf16.gmra.mrb[24].mxu0 %v9191_v29 }
  0x73   : > { %1072 = vmatprep.mubr.bf16.mxu0 %v9192_v30 }
  0x7a   : > { %1073 = vmatmul.mubr.bf16.gmra.mrb[28].mxu0 %v9194_v31 }
  0x7b   : > { %1080 = vmatprep.mubr.bf16.mxu0 %v9195_v32 }
  0x82   : > { %1081 = vmatmul.mubr.bf16.gmra.mrb[32].mxu0 %v9197_v33 }
  0x83   : > { %1088 = vmatprep.mubr.bf16.mxu0 %v9198_v34 }
  0x8a   : > { %1089 = vmatmul.mubr.bf16.gmra.mrb[36].mxu0 %v9200_v35  ;;  %v1592_v35 = vmax.bf16 %v9937_v20, %v9917_v48 }
  0x8b   : > { %1096 = vmatprep.mubr.bf16.mxu0 %v9201_v36  ;;  %v9946_v36 = vsel %vm1640_vm4, %v1641_v12, %v1642_v16 }
  0x92   : > { %1097 = vmatmul.mubr.bf16.gmra.mrb[40].mxu0 %v9203_v37 }
  0x93   : > { %1104 = vmatprep.mubr.bf16.mxu0 %v9204_v38 }
  0x9a   : > { %1105 = vmatmul.mubr.bf16.gmra.mrb[44].mxu0 %v9206_v39 }
  0x9b   : > { %1112 = vmatprep.mubr.bf16.mxu0 %v9207_v40 }
  0xa2   : > { %1113 = vmatmul.mubr.bf16.gmra.mrb[48].mxu0 %v9209_v41 }
  0xa3   : > { %1120 = vmatprep.mubr.bf16.mxu0 %v9210_v42 }
  0xaa   : > { %1121 = vmatmul.mubr.bf16.gmra.mrb[52].mxu0 %v9212_v46 }
  0xab   : > { %1128 = vmatprep.mubr.bf16.mxu0 %v9213_v47 }
  0xb2   : > { %1129 = vmatmul.mubr.bf16.gmra.mrb[56].mxu0 %v9215_v49 }
  0xb3   : > { %1136 = vmatprep.mubr.bf16.mxu0 %v9216_v50  ;;  %v1705_v50 = vmax.bf16 %v9946_v36, %v1592_v35 }
  0xba   : > { %1137 = vmatmul.mubr.bf16.gmra.mrb[60].mxu0 %v9218_v51 }
 0x115   : > { %v8187_v54 = vpop.f32.mrb[0].mxu0 }
 0x116   : > { %v8188_v55 = vpop.f32.mrb[1].mxu0 }
 0x117   : > { %v8189_v57 = vadd.f32 %v8188_v55, %v8187_v54  ;;  %v8190_v58 = vpop.f32.mrb[2].mxu0 }
 0x118   : > { %v8191_v60 = vpop.f32.mrb[3].mxu0 }
 0x119   : > { %v1019_v62 = vadd.f32 %v8189_v57, %v9926_v53  ;;  %v8192_v63 = vadd.f32 %v8191_v60, %v8190_v58 }
 0x11b   : > { %v1145_v0 = vmax.f32 %v1019_v62, 0.0  ;;  %v1022_v1 = vadd.f32 %v8192_v63, %v9926_v53 }
 0x11d   : > { %v1146_v3 = vmax.f32 %v1022_v1, 0.0  ;;  %v8193_v4 = vpop.f32.mrb[4].mxu0 }
 0x11e   : > { %v8194_v5 = vpop.f32.mrb[5].mxu0 }
 0x11f   : > { %v1177_v6 = vpack.c.bf16 %v1146_v3, %v1145_v0  ;;  %v8195_v7 = vadd.f32 %v8194_v5, %v8193_v4  ;;  %v8196_v8 = vpop.f32.mrb[6].mxu0 }
 0x120   : > { %v8197_v10 = vpop.f32.mrb[7].mxu0 }
 0x121   : > { %v1201_v13 = vshrl.u32 %v1177_v6, 16  ;;  %v1027_v14 = vadd.f32 %v8195_v7, %v9926_v53  ;;  %v8198_v15 = vadd.f32 %v8197_v10, %v8196_v8  ;;  %v1204_v18 = vshll.u32 %v1177_v6, 16 }
 0x123   : > { %v1203_v17 = vrot.slane %v1201_v13, 7  ;;  %v1030_v19 = vadd.f32 %v8198_v15, %v9926_v53  ;;  %v1147_v23 = vmax.f32 %v1027_v14, 0.0  ;;  %v9221_v15 = vld [vmem:[%s12148_s27 + $0x4] ss:$8 sps:$4 sm:$0xff]   ;;  %s7525_s27 = scalar_lea.sflag [#allocation3], %s647_s28 }
 0x124   : > { %1916 = vmatprep.mubr.bf16.mxu1 %v9221_v15 }
 0x125   : > { %v1206_v21 = vor.u32 %v1204_v18, %v1203_v17  ;;  %v1367_v22 = vsel %vm9908_vm2, %v1203_v17, 0  ;;  %v1148_v24 = vmax.f32 %v1030_v19, 0.0  ;;  %v8199_v25 = vpop.f32.mrb[8].mxu0 }
 0x126   : > { %v1404_v26 = vshll.u32 %v1367_v22, 16  ;;  %v8200_v27 = vpop.f32.mrb[9].mxu0  ;;  %v1645_v57 = vrot.slane %v1367_v22, 1 }
 0x127   : > { %v1350_v28 = vsel %vm9908_vm2, 0, %v1206_v21  ;;  %v1178_v29 = vpack.c.bf16 %v1148_v24, %v1147_v23  ;;  %v8201_v30 = vadd.f32 %v8200_v27, %v8199_v25  ;;  %v8202_v31 = vpop.f32.mrb[10].mxu0 }
 0x128   : > { %v1399_v32 = vshll.u32 %v1350_v28, 16  ;;  %v1406_v33 = vrot.slane %v1404_v26, 1  ;;  %v8203_v34 = vpop.f32.mrb[11].mxu0  ;;  %v1397_v40 = vshrl.u32 %v1350_v28, 16  ;;  %v1644_v42 = vrot.slane %v1350_v28, 1 }
 0x129   : > { %v1208_v37 = vshrl.u32 %v1178_v29, 16  ;;  %v1035_v38 = vadd.f32 %v8201_v30, %v9926_v53  ;;  %v8204_v39 = vadd.f32 %v8203_v34, %v8202_v31  ;;  %v1211_v46 = vshll.u32 %v1178_v29, 16 }
 0x12a   : > { %v1401_v41 = vrot.slane %v1399_v32, 1  ;;  %v1646_v5 = vsel %vm1640_vm4, %v1644_v42, %v1645_v57  ;;  %v1721_v6 = vmax.bf16 %v1705_v50, %v1350_v28 }
 0x12b   : > { %v1210_v45 = vrot.slane %v1208_v37, 7  ;;  %v1038_v47 = vadd.f32 %v8204_v39, %v9926_v53  ;;  %v1149_v52 = vmax.f32 %v1035_v38, 0.0 }
 0x12c   : > { %v1402_v49 = vor.u32 %v1401_v41, %v1397_v40 }
 0x12d   : > { %v1213_v51 = vor.u32 %v1211_v46, %v1210_v45  ;;  %v1150_v54 = vmax.f32 %v1038_v47, 0.0  ;;  %v8205_v55 = vpop.f32.mrb[12].mxu0  ;;  %v1368_v56 = vsel %vm9908_vm2, %v1210_v45, 0 }
 0x12e   : > { %v8206_v58 = vpop.f32.mrb[13].mxu0  ;;  %v1407_v59 = vsel %vm1383_vm3, %v1402_v49, %v1406_v33  ;;  %v1416_v60 = vshll.u32 %v1368_v56, 16  ;;  %v1648_v30 = vrot.slane %v1368_v56, 1 }
 0x12f   : > { %v1351_v61 = vsel %vm9908_vm2, 0, %v1213_v51  ;;  %v1179_v62 = vpack.c.bf16 %v1150_v54, %v1149_v52  ;;  %v8207_v63 = vadd.f32 %v8206_v58, %v8205_v55  ;;  %v8208_v0 = vpop.f32.mrb[14].mxu0  ;;  %v1593_v1 = vmax.bf16 %v1407_v59, %v1350_v28 }
 0x130   : > { %v8209_v2 = vpop.f32.mrb[15].mxu0  ;;  %v1409_v3 = vshrl.u32 %v1351_v61, 16  ;;  %v1411_v4 = vshll.u32 %v1351_v61, 16  ;;  %v1418_v10 = vrot.slane %v1416_v60, 1  ;;  %v1647_v12 = vrot.slane %v1351_v61, 1 }
 0x131   : > { %v1215_v7 = vshrl.u32 %v1179_v62, 16  ;;  %v1043_v8 = vadd.f32 %v8207_v63, %v9926_v53  ;;  %v8210_v9 = vadd.f32 %v8209_v2, %v8208_v0  ;;  %v1706_v13 = vmax.bf16 %v1646_v5, %v1593_v1 }
 0x132   : > { %v1413_v11 = vrot.slane %v1411_v4, 1  ;;  %v1750_v14 = vmax.bf16 %v1721_v6, %v1407_v59  ;;  %v1218_v17 = vshll.u32 %v1179_v62, 16  ;;  %v1649_v39 = vsel %vm1640_vm4, %v1647_v12, %v1648_v30 }
 0x133   : > { %v1217_v16 = vrot.slane %v1215_v7, 7  ;;  %v1046_v18 = vadd.f32 %v8210_v9, %v9926_v53  ;;  %v1722_v21 = vmax.bf16 %v1706_v13, %v1351_v61  ;;  %v1151_v24 = vmax.f32 %v1043_v8, 0.0 }
 0x134   : > { %v1414_v19 = vor.u32 %v1413_v11, %v1409_v3  ;;  %v1772_v22 = vmax.bf16 %v1750_v14, %v1646_v5 }
 0x135   : > { %v1220_v23 = vor.u32 %v1218_v17, %v1217_v16  ;;  %v1152_v25 = vmax.f32 %v1046_v18, 0.0  ;;  %v8211_v26 = vpop.f32.mrb[16].mxu0  ;;  %v1369_v27 = vsel %vm9908_vm2, %v1217_v16, 0 }
 0x136   : > { %v8212_v28 = vpop.f32.mrb[17].mxu0  ;;  %v1419_v29 = vsel %vm1383_vm3, %v1414_v19, %v1418_v10  ;;  %v1788_v31 = vmax.bf16 %v1772_v22, %v1351_v61  ;;  %v1428_v42 = vshll.u32 %v1369_v27, 16  ;;  %v1651_v4 = vrot.slane %v1369_v27, 1 }
 0x137   : > { %v1352_v32 = vsel %vm9908_vm2, 0, %v1220_v23  ;;  %v1180_v33 = vpack.c.bf16 %v1152_v25, %v1151_v24  ;;  %v8213_v34 = vadd.f32 %v8212_v28, %v8211_v26  ;;  %v8214_v35 = vpop.f32.mrb[18].mxu0  ;;  %v1594_v37 = vmax.bf16 %v1419_v29, %v1351_v61 }
 0x138   : > { %v8215_v38 = vpop.f32.mrb[19].mxu0  ;;  %v1751_v40 = vmax.bf16 %v1722_v21, %v1419_v29  ;;  %v1804_v41 = vmax.bf16 %v1788_v31, %v1419_v29  ;;  %v1423_v52 = vshll.u32 %v1352_v32, 16  ;;  %v1421_v57 = vshrl.u32 %v1352_v32, 16 }
 0x139   : > { %v1222_v45 = vshrl.u32 %v1180_v33, 16  ;;  %v1051_v46 = vadd.f32 %v8213_v34, %v9926_v53  ;;  %v8216_v47 = vadd.f32 %v8215_v38, %v8214_v35  ;;  %v1707_v49 = vmax.bf16 %v1649_v39, %v1594_v37 }
 0x13a   : > { %v1773_v50 = vmax.bf16 %v1751_v40, %v1649_v39  ;;  %v9969_v51 = vmax.bf16 %v1804_v41, %v1649_v39  ;;  %v1225_v55 = vshll.u32 %v1180_v33, 16  ;;  %v1425_v59 = vrot.slane %v1423_v52, 1 }
 0x13b   : > { %v1224_v54 = vrot.slane %v1222_v45, 7  ;;  %v1054_v56 = vadd.f32 %v8216_v47, %v9926_v53  ;;  %v1723_v58 = vmax.bf16 %v1707_v49, %v1352_v32  ;;  %v1650_v60 = vrot.slane %v1352_v32, 1 }
 0x13c   : > { %v1789_v61 = vmax.bf16 %v1773_v50, %v1352_v32  ;;  %v1153_v0 = vmax.f32 %v1051_v46, 0.0  ;;  %v1430_v3 = vrot.slane %v1428_v42, 1  ;;  %v1426_v7 = vor.u32 %v1425_v59, %v1421_v57 }
 0x13d   : > { %v1227_v62 = vor.u32 %v1225_v55, %v1224_v54  ;;  %v1370_v63 = vsel %vm9908_vm2, %v1224_v54, 0  ;;  %v1154_v1 = vmax.f32 %v1054_v56, 0.0  ;;  %v8217_v2 = vpop.f32.mrb[20].mxu0  ;;  %v1652_v15 = vsel %vm1640_vm4, %v1650_v60, %v1651_v4 }
 0x13e   : > { %v1440_v5 = vshll.u32 %v1370_v63, 16  ;;  %v8218_v6 = vpop.f32.mrb[21].mxu0  ;;  %v1431_v14 = vsel %vm1383_vm3, %v1426_v7, %v1430_v3  ;;  %v1654_v40 = vrot.slane %v1370_v63, 1 }
 0x13f   : > { %v1353_v8 = vsel %vm9908_vm2, 0, %v1227_v62  ;;  %v1181_v9 = vpack.c.bf16 %v1154_v1, %v1153_v0  ;;  %v8219_v10 = vadd.f32 %v8218_v6, %v8217_v2  ;;  %v8220_v11 = vpop.f32.mrb[22].mxu0  ;;  %v1595_v22 = vmax.bf16 %v1431_v14, %v1352_v32 }
 0x140   : > { %v1442_v12 = vrot.slane %v1440_v5, 1  ;;  %v8221_v13 = vpop.f32.mrb[23].mxu0  ;;  %v1435_v16 = vshll.u32 %v1353_v8, 16  ;;  %v1433_v21 = vshrl.u32 %v1353_v8, 16  ;;  %v1752_v23 = vmax.bf16 %v1723_v58, %v1431_v14 }
 0x141   : > { %v1229_v17 = vshrl.u32 %v1181_v9, 16  ;;  %v1059_v18 = vadd.f32 %v8219_v10, %v9926_v53  ;;  %v8222_v19 = vadd.f32 %v8221_v13, %v8220_v11  ;;  %v1805_v24 = vmax.bf16 %v1789_v61, %v1431_v14 }
 0x142   : > { %v1437_v25 = vrot.slane %v1435_v16, 1  ;;  %v1232_v27 = vshll.u32 %v1181_v9, 16  ;;  %v1653_v29 = vrot.slane %v1353_v8, 1  ;;  %v1708_v30 = vmax.bf16 %v1652_v15, %v1595_v22 }
 0x143   : > { %v1231_v26 = vrot.slane %v1229_v17, 7  ;;  %v1062_v28 = vadd.f32 %v8222_v19, %v9926_v53  ;;  %v1774_v31 = vmax.bf16 %v1752_v23, %v1652_v15  ;;  %v9980_v33 = vmax.bf16 %v1805_v24, %v1652_v15 }
 0x144   : > { %v1438_v34 = vor.u32 %v1437_v25, %v1433_v21  ;;  %v1155_v38 = vmax.f32 %v1059_v18, 0.0  ;;  %v1724_v42 = vmax.bf16 %v1708_v30, %v1353_v8  ;;  %v1655_v56 = vsel %vm1640_vm4, %v1653_v29, %v1654_v40 }
 0x145   : > { %v1234_v35 = vor.u32 %v1232_v27, %v1231_v26  ;;  %v1371_v37 = vsel %vm9908_vm2, %v1231_v26, 0  ;;  %v1156_v39 = vmax.f32 %v1062_v28, 0.0  ;;  %v8223_v32 = vpop.f32.mrb[24].mxu0  ;;  %v1790_v58 = vmax.bf16 %v1774_v31, %v1353_v8 }
 0x146   : > { %v8224_v41 = vpop.f32.mrb[25].mxu0  ;;  %v1443_v45 = vsel %vm1383_vm3, %v1438_v34, %v1442_v12  ;;  %v1452_v54 = vshll.u32 %v1371_v37, 16  ;;  %v1657_v17 = vrot.slane %v1371_v37, 1 }
 0x147   : > { %v1354_v46 = vsel %vm9908_vm2, 0, %v1234_v35  ;;  %v1182_v47 = vpack.c.bf16 %v1156_v39, %v1155_v38  ;;  %v8225_v49 = vadd.f32 %v8224_v41, %v8223_v32  ;;  %v8226_v50 = vpop.f32.mrb[26].mxu0  ;;  %v1596_v52 = vmax.bf16 %v1443_v45, %v1353_v8 }
 0x148   : > { %v8227_v55 = vpop.f32.mrb[27].mxu0  ;;  %v1753_v57 = vmax.bf16 %v1724_v42, %v1443_v45  ;;  %v1445_v62 = vshrl.u32 %v1354_v46, 16  ;;  %v1806_v1 = vmax.bf16 %v1790_v58, %v1443_v45  ;;  %v1447_v2 = vshll.u32 %v1354_v46, 16 }
 0x149   : > { %v1236_v59 = vshrl.u32 %v1182_v47, 16  ;;  %v1067_v60 = vadd.f32 %v8225_v49, %v9926_v53  ;;  %v8228_v61 = vadd.f32 %v8227_v55, %v8226_v50  ;;  %v1709_v63 = vmax.bf16 %v1655_v56, %v1596_v52 }
 0x14a   : > { %v1775_v0 = vmax.bf16 %v1753_v57, %v1655_v56  ;;  %v1239_v4 = vshll.u32 %v1182_v47, 16  ;;  %v1656_v6 = vrot.slane %v1354_v46, 1  ;;  %v9990_v9 = vmax.bf16 %v1806_v1, %v1655_v56 }
 0x14b   : > { %v1238_v3 = vrot.slane %v1236_v59, 7  ;;  %v1070_v5 = vadd.f32 %v8228_v61, %v9926_v53  ;;  %v1725_v7 = vmax.bf16 %v1709_v63, %v1354_v46  ;;  %v1449_v10 = vrot.slane %v1447_v2, 1 }
 0x14c   : > { %v1791_v11 = vmax.bf16 %v1775_v0, %v1354_v46  ;;  %v1157_v13 = vmax.f32 %v1067_v60, 0.0  ;;  %v1454_v16 = vrot.slane %v1452_v54, 1  ;;  %v1658_v29 = vsel %vm1640_vm4, %v1656_v6, %v1657_v17 }
 0x14d   : > { %v1241_v8 = vor.u32 %v1239_v4, %v1238_v3  ;;  %v1372_v12 = vsel %vm9908_vm2, %v1238_v3, 0  ;;  %v1158_v14 = vmax.f32 %v1070_v5, 0.0  ;;  %v8229_v15 = vpop.f32.mrb[28].mxu0  ;;  %v1450_v21 = vor.u32 %v1449_v10, %v1445_v62 }
 0x14e   : > { %v1464_v18 = vshll.u32 %v1372_v12, 16  ;;  %v8230_v19 = vpop.f32.mrb[29].mxu0  ;;  %v1660_v59 = vrot.slane %v1372_v12, 1 }
 0x14f   : > { %v1355_v22 = vsel %vm9908_vm2, 0, %v1241_v8  ;;  %v1183_v23 = vpack.c.bf16 %v1158_v14, %v1157_v13  ;;  %v8231_v24 = vadd.f32 %v8230_v19, %v8229_v15  ;;  %v8232_v25 = vpop.f32.mrb[30].mxu0  ;;  %v1455_v28 = vsel %vm1383_vm3, %v1450_v21, %v1454_v16 }
 0x150   : > { %v1466_v26 = vrot.slane %v1464_v18, 1  ;;  %v8233_v27 = vpop.f32.mrb[31].mxu0  ;;  %v1459_v30 = vshll.u32 %v1355_v22, 16  ;;  %v1457_v37 = vshrl.u32 %v1355_v22, 16  ;;  %v1597_v38 = vmax.bf16 %v1455_v28, %v1354_v46 }
 0x151   : > { %v1243_v31 = vshrl.u32 %v1183_v23, 16  ;;  %v1075_v34 = vadd.f32 %v8231_v24, %v9926_v53  ;;  %v8234_v35 = vadd.f32 %v8233_v27, %v8232_v25  ;;  %v1754_v39 = vmax.bf16 %v1725_v7, %v1455_v28 }
 0x152   : > { %v1807_v32 = vmax.bf16 %v1791_v11, %v1455_v28  ;;  %v1461_v40 = vrot.slane %v1459_v30, 1  ;;  %v1246_v42 = vshll.u32 %v1183_v23, 16  ;;  %v1659_v47 = vrot.slane %v1355_v22, 1 }
 0x153   : > { %v1245_v41 = vrot.slane %v1243_v31, 7  ;;  %v1078_v45 = vadd.f32 %v8234_v35, %v9926_v53  ;;  %v1710_v49 = vmax.bf16 %v1658_v29, %v1597_v38  ;;  %v1776_v50 = vmax.bf16 %v1754_v39, %v1658_v29 }
 0x154   : > { %v10000_v52 = vmax.bf16 %v1807_v32, %v1658_v29  ;;  %v1462_v54 = vor.u32 %v1461_v40, %v1457_v37  ;;  %v1159_v57 = vmax.f32 %v1075_v34, 0.0  ;;  %v1661_v6 = vsel %vm1640_vm4, %v1659_v47, %v1660_v59 }
 0x155   : > { %v1248_v55 = vor.u32 %v1246_v42, %v1245_v41  ;;  %v1373_v56 = vsel %vm9908_vm2, %v1245_v41, 0  ;;  %v1160_v58 = vmax.f32 %v1078_v45, 0.0  ;;  %v8235_v46 = vpop.f32.mrb[32].mxu0  ;;  %v1726_v61 = vmax.bf16 %v1710_v49, %v1355_v22 }
 0x156   : > { %v8236_v60 = vpop.f32.mrb[33].mxu0  ;;  %v1467_v62 = vsel %vm1383_vm3, %v1462_v54, %v1466_v26  ;;  %v1476_v4 = vshll.u32 %v1373_v56, 16  ;;  %v1792_v10 = vmax.bf16 %v1776_v50, %v1355_v22  ;;  %v1663_v34 = vrot.slane %v1373_v56, 1 }
 0x157   : > { %v10007_v63 = vsel %vm9908_vm2, 0, %v1248_v55  ;;  %v1184_v0 = vpack.c.bf16 %v1160_v58, %v1159_v57  ;;  %v8237_v1 = vadd.f32 %v8236_v60, %v8235_v46  ;;  %v8238_v2 = vpop.f32.mrb[34].mxu0  ;;  %v1598_v3 = vmax.bf16 %v1467_v62, %v1355_v22 }
 0x158   : > { %v8239_v5 = vpop.f32.mrb[35].mxu0  ;;  %v1755_v7 = vmax.bf16 %v1726_v61, %v1467_v62  ;;  %v1469_v13 = vshrl.u32 %v10007_v63, 16  ;;  %v1808_v16 = vmax.bf16 %v1792_v10, %v1467_v62  ;;  %v1471_v17 = vshll.u32 %v10007_v63, 16 }
 0x159   : > { %v1250_v11 = vshrl.u32 %v1184_v0, 16  ;;  %v1083_v8 = vadd.f32 %v8237_v1, %v9926_v53  ;;  %v8240_v12 = vadd.f32 %v8239_v5, %v8238_v2  ;;  %v1711_v14 = vmax.bf16 %v1661_v6, %v1598_v3 }
 0x15a   : > { %v1777_v15 = vmax.bf16 %v1755_v7, %v1661_v6  ;;  %v1253_v19 = vshll.u32 %v1184_v0, 16  ;;  %v1662_v23 = vrot.slane %v10007_v63, 1  ;;  %v10016_v22 = vmax.bf16 %v1808_v16, %v1661_v6 }
 0x15b   : > { %v1252_v18 = vrot.slane %v1250_v11, 7  ;;  %v1086_v21 = vadd.f32 %v8240_v12, %v9926_v53  ;;  %v1727_v24 = vmax.bf16 %v1711_v14, %v10007_v63  ;;  %v1473_v25 = vrot.slane %v1471_v17, 1 }
 0x15c   : > { %v10019_v26 = vmax.bf16 %v1777_v15, %v10007_v63  ;;  %v1161_v29 = vmax.f32 %v1083_v8, 0.0  ;;  %v1478_v42 = vrot.slane %v1476_v4, 1  ;;  %v1664_v49 = vsel %vm1640_vm4, %v1662_v23, %v1663_v34 }
 0x15d   : > { %v1255_v27 = vor.u32 %v1253_v19, %v1252_v18  ;;  %v1374_v28 = vsel %vm9908_vm2, %v1252_v18, 0  ;;  %v1162_v30 = vmax.f32 %v1086_v21, 0.0  ;;  %v8241_v31 = vpop.f32.mrb[36].mxu0  ;;  %v1474_v38 = vor.u32 %v1473_v25, %v1469_v13 }
 0x15e   : > { %v1488_v35 = vshll.u32 %v1374_v28, 16  ;;  %v8242_v37 = vpop.f32.mrb[37].mxu0  ;;  %v1666_v50 = vrot.slane %v1374_v28, 1 }
 0x15f   : > { %v1357_v39 = vsel %vm9908_vm2, 0, %v1255_v27  ;;  %v1185_v32 = vpack.c.bf16 %v1162_v30, %v1161_v29  ;;  %v8243_v40 = vadd.f32 %v8242_v37, %v8241_v31  ;;  %v8244_v41 = vpop.f32.mrb[38].mxu0  ;;  %v1479_v59 = vsel %vm1383_vm3, %v1474_v38, %v1478_v42 }
 0x160   : > { %v1483_v45 = vshll.u32 %v1357_v39, 16  ;;  %v8245_v47 = vpop.f32.mrb[39].mxu0  ;;  %v1481_v56 = vshrl.u32 %v1357_v39, 16  ;;  %v1490_v46 = vrot.slane %v1488_v35, 1  ;;  %v1599_v0 = vmax.bf16 %v1479_v59, %v10007_v63 }
 0x161   : > { %v1257_v54 = vshrl.u32 %v1185_v32, 16  ;;  %v1091_v55 = vadd.f32 %v8243_v40, %v9926_v53  ;;  %v8246_v57 = vadd.f32 %v8245_v47, %v8244_v41  ;;  %v1260_v61 = vshll.u32 %v1185_v32, 16 }
 0x162   : > { %v1485_v58 = vrot.slane %v1483_v45, 1  ;;  %v1665_v2 = vrot.slane %v1357_v39, 1  ;;  %v1756_v3 = vmax.bf16 %v1727_v24, %v1479_v59  ;;  %v1809_v4 = vmax.bf16 %v10019_v26, %v1479_v59 }
 0x163   : > { %v1259_v60 = vrot.slane %v1257_v54, 7  ;;  %v1094_v62 = vadd.f32 %v8246_v57, %v9926_v53  ;;  %v1163_v7 = vmax.f32 %v1091_v55, 0.0  ;;  %v1712_v14 = vmax.bf16 %v1664_v49, %v1599_v0 }
 0x164   : > { %v1486_v1 = vor.u32 %v1485_v58, %v1481_v56  ;;  %v1778_v15 = vmax.bf16 %v1756_v3, %v1664_v49  ;;  %v10040_v25 = vsel %vm1640_vm4, %v1665_v2, %v1666_v50  ;;  %v10047_v40 = vmax.bf16 %v1809_v4, %v1664_v49 }
 0x165   : > { %v1262_v5 = vor.u32 %v1260_v61, %v1259_v60  ;;  %v1375_v6 = vsel %vm9908_vm2, %v1259_v60, 0  ;;  %v1164_v10 = vmax.f32 %v1094_v62, 0.0  ;;  %v8247_v11 = vpop.f32.mrb[40].mxu0  ;;  %v1728_v35 = vmax.bf16 %v1712_v14, %v1357_v39 }
 0x166   : > { %v1491_v8 = vsel %vm1383_vm3, %v1486_v1, %v1490_v46  ;;  %v1500_v12 = vshll.u32 %v1375_v6, 16  ;;  %v8248_v13 = vpop.f32.mrb[41].mxu0  ;;  %v1794_v45 = vmax.bf16 %v1778_v15, %v1357_v39  ;;  %v1669_v58 = vrot.slane %v1375_v6, 1 }
 0x167   : > { %v10036_v63 = vsel %vm9908_vm2, 0, %v1262_v5  ;;  %v1186_v16 = vpack.c.bf16 %v1164_v10, %v1163_v7  ;;  %v8249_v17 = vadd.f32 %v8248_v13, %v8247_v11  ;;  %v8250_v18 = vpop.f32.mrb[42].mxu0  ;;  %v1600_v19 = vmax.bf16 %v1491_v8, %v1357_v39 }
 0x168   : > { %v1502_v21 = vrot.slane %v1500_v12, 1  ;;  %v8251_v23 = vpop.f32.mrb[43].mxu0  ;;  %v1495_v24 = vshll.u32 %v10036_v63, 16  ;;  %v1493_v29 = vshrl.u32 %v10036_v63, 16  ;;  %v1668_v31 = vrot.slane %v10036_v63, 1 }
 0x169   : > { %v1264_v26 = vshrl.u32 %v1186_v16, 16  ;;  %v1099_v27 = vadd.f32 %v8249_v17, %v9926_v53  ;;  %v8252_v28 = vadd.f32 %v8251_v23, %v8250_v18  ;;  %v1713_v34 = vmax.bf16 %v10040_v25, %v1600_v19 }
 0x16a   : > { %v1497_v30 = vrot.slane %v1495_v24, 1  ;;  %v1267_v38 = vshll.u32 %v1186_v16, 16  ;;  %v10050_v47 = vmax.bf16 %v1728_v35, %v1491_v8  ;;  %v1810_v60 = vmax.bf16 %v1794_v45, %v1491_v8 }
 0x16b   : > { %v1266_v37 = vrot.slane %v1264_v26, 7  ;;  %v1102_v32 = vadd.f32 %v8252_v28, %v9926_v53  ;;  %v1729_v42 = vmax.bf16 %v1713_v34, %v10036_v63  ;;  %v1165_v54 = vmax.f32 %v1099_v27, 0.0 }
 0x16c   : > { %v1498_v41 = vor.u32 %v1497_v30, %v1493_v29  ;;  %v10062_v5 = vsel %vm1640_vm4, %v1668_v31, %v1669_v58  ;;  %v10069_v19 = vmax.bf16 %v1810_v60, %v10040_v25  ;;  %v1779_v26 = vmax.bf16 %v10050_v47, %v10040_v25 }
 0x16d   : > { %v1269_v50 = vor.u32 %v1267_v38, %v1266_v37  ;;  %v1166_v55 = vmax.f32 %v1102_v32, 0.0  ;;  %v8253_v57 = vpop.f32.mrb[44].mxu0  ;;  %v1376_v56 = vsel %vm9908_vm2, %v1266_v37, 0 }
 0x16e   : > { %v8254_v46 = vpop.f32.mrb[45].mxu0  ;;  %v10055_v59 = vsel %vm1383_vm3, %v1498_v41, %v1502_v21  ;;  %v1512_v49 = vshll.u32 %v1376_v56, 16  ;;  %v1672_v6 = vrot.slane %v1376_v56, 1 }
 0x16f   : > { %v1359_v61 = vsel %vm9908_vm2, 0, %v1269_v50  ;;  %v1187_v39 = vpack.c.bf16 %v1166_v55, %v1165_v54  ;;  %v8255_v62 = vadd.f32 %v8254_v46, %v8253_v57  ;;  %v8256_v0 = vpop.f32.mrb[46].mxu0  ;;  %v1601_v1 = vmax.bf16 %v10055_v59, %v10036_v63 }
 0x170   : > { %v8257_v2 = vpop.f32.mrb[47].mxu0  ;;  %v1505_v3 = vshrl.u32 %v1359_v61, 16  ;;  %v1507_v4 = vshll.u32 %v1359_v61, 16  ;;  %v1514_v8 = vrot.slane %v1512_v49, 1  ;;  %v1671_v13 = vrot.slane %v1359_v61, 1 }
 0x171   : > { %v1271_v7 = vshrl.u32 %v1187_v39, 16  ;;  %v1107_v10 = vadd.f32 %v8255_v62, %v9926_v53  ;;  %v8258_v11 = vadd.f32 %v8257_v2, %v8256_v0  ;;  %v1714_v14 = vmax.bf16 %v10062_v5, %v1601_v1 }
 0x172   : > { %v1509_v12 = vrot.slane %v1507_v4, 1  ;;  %v1758_v15 = vmax.bf16 %v1729_v42, %v10055_v59  ;;  %v1274_v17 = vshll.u32 %v1187_v39, 16  ;;  %v1673_v37 = vsel %vm1640_vm4, %v1671_v13, %v1672_v6 }
 0x173   : > { %v1273_v16 = vrot.slane %v1271_v7, 7  ;;  %v1110_v18 = vadd.f32 %v8258_v11, %v9926_v53  ;;  %v1730_v23 = vmax.bf16 %v1714_v14, %v1359_v61  ;;  %v1167_v29 = vmax.f32 %v1107_v10, 0.0 }
 0x174   : > { %v1510_v21 = vor.u32 %v1509_v12, %v1505_v3  ;;  %v1780_v24 = vmax.bf16 %v1758_v15, %v10062_v5  ;;  %v10088_v10 = vmax.bf16 %v1779_v26, %v10036_v63 }
 0x175   : > { %v1276_v27 = vor.u32 %v1274_v17, %v1273_v16  ;;  %v1377_v28 = vsel %vm9908_vm2, %v1273_v16, 0  ;;  %v1168_v30 = vmax.f32 %v1110_v18, 0.0  ;;  %v8259_v31 = vpop.f32.mrb[48].mxu0 }
 0x176   : > { %v8260_v34 = vpop.f32.mrb[49].mxu0  ;;  %v1515_v35 = vsel %vm1383_vm3, %v1510_v21, %v1514_v8  ;;  %v1796_v38 = vmax.bf16 %v1780_v24, %v1359_v61  ;;  %v1524_v47 = vshll.u32 %v1377_v28, 16  ;;  %v1675_v50 = vrot.slane %v1377_v28, 1 }
 0x177   : > { %v1360_v32 = vsel %vm9908_vm2, 0, %v1276_v27  ;;  %v1188_v41 = vpack.c.bf16 %v1168_v30, %v1167_v29  ;;  %v8261_v42 = vadd.f32 %v8260_v34, %v8259_v31  ;;  %v8262_v45 = vpop.f32.mrb[50].mxu0  ;;  %v1602_v25 = vmax.bf16 %v1515_v35, %v1359_v61  ;;  %v10084_v61 = vld [vmem:[%s12147_s23] ss:$0 sm:$0xff] }
 0x178   : > { %v8263_v54 = vpop.f32.mrb[51].mxu0  ;;  %v1759_v55 = vmax.bf16 %v1730_v23, %v1515_v35  ;;  %v1812_v57 = vmax.bf16 %v1796_v38, %v1515_v35  ;;  %v1517_v49 = vshrl.u32 %v1360_v32, 16  ;;  %v1519_v0 = vshll.u32 %v1360_v32, 16 }
 0x179   : > { %v1278_v56 = vshrl.u32 %v1188_v41, 16  ;;  %v1115_v58 = vadd.f32 %v8261_v42, %v9926_v53  ;;  %v8264_v46 = vadd.f32 %v8263_v54, %v8262_v45  ;;  %v1715_v60 = vmax.bf16 %v1673_v37, %v1602_v25 }
 0x17a   : > { %v1781_v39 = vmax.bf16 %v1759_v55, %v1673_v37  ;;  %v1828_v62 = vmax.bf16 %v1812_v57, %v1673_v37  ;;  %v1281_v2 = vshll.u32 %v1188_v41, 16  ;;  %v1674_v4 = vrot.slane %v1360_v32, 1 }
 0x17b   : > { %v1280_v1 = vrot.slane %v1278_v56, 7  ;;  %v1118_v3 = vadd.f32 %v10084_v61, %v8264_v46  ;;  %v1731_v6 = vmax.bf16 %v1715_v60, %v1360_v32  ;;  %v1521_v53 = vrot.slane %v1519_v0, 1 }
 0x17c   : > { %v1797_v7 = vmax.bf16 %v1781_v39, %v1360_v32  ;;  %8283 = vmatprep.subr.bf16.mxu1 %v1828_v62  ;;  %v1169_v12 = vmax.f32 %v1115_v58, 0.0  ;;  %v1526_v15 = vrot.slane %v1524_v47, 1  ;;  %v1811_v21 = vmax.bf16 %v10088_v10, %v10055_v59 }
 0x17d   : > { %v1283_v11 = vor.u32 %v1281_v2, %v1280_v1  ;;  %v1378_v8 = vsel %vm9908_vm2, %v1280_v1, 0  ;;  %v1170_v13 = vmax.f32 %v1118_v3, 0.0  ;;  %8284 = vmatpush3.bf16.msra.mxu1 %v9969_v51  ;;  %v8265_v14 = vpop.f32.mrb[52].mxu0  ;;  %v1522_v18 = vor.u32 %v1521_v53, %v1517_v49 }
 0x17e   : > { %v1536_v16 = vshll.u32 %v1378_v8, 16  ;;  %v8266_v17 = vpop.f32.mrb[53].mxu0  ;;  %v1676_v27 = vsel %vm1640_vm4, %v1674_v4, %v1675_v50  ;;  %v1678_v29 = vrot.slane %v1378_v8, 1 }
 0x17f   : > { %v1361_v63 = vsel %vm9908_vm2, 0, %v1283_v11  ;;  %v1189_v23 = vpack.c.bf16 %v1170_v13, %v1169_v12  ;;  %v8267_v24 = vadd.f32 %v8266_v17, %v8265_v14  ;;  %v8268_v26 = vpop.f32.mrb[54].mxu0  ;;  %v1527_v51 = vsel %vm1383_vm3, %v1522_v18, %v1526_v15 }
 0x180   : > { %v1538_v28 = vrot.slane %v1536_v16, 1  ;;  %v8269_v30 = vpop.f32.mrb[55].mxu0  ;;  %v1531_v31 = vshll.u32 %v1361_v63, 16  ;;  %v1529_v38 = vshrl.u32 %v1361_v63, 16  ;;  %v1603_v41 = vmax.bf16 %v1527_v51, %v1360_v32 }
 0x181   : > { %v1285_v34 = vshrl.u32 %v1189_v23, 16  ;;  %v1123_v35 = vadd.f32 %v10084_v61, %v8267_v24  ;;  %v8270_v37 = vadd.f32 %v8269_v30, %v8268_v26  ;;  %v1760_v42 = vmax.bf16 %v1731_v6, %v1527_v51 }
 0x182   : > { %v1813_v45 = vmax.bf16 %v1797_v7, %v1527_v51  ;;  %v1533_v25 = vrot.slane %v1531_v31, 1  ;;  %v1288_v54 = vshll.u32 %v1189_v23, 16  ;;  %v1677_v50 = vrot.slane %v1361_v63, 1 }
 0x183   : > { %v1287_v47 = vrot.slane %v1285_v34, 7  ;;  %v1126_v55 = vadd.f32 %v10084_v61, %v8270_v37  ;;  %v1716_v57 = vmax.bf16 %v1676_v27, %v1603_v41  ;;  %v1782_v56 = vmax.bf16 %v1760_v42, %v1676_v27 }
 0x184   : > { %v1829_v58 = vmax.bf16 %v1813_v45, %v1676_v27  ;;  %v1534_v46 = vor.u32 %v1533_v25, %v1529_v38  ;;  %v1171_v39 = vmax.f32 %v1123_v35, 0.0  ;;  %v1679_v3 = vsel %vm1640_vm4, %v1677_v50, %v1678_v29 }
 0x185   : > { %v1290_v49 = vor.u32 %v1288_v54, %v1287_v47  ;;  %v1379_v60 = vsel %vm9908_vm2, %v1287_v47, 0  ;;  %v1172_v62 = vmax.f32 %v1126_v55, 0.0  ;;  %v8271_v0 = vpop.f32.mrb[56].mxu0  ;;  %v1732_v32 = vmax.bf16 %v1716_v57, %v1361_v63 }
 0x186   : > { %8285 = vmatprep.subr.bf16.mxu1 %v1829_v58  ;;  %v8272_v1 = vpop.f32.mrb[57].mxu0  ;;  %v1539_v2 = vsel %vm1383_vm3, %v1534_v46, %v1538_v28  ;;  %v1548_v8 = vshll.u32 %v1379_v60, 16  ;;  %v1681_v12 = vrot.slane %v1379_v60, 1  ;;  %v1798_v15 = vmax.bf16 %v1782_v56, %v1361_v63 }
 0x187   : > { %v1362_v4 = vsel %vm9908_vm2, 0, %v1290_v49  ;;  %v1190_v6 = vpack.c.bf16 %v1172_v62, %v1171_v39  ;;  %8286 = vmatpush3.bf16.msra.mxu1 %v9980_v33  ;;  %v8273_v7 = vadd.f32 %v8272_v1, %v8271_v0  ;;  %v8274_v53 = vpop.f32.mrb[58].mxu0  ;;  %v1604_v11 = vmax.bf16 %v1539_v2, %v1361_v63 }
 0x188   : > { %v8275_v13 = vpop.f32.mrb[59].mxu0  ;;  %v1761_v14 = vmax.bf16 %v1732_v32, %v1539_v2  ;;  %v1541_v23 = vshrl.u32 %v1362_v4, 16  ;;  %v1814_v27 = vmax.bf16 %v1798_v15, %v1539_v2  ;;  %v1543_v28 = vshll.u32 %v1362_v4, 16 }
 0x189   : > { %v1292_v16 = vshrl.u32 %v1190_v6, 16  ;;  %v1131_v17 = vadd.f32 %v10084_v61, %v8273_v7  ;;  %v8276_v18 = vadd.f32 %v8275_v13, %v8274_v53  ;;  %v1717_v24 = vmax.bf16 %v1679_v3, %v1604_v11 }
 0x18a   : > { %v1783_v26 = vmax.bf16 %v1761_v14, %v1679_v3  ;;  %v1295_v30 = vshll.u32 %v1190_v6, 16  ;;  %v1680_v51 = vrot.slane %v1362_v4, 1  ;;  %v1830_v34 = vmax.bf16 %v1814_v27, %v1679_v3 }
 0x18b   : > { %v1294_v29 = vrot.slane %v1292_v16, 7  ;;  %v1134_v33 = vadd.f32 %v10084_v61, %v8276_v18  ;;  %v1733_v31 = vmax.bf16 %v1717_v24, %v1362_v4  ;;  %v1545_v35 = vrot.slane %v1543_v28, 1 }
 0x18c   : > { %v1799_v37 = vmax.bf16 %v1783_v26, %v1362_v4  ;;  %v1173_v41 = vmax.f32 %v1131_v17, 0.0  ;;  %v1550_v25 = vrot.slane %v1548_v8, 1  ;;  %8287 = vmatprep.subr.bf16.mxu1 %v1830_v34  ;;  %v10116_v50 = vmax.bf16 %v1811_v21, %v10062_v5 }
 0x18d   : > { %v1297_v38 = vor.u32 %v1295_v30, %v1294_v29  ;;  %v1380_v63 = vsel %vm9908_vm2, %v1294_v29, 0  ;;  %v1174_v42 = vmax.f32 %v1134_v33, 0.0  ;;  %v8277_v45 = vpop.f32.mrb[60].mxu0  ;;  %v1546_v55 = vor.u32 %v1545_v35, %v1541_v23  ;;  %8288 = vmatpush3.bf16.msra.mxu1 %v9990_v9 }
 0x18e   : > { %v1560_v47 = vshll.u32 %v1380_v63, 16  ;;  %v8278_v54 = vpop.f32.mrb[61].mxu0  ;;  %v1682_v62 = vsel %vm1640_vm4, %v1680_v51, %v1681_v12  ;;  %v1684_v18 = vrot.slane %v1380_v63, 1 }
 0x18f   : > { %v1363_v57 = vsel %vm9908_vm2, 0, %v1297_v38  ;;  %v1191_v56 = vpack.c.bf16 %v1174_v42, %v1173_v41  ;;  %v8279_v58 = vadd.f32 %v8278_v54, %v8277_v45  ;;  %v8280_v46 = vpop.f32.mrb[62].mxu0  ;;  %v1551_v39 = vsel %vm1383_vm3, %v1546_v55, %v1550_v25 }
 0x190   : > { %v1562_v49 = vrot.slane %v1560_v47, 1  ;;  %v8281_v60 = vpop.f32.mrb[63].mxu0  ;;  %v1555_v0 = vshll.u32 %v1363_v57, 16  ;;  %v1553_v10 = vshrl.u32 %v1363_v57, 16  ;;  %v1605_v21 = vmax.bf16 %v1551_v39, %v1362_v4 }
 0x191   : > { %v1299_v32 = vshrl.u32 %v1191_v56, 16  ;;  %v1139_v59 = vadd.f32 %v10084_v61, %v8279_v58  ;;  %v8282_v5 = vadd.f32 %v8281_v60, %v8280_v46  ;;  %v1762_v1 = vmax.bf16 %v1733_v31, %v1551_v39 }
 0x192   : > { %v1815_v2 = vmax.bf16 %v1799_v37, %v1551_v39  ;;  %v1557_v3 = vrot.slane %v1555_v0, 1  ;;  %v1302_v9 = vshll.u32 %v1191_v56, 16  ;;  %v1683_v53 = vrot.slane %v1363_v57, 1 }
 0x193   : > { %v1301_v6 = vrot.slane %v1299_v32, 7  ;;  %v1142_v7 = vadd.f32 %v10084_v61, %v8282_v5  ;;  %v1718_v11 = vmax.bf16 %v1682_v62, %v1605_v21  ;;  %v1784_v8 = vmax.bf16 %v1762_v1, %v1682_v62 }
 0x194   : > { %v1831_v13 = vmax.bf16 %v1815_v2, %v1682_v62  ;;  %v1558_v14 = vor.u32 %v1557_v3, %v1553_v10  ;;  %v1175_v16 = vmax.f32 %v1139_v59, 0.0  ;;  %v1685_v29 = vsel %vm1640_vm4, %v1683_v53, %v1684_v18  ;;  %v9219_v18 = vld [vmem:[%s12149_s1] ss:$8 sps:$4 sm:$0xff]  }
 0x195   : > { %v1304_v12 = vor.u32 %v1302_v9, %v1301_v6  ;;  %v1381_v15 = vsel %vm9908_vm2, %v1301_v6, 0  ;;  %v1176_v17 = vmax.f32 %v1142_v7, 0.0  ;;  %v1734_v4 = vmax.bf16 %v1718_v11, %v1363_v57 }
 0x196   : > { %8289 = vmatprep.subr.bf16.mxu1 %v1831_v13  ;;  %v1563_v23 = vsel %vm1383_vm3, %v1558_v14, %v1562_v49  ;;  %v1800_v27 = vmax.bf16 %v1784_v8, %v1363_v57  ;;  %v1572_v28 = vshll.u32 %v1381_v15, 16  ;;  %v1687_v56 = vrot.slane %v1381_v15, 1 }
 0x197   : > { %v1364_v24 = vsel %vm9908_vm2, 0, %v1304_v12  ;;  %v1192_v61 = vpack.c.bf16 %v1176_v17, %v1175_v16  ;;  %8290 = vmatpush3.bf16.msra.mxu1 %v10000_v52  ;;  %v1606_v26 = vmax.bf16 %v1563_v23, %v1363_v57  ;;  %v1763_v30 = vmax.bf16 %v1734_v4, %v1563_v23  ;;  %v9231_v17 = vld [vmem:[%s12150_s26] sm:$0xff]   ;;  %v9222_v4 = vld [vmem:[%s12149_s1 + $0x14] ss:$8 sps:$4 sm:$0xff]   ;;  %s12156_s26 = sld [smem:[#allocation13_spill]] }
 0x198   : > { %v1567_v33 = vshll.u32 %v1364_v24, 16  ;;  %v1816_v34 = vmax.bf16 %v1800_v27, %v1563_v23  ;;  %v1565_v37 = vshrl.u32 %v1364_v24, 16  ;;  %v1574_v25 = vrot.slane %v1572_v28, 1  ;;  %v9234_v23 = vld [vmem:[%s12151_s0 + $0x18] sm:$0xff]   ;;  %v9235_v27 = vld [vmem:[%s12151_s0 + $0x20] sm:$0xff]   ;;  %v9236_v28 = vld [vmem:[%s12151_s0 + $0x28] sm:$0xff]  }
 0x199   : > { %v1306_v51 = vshrl.u32 %v1192_v61, 16  ;;  %v1719_v31 = vmax.bf16 %v1685_v29, %v1606_v26  ;;  %v1785_v35 = vmax.bf16 %v1763_v30, %v1685_v29  ;;  %v1309_v41 = vshll.u32 %v1192_v61, 16  ;;  %v9228_v61 = vld [vmem:[%s12149_s1 + $0x34] ss:$8 sps:$4 sm:$0xff]   ;;  %v9230_v26 = vld [vmem:[%s12149_s1 + $0x30] ss:$8 sps:$4 sm:$0xff]  }
 0x19a   : > { %v1569_v38 = vrot.slane %v1567_v33, 1  ;;  %v1832_v45 = vmax.bf16 %v1816_v34, %v1685_v29  ;;  %v1686_v52 = vrot.slane %v1364_v24, 1  ;;  %v9237_v29 = vld [vmem:[%s12151_s0 + $0x30] sm:$0xff]   ;;  %v9238_v30 = vld [vmem:[%s12151_s0 + $0x38] sm:$0xff]   ;;  %v9239_v33 = vld [vmem:[%s12152_s7 + $0x140] sm:$0xff]  }
 0x19b   : > { %v1308_v63 = vrot.slane %v1306_v51, 7  ;;  %v1735_v42 = vmax.bf16 %v1719_v31, %v1364_v24  ;;  %v1801_v54 = vmax.bf16 %v1785_v35, %v1364_v24  ;;  %v9240_v51 = vld [vmem:[%s12152_s7 + $0x100] sm:$0xff]   ;;  %v9241_v31 = vld [vmem:[%s12152_s7 + $0x148] sm:$0xff]   ;;  %8415 = vmatprep.subr.bf16.mxu0 %v9239_v33 }
 0x19c   : > { %v1570_v47 = vor.u32 %v1569_v38, %v1565_v37  ;;  %8291 = vmatprep.subr.bf16.mxu1 %v1832_v45  ;;  %v1688_v0 = vsel %vm1640_vm4, %v1686_v52, %v1687_v56  ;;  %v9245_v34 = vld [vmem:[%s12152_s7 + $0x40] sm:$0xff]   ;;  %8416 = vmatpush3.bf16.msra.mxu0 %v9240_v51  ;;  %v9242_v35 = vld [vmem:[%s12152_s7 + $0x108] sm:$0xff]   ;;  %v9243_v37 = vld [vmem:[%s12152_s7 + $0x150] sm:$0xff]  }
 0x19d   : > { %v1311_v55 = vor.u32 %v1309_v41, %v1308_v63  ;;  %v1382_v57 = vsel %vm9908_vm2, %v1308_v63, 0  ;;  %8292 = vmatpush3.bf16.msra.mxu1 %v10016_v22  ;;  %8417 = vmatprep.subr.bf16.mxu0 %v9241_v31  ;;  %v9244_v38 = vld [vmem:[%s12152_s7 + $0x110] sm:$0xff]   ;;  %v9248_v63 = vld [vmem:[%s12152_s7 + $0x158] sm:$0xff]   ;;  %v10294_v33 = vld [vmem:[%s12152_s7 + $0x200] sm:$0xff]   ;;  %s12157_s29 = smov %s12156_s26 }
 0x19e   : > { %v1575_v58 = vsel %vm1383_vm3, %v1570_v47, %v1574_v25  ;;  %v1745_v62 = vshll.u32 %v1382_v57, 16  ;;  %v1769_v53 = vrot.slane %v1382_v57, 1  ;;  %v9250_v41 = vld [vmem:[%s12152_s7 + $0x118] sm:$0xff]   ;;  %v10300_v51 = vld [vmem:[%s12153_s6] ss:$0 sm:$0xff] }
 0x19f   : > { %v1365_v46 = vsel %vm9908_vm2, 0, %v1311_v55  ;;  %v1607_v49 = vmax.bf16 %v1575_v58, %v1364_v24  ;;  %v1764_v60 = vmax.bf16 %v1735_v42, %v1575_v58  ;;  %v1817_v39 = vmax.bf16 %v1801_v54, %v1575_v58  ;;  %v9227_v24 = vld [vmem:[%s12149_s1 + $0x20] ss:$8 sps:$4 sm:$0xff]  }
 0x1a0   : > { %v1740_v32 = vshll.u32 %v1365_v46, 16  ;;  %v1738_v21 = vshrl.u32 %v1365_v46, 16  ;;  %v1747_v3 = vrot.slane %v1745_v62, 1  ;;  %v1768_v9 = vrot.slane %v1365_v46, 1  ;;  %8418 = vmatpush3.bf16.msra.mxu0 %v9242_v35 }
 0x1a1   : > { %v1720_v59 = vmax.bf16 %v1688_v0, %v1607_v49  ;;  %v1786_v5 = vmax.bf16 %v1764_v60, %v1688_v0  ;;  %v1833_v10 = vmax.bf16 %v1817_v39, %v1688_v0  ;;  %8419 = vmatprep.subr.bf16.mxu0 %v9243_v37  ;;  %v9246_v39 = vld [vmem:[%s12152_s7] sm:$0xff]   ;;  %v9247_v0 = vld [vmem:[%s12152_s7 + $0x48] sm:$0xff]  }
 0x1a2   : > { %v1742_v1 = vrot.slane %v1740_v32, 1  ;;  %v1770_v13 = vsel %vm1640_vm4, %v1768_v9, %v1769_v53 }
 0x1a3   : > { %8293 = vmatprep.subr.bf16.mxu1 %v1833_v10  ;;  %v1736_v2 = vmax.bf16 %v1720_v59, %v1365_v46  ;;  %v1802_v22 = vmax.bf16 %v1786_v5, %v1365_v46  ;;  %v9249_v5 = vld [vmem:[%s12152_s7 + $0x8] sm:$0xff]  }
 0x1a4   : > { %8294 = vmatpush3.bf16.msra.mxu1 %v10047_v40  ;;  %v1743_v6 = vor.u32 %v1742_v1, %v1738_v21  ;;  %8420 = vmatpush3.bf16.msra.mxu0 %v9244_v38 }
 0x1a5   : > { %8421 = vmatprep.subr.bf16.mxu0 %v9248_v63 }
 0x1a6   : > { %v1748_v7 = vsel %vm1383_vm3, %v1743_v6, %v1747_v3 }
 0x1a7   : > { %v1765_v11 = vmax.bf16 %v1748_v7, %v1736_v2  ;;  %v1818_v8 = vmax.bf16 %v1802_v22, %v1748_v7 }
 0x1a8   : > { %8422 = vmatpush3.bf16.msra.mxu0 %v9250_v41 }
 0x1a9   : > { %v1787_v14 = vmax.bf16 %v1770_v13, %v1765_v11  ;;  %v1834_v12 = vmax.bf16 %v1818_v8, %v1770_v13  ;;  %v9251_v13 = vld [vmem:[%s12152_s7 + $0x50] sm:$0xff]  }
 0x1ab   : > { %8295 = vmatprep.subr.bf16.mxu1 %v1834_v12  ;;  %v1803_v15 = vmax.bf16 %v1787_v14, %v9917_v48  ;;  %v9252_v14 = vld [vmem:[%s12152_s7 + $0x10] sm:$0xff]   ;;  %v9253_v12 = vld [vmem:[%s12152_s7 + $0x58] sm:$0xff]  }
 0x1ac   : > { %8296 = vmatpush3.bf16.msra.mxu1 %v10069_v19  ;;  %v9224_v19 = vld [vmem:[%s12149_s1 + $0x10] ss:$8 sps:$4 sm:$0xff]  }
 0x1ad   : > { %v1819_v16 = vmax.bf16 %v1803_v15, %v9937_v20  ;;  %v9232_v20 = vld [vmem:[%s12151_s0 + $0x8] sm:$0xff]   ;;  %v9254_v15 = vld [vmem:[%s12152_s7 + $0x18] sm:$0xff]  }
 0x1af   : > { %v1835_v40 = vmax.bf16 %v1819_v16, %v9946_v36  ;;  %v9233_v36 = vld [vmem:[%s12151_s0 + $0x10] sm:$0xff]   ;;  %v9257_v16 = vld [vmem:[%s12152_s7 + $0x160] sm:$0xff]  }
 0x1b0   : > { %8423 = vmatprep.subr.bf16.mxu0 %v9257_v16 }
 0x1b1   : > { %8297 = vmatprep.subr.bf16.mxu1 %v1835_v40  ;;  %v9258_v40 = vld [vmem:[%s12152_s7 + $0x120] sm:$0xff]  }
 0x1b2   : > { %8298 = vmatpush3.bf16.msra.mxu1 %v10116_v50  ;;  %v9225_v50 = vld [vmem:[%s12149_s1 + $0x24] ss:$8 sps:$4 sm:$0xff]   ;;  %8424 = vmatpush3.bf16.msra.mxu0 %v9258_v40  ;;  %s9606_s1 = sshll.u32 %s9667_s3, 4  ;;  %s9607_s1 = int_to_ptr.vmem [resolvable:$false] %s9606_s1 }
 0x1b3   : > { %8955 = vmatprep.subr.bf16.mxu1 %v9231_v17  ;;  %s9608_s30 = scalar_lea.vmem %s9607_s1, 32 }
 0x1b5   : > { %1917 = vmatmul.mubr.bf16.vlgmr.msra.gmra.mrb[0].mxu1 %v9219_v18  ;;  %v9261_v18 = vld [vmem:[%s12152_s7 + $0x168] sm:$0xff]  }
 0x1b6   : > { %1924 = vmatprep.mubr.bf16.mxu1 %v9222_v4  ;;  %8956 = vmatpush3.bf16.msra.mxu1 %v9231_v17  ;;  %v9255_v17 = vld [vmem:[%s12152_s7 + $0x60] sm:$0xff]   ;;  %v9262_v4 = vld [vmem:[%s12152_s7 + $0x128] sm:$0xff]  }
 0x1b7   : > { %8957 = vmatprep.subr.bf16.mxu1 %v9232_v20  ;;  %8425 = vmatprep.subr.bf16.mxu0 %v9261_v18 }
 0x1b8   : > { %8426 = vmatpush3.bf16.msra.mxu0 %v9262_v4 }
 0x1ba   : > { %8958 = vmatpush3.bf16.msra.mxu1 %v9232_v20  ;;  %v9256_v20 = vld [vmem:[%s12152_s7 + $0x20] sm:$0xff]  }
 0x1bb   : > { %8959 = vmatprep.subr.bf16.mxu1 %v9233_v36 }
 0x1bd   : > { %1925 = vmatmul.mubr.bf16.gmra.mrb[4].mxu1 %v9224_v19  ;;  %v9260_v19 = vld [vmem:[%s12152_s7 + $0x28] sm:$0xff]  }
 0x1be   : > { %1932 = vmatprep.mubr.bf16.mxu1 %v9225_v50  ;;  %8960 = vmatpush3.bf16.msra.mxu1 %v9233_v36  ;;  %v9259_v36 = vld [vmem:[%s12152_s7 + $0x68] sm:$0xff]   ;;  %v9263_v50 = vld [vmem:[%s12152_s7 + $0x70] sm:$0xff]  }
 0x1bf   : > { %8961 = vmatprep.subr.bf16.mxu1 %v9234_v23 }
 0x1c2   : > { %8962 = vmatpush3.bf16.msra.mxu1 %v9234_v23  ;;  %v9264_v23 = vld [vmem:[%s12152_s7 + $0x30] sm:$0xff]  }
 0x1c3   : > { %8963 = vmatprep.subr.bf16.mxu1 %v9235_v27 }
 0x1c5   : > { %1933 = vmatmul.mubr.bf16.gmra.mrb[8].mxu1 %v9227_v24  ;;  %v9265_v24 = vld [vmem:[%s12152_s7 + $0x170] sm:$0xff]  }
 0x1c6   : > { %1940 = vmatprep.mubr.bf16.mxu1 %v9228_v61  ;;  %8964 = vmatpush3.bf16.msra.mxu1 %v9235_v27  ;;  %v9266_v61 = vld [vmem:[%s12152_s7 + $0x130] sm:$0xff]   ;;  %v9268_v27 = vld [vmem:[%s12152_s7 + $0x38] sm:$0xff]  }
 0x1c7   : > { %8965 = vmatprep.subr.bf16.mxu1 %v9236_v28  ;;  %8427 = vmatprep.subr.bf16.mxu0 %v9265_v24 }
 0x1c8   : > { %8428 = vmatpush3.bf16.msra.mxu0 %v9266_v61 }
 0x1ca   : > { %8966 = vmatpush3.bf16.msra.mxu1 %v9236_v28  ;;  %v9269_v28 = vld [vmem:[%s12152_s7 + $0x178] sm:$0xff]  }
 0x1cb   : > { %8967 = vmatprep.subr.bf16.mxu1 %v9237_v29  ;;  %8429 = vmatprep.subr.bf16.mxu0 %v9269_v28 }
 0x1cd   : > { %1941 = vmatmul.mubr.bf16.gmra.mrb[12].mxu1 %v9230_v26  ;;  %v9267_v26 = vld [vmem:[%s12152_s7 + $0x78] sm:$0xff]  }
 0x1ce   : > { %8968 = vmatpush3.bf16.msra.mxu1 %v9237_v29  ;;  %v9270_v29 = vld [vmem:[%s12152_s7 + $0x138] sm:$0xff]  }
 0x1cf   : > { %8969 = vmatprep.subr.bf16.mxu1 %v9238_v30  ;;  %8430 = vmatpush3.bf16.msra.mxu0 %v9270_v29 }
 0x1d0   : > { %8979 = vmatprep.subr.bf16.mxu0 %v10294_v33 }
 0x1d2   : > { %8970 = vmatpush3.bf16.msra.mxu1 %v9238_v30  ;;  %v9271_v30 = vld [vmem:[%s12152_s7 + $0xc0] sm:$0xff]  }
 0x1d3   : > { %8335 = vmatprep.subr.bf16.mxu1 %v9245_v34 }
 0x288   : > { %v8299_v42 = vpop.f32.mrb[0].mxu1 }
 0x289   : > { %v8300_v45 = vpop.f32.mrb[1].mxu1 }
 0x28a   : > { %v8301_v25 = vadd.f32 %v8300_v45, %v8299_v42  ;;  %v8302_v47 = vpop.f32.mrb[2].mxu1 }
 0x28b   : > { %v8303_v52 = vpop.f32.mrb[3].mxu1 }
 0x28c   : > { %v8304_v54 = vadd.f32 %v8303_v52, %v8302_v47 }
 0x28e   : > { %v1949_v55 = vpack.c.bf16 %v8304_v54, %v8301_v25  ;;  %v10312_v25 = vsel %vm10302_vm7, %v9917_v48, 0 }
 0x290   : > { %v8305_v57 = vpop.f32.mrb[4].mxu1  ;;  %8971 = vmatprep.mubr.bf16.mxu1 %v1949_v55 }
 0x291   : > { %v8306_v56 = vpop.f32.mrb[5].mxu1 }
 0x292   : > { %v8307_v58 = vadd.f32 %v8306_v56, %v8305_v57  ;;  %v8308_v46 = vpop.f32.mrb[6].mxu1 }
 0x293   : > { %v8309_v49 = vpop.f32.mrb[7].mxu1 }
 0x294   : > { %v8310_v60 = vadd.f32 %v8309_v49, %v8308_v46  ;;  %v2208_v49 = vshll.u32 %v10312_v25, 16 }
 0x296   : > { %v1950_v62 = vpack.c.bf16 %v8310_v60, %v8307_v58 }
 0x298   : > { %v8311_v32 = vpop.f32.mrb[8].mxu1  ;;  %8972 = vmatmul.mubr.bf16.vlgmr.msra.gmra.mrb[16].mxu1 %v1950_v62 }
 0x299   : > { %v8312_v59 = vpop.f32.mrb[9].mxu1  ;;  %8336 = vmatpush3.bf16.msra.mxu1 %v9246_v39 }
 0x29a   : > { %v8313_v10 = vadd.f32 %v8312_v59, %v8311_v32  ;;  %v8314_v21 = vpop.f32.mrb[10].mxu1  ;;  %8337 = vmatprep.subr.bf16.mxu1 %v9247_v0 }
 0x29b   : > { %v8315_v1 = vpop.f32.mrb[11].mxu1 }
 0x29c   : > { %v8316_v2 = vadd.f32 %v8315_v1, %v8314_v21 }
 0x29d   : > { %8338 = vmatpush3.bf16.msra.mxu1 %v9249_v5 }
 0x29e   : > { %v1951_v22 = vpack.c.bf16 %v8316_v2, %v8313_v10  ;;  %8339 = vmatprep.subr.bf16.mxu1 %v9251_v13  ;;  %v2206_v10 = vshrl.u32 %v10312_v25, 16 }
 0x2a0   : > { %v8317_v3 = vpop.f32.mrb[12].mxu1  ;;  %8975 = vmatprep.mubr.bf16.mxu1 %v1951_v22  ;;  %v2210_v22 = vrot.slane %v2208_v49, 1 }
 0x2a1   : > { %v8318_v6 = vpop.f32.mrb[13].mxu1  ;;  %8340 = vmatpush3.bf16.msra.mxu1 %v9252_v14 }
 0x2a2   : > { %v8319_v9 = vadd.f32 %v8318_v6, %v8317_v3  ;;  %v8320_v7 = vpop.f32.mrb[14].mxu1  ;;  %8341 = vmatprep.subr.bf16.mxu1 %v9253_v12 }
 0x2a3   : > { %v8321_v53 = vpop.f32.mrb[15].mxu1 }
 0x2a4   : > { %v8322_v11 = vadd.f32 %v8321_v53, %v8320_v7 }
 0x2a5   : > { %8342 = vmatpush3.bf16.msra.mxu1 %v9254_v15  ;;  %v10331_v15 = vor.u32 %v2210_v22, %v2206_v10 }
 0x2a6   : > { %v1952_v8 = vpack.c.bf16 %v8322_v11, %v8319_v9  ;;  %8343 = vmatprep.subr.bf16.mxu1 %v9255_v17 }
 0x2a8   : > { %8976 = vmatmul.mubr.bf16.gmra.mrb[20].mxu1 %v1952_v8 }
 0x2a9   : > { %8344 = vmatpush3.bf16.msra.mxu1 %v9256_v20 }
 0x2aa   : > { %8345 = vmatprep.subr.bf16.mxu1 %v9259_v36 }
 0x2ad   : > { %8346 = vmatpush3.bf16.msra.mxu1 %v9260_v19 }
 0x2ae   : > { %8347 = vmatprep.subr.bf16.mxu1 %v9263_v50 }
 0x2b1   : > { %8348 = vmatpush3.bf16.msra.mxu1 %v9264_v23 }
 0x2b2   : > { %8349 = vmatprep.subr.bf16.mxu1 %v9267_v26 }
 0x2b5   : > { %8350 = vmatpush3.bf16.msra.mxu1 %v9268_v27 }
 0x2b6   : > { %8375 = vmatprep.subr.bf16.mxu1 %v9271_v30 }
 0x36b   : > { %v8973_v31 = vpop.f32.mrb[16].mxu1 }
 0x36c   : > { %v2067_v35 = vadd.f32 %v8973_v31, %v10300_v51  ;;  %v2058_v37 = vpop.f32.mrb[17].mxu1 }
 0x36d   : > { %v2059_v38 = vadd.f32 %v10300_v51, %v2058_v37  ;;  %v8974_v63 = vpop.f32.mrb[18].mxu1 }
 0x36e   : > { %v2091_v41 = vmax.f32 %v2067_v35, 0.0  ;;  %v2070_v42 = vadd.f32 %v8974_v63, %v10300_v51  ;;  %v2061_v45 = vpop.f32.mrb[19].mxu1 }
 0x36f   : > { %v2089_v47 = vmax.f32 %v2059_v38, 0.0  ;;  %v2062_v52 = vadd.f32 %v10300_v51, %v2061_v45 }
 0x370   : > { %v8151_v54 = vpack.c.bf16 %v2091_v41, %v2091_v41  ;;  %v2092_v55 = vmax.f32 %v2070_v42, 0.0 }
 0x371   : > { %v8149_v57 = vpack.c.bf16 %v2089_v47, %v2089_v47  ;;  %v2090_v56 = vmax.f32 %v2062_v52, 0.0 }
 0x372   : > { %v2136_v58 = vshrl.u32 %v8151_v54, 16  ;;  %v8152_v46 = vpack.c.bf16 %v2092_v55, %v2092_v55  ;;  %v2139_v0 = vshll.u32 %v8151_v54, 16 }
 0x373   : > { %v2122_v60 = vshrl.u32 %v8149_v57, 16  ;;  %v8150_v39 = vpack.c.bf16 %v2090_v56, %v2090_v56  ;;  %v2125_v5 = vshll.u32 %v8149_v57, 16 }
 0x374   : > { %v2138_v62 = vrot.slane %v2136_v58, 7  ;;  %v2143_v32 = vshrl.u32 %v8152_v46, 16  ;;  %v2146_v2 = vshll.u32 %v8152_v46, 16 }
 0x375   : > { %v2124_v59 = vrot.slane %v2122_v60, 7  ;;  %v2129_v48 = vshrl.u32 %v8150_v39, 16  ;;  %v2132_v9 = vshll.u32 %v8150_v39, 16  ;;  %v9272_v60 = vld [vmem:[%s12152_s7 + $0x80] sm:$0xff]  }
 0x376   : > { %v2141_v21 = vor.u32 %v2139_v0, %v2138_v62  ;;  %v2145_v1 = vrot.slane %v2143_v32, 7 }
 0x377   : > { %v2127_v3 = vor.u32 %v2125_v5, %v2124_v59  ;;  %v2131_v6 = vrot.slane %v2129_v48, 7  ;;  %v9274_v5 = vld [vmem:[%s12152_s7 + $0xc8] sm:$0xff]  }
 0x378   : > { %v2187_v7 = vsel %vm9908_vm2, 0, %v2141_v21  ;;  %v2148_v53 = vor.u32 %v2146_v2, %v2145_v1 }
 0x379   : > { %v10321_v11 = vsel %vm10302_vm7, %v2187_v7, 0  ;;  %v2185_v8 = vsel %vm9908_vm2, 0, %v2127_v3  ;;  %v2134_v13 = vor.u32 %v2132_v9, %v2131_v6 }
 0x37a   : > { %v10327_v14 = vsel %vm10302_vm7, %v2185_v8, 0  ;;  %v2188_v12 = vsel %vm9908_vm2, 0, %v2148_v53  ;;  %v2227_v18 = vshrl.u32 %v10321_v11, 16  ;;  %v2229_v4 = vshll.u32 %v10321_v11, 16 }
 0x37b   : > { %v10335_v16 = vsel %vm10302_vm7, %v2188_v12, 0  ;;  %v2186_v40 = vsel %vm9908_vm2, 0, %v2134_v13  ;;  %v8977_v17 = vpop.f32.mrb[20].mxu1  ;;  %v2270_v50 = vrot.slane %v10327_v14, 1  ;;  %v2215_v23 = vshll.u32 %v10327_v14, 16  ;;  %v9275_v13 = vld [vmem:[%s12152_s7 + $0x88] sm:$0xff]  }
 0x37c   : > { %v10343_v20 = vsel %vm10302_vm7, %v2186_v40, 0  ;;  %v2083_v36 = vadd.f32 %v8977_v17, %v10300_v51  ;;  %v2074_v19 = vpop.f32.mrb[21].mxu1  ;;  %v2213_v27 = vshrl.u32 %v10327_v14, 16  ;;  %v7673_v28 = vcombine.low %v10312_v25, %v10327_v14  ;;  %v9276_v12 = vld [vmem:[%s12152_s7 + $0x208] sm:$0xff]  }
 0x37d   : > { %v2075_v24 = vadd.f32 %v10300_v51, %v2074_v19  ;;  %v8978_v61 = vpop.f32.mrb[22].mxu1  ;;  %v2271_v26 = vrot.slane %v10343_v20, 1  ;;  %v2217_v35 = vrot.slane %v2215_v23, 1  ;;  %v2222_v37 = vshll.u32 %v10343_v20, 16 }
 0x37e   : > { %v2095_v29 = vmax.f32 %v2083_v36, 0.0  ;;  %v2086_v30 = vadd.f32 %v8978_v61, %v10300_v51  ;;  %v2077_v31 = vpop.f32.mrb[23].mxu1  ;;  %v2231_v42 = vrot.slane %v2229_v4, 1  ;;  %v2220_v56 = vshrl.u32 %v10343_v20, 16  ;;  %v9277_v36 = vld [vmem:[%s12152_s7 + $0xd0] sm:$0xff]  }
 0x37f   : > { %v2093_v38 = vmax.f32 %v2075_v24, 0.0  ;;  %v2078_v63 = vadd.f32 %v10300_v51, %v2077_v31  ;;  %v7678_v41 = vcombine.low %v2270_v50, %v2271_v26  ;;  %v2218_v52 = vor.u32 %v2217_v35, %v2213_v27 }
 0x380   : > { %v8155_v45 = vpack.c.bf16 %v2095_v29, %v2095_v29  ;;  %v2096_v47 = vmax.f32 %v2086_v30, 0.0  ;;  %v2224_v54 = vrot.slane %v2222_v37, 1  ;;  %v10361_v58 = vor.u32 %v2231_v42, %v2227_v18  ;;  %v9280_v42 = vld [vmem:[%s12152_s7 + $0xd8] sm:$0xff]  }
 0x381   : > { %v8153_v55 = vpack.c.bf16 %v2093_v38, %v2093_v38  ;;  %v2094_v57 = vmax.f32 %v2078_v63, 0.0  ;;  %3112 = vmatprep.mubr.bf16.mxu0 %v7678_v41  ;;  %v7674_v51 = vcombine.low %v10331_v15, %v2218_v52  ;;  %v2272_v39 = vrot.slane %v10321_v11, 1 }
 0x382   : > { %v2164_v46 = vshrl.u32 %v8155_v45, 16  ;;  %v8156_v49 = vpack.c.bf16 %v2096_v47, %v2096_v47  ;;  %v2167_v62 = vshll.u32 %v8155_v45, 16  ;;  %v2225_v59 = vor.u32 %v2224_v54, %v2220_v56 }
 0x383   : > { %v2150_v0 = vshrl.u32 %v8153_v55, 16  ;;  %v8154_v32 = vpack.c.bf16 %v2094_v57, %v2094_v57  ;;  %v2153_v10 = vshll.u32 %v8153_v55, 16  ;;  %2982 = vmatprep.mubr.bf16.mxu1 %v7674_v51  ;;  %v2273_v1 = vrot.slane %v10335_v16, 1 }
 0x384   : > { %v2166_v48 = vrot.slane %v2164_v46, 7  ;;  %v2171_v21 = vshrl.u32 %v8156_v49, 16  ;;  %v2174_v22 = vshll.u32 %v8156_v49, 16  ;;  %2983 = vmatmul.mubr.bf16.vlgmr.msra.gmra.mrb[24].mxu1 %v7673_v28  ;;  %v7677_v6 = vcombine.low %v2218_v52, %v2225_v59 }
 0x385   : > { %v2152_v2 = vrot.slane %v2150_v0, 7  ;;  %v2157_v3 = vshrl.u32 %v8154_v32, 16  ;;  %v10373_v53 = vcombine.low %v2225_v59, %v10361_v58  ;;  %8376 = vmatpush3.bf16.msra.mxu1 %v9272_v60  ;;  %v7684_v8 = vcombine.low %v2272_v39, %v2273_v1 }
 0x386   : > { %v2169_v9 = vor.u32 %v2167_v62, %v2166_v48  ;;  %v2173_v7 = vrot.slane %v2171_v21, 7  ;;  %v2160_v18 = vshll.u32 %v8154_v32, 16  ;;  %3113 = vmatmul.mubr.bf16.vlgmr.msra.gmra.mrb[64].mxu0 %v7677_v6  ;;  %8377 = vmatprep.subr.bf16.mxu1 %v9274_v5  ;;  %v10383_v4 = vcombine.low %v10343_v20, %v10321_v11  ;;  %v9282_v62 = vld [vmem:[%s12152_s7 + $0x218] sm:$0xff]  }
 0x387   : > { %v2155_v40 = vor.u32 %v2153_v10, %v2152_v2  ;;  %v2159_v17 = vrot.slane %v2157_v3, 7  ;;  %2990 = vmatprep.mubr.bf16.mxu1 %v10373_v53  ;;  %3120 = vmatprep.mubr.bf16.mxu0 %v7684_v8  ;;  %v2236_v24 = vshll.u32 %v10335_v16, 16  ;;  %v7676_v61 = vcombine.low %v10327_v14, %v10343_v20  ;;  %v9296_v20 = vld [vmem:[%s12152_s7 + $0x180] sm:$0xff]   ;;  %v9299_v14 = vld [vmem:[%s12152_s7 + $0x1d0] sm:$0xff]  }
 0x388   : > { %v2191_v19 = vsel %vm9908_vm2, 0, %v2169_v9  ;;  %v2176_v23 = vor.u32 %v2174_v22, %v2173_v7  ;;  %8980 = vmatpush3.bf16.msra.mxu0 %v10294_v33  ;;  %v2234_v29 = vshrl.u32 %v10335_v16, 16  ;;  %v10400_v30 = vcombine.low %v2271_v26, %v2272_v39  ;;  %v9278_v33 = vld [vmem:[%s12152_s7 + $0x90] sm:$0xff]   ;;  %v9281_v39 = vld [vmem:[%s12152_s7 + $0x98] sm:$0xff]  }
 0x389   : > { %v2189_v27 = vsel %vm9908_vm2, 0, %v2155_v40  ;;  %v2162_v28 = vor.u32 %v2160_v18, %v2159_v17  ;;  %v10404_v31 = vsel %vm10302_vm7, %v2191_v19, 0  ;;  %8378 = vmatpush3.bf16.msra.mxu1 %v9275_v13  ;;  %8981 = vmatprep.subr.bf16.mxu0 %v9276_v12  ;;  %v2238_v38 = vrot.slane %v2236_v24, 1  ;;  %v9279_v26 = vld [vmem:[%s12152_s7 + $0x210] sm:$0xff]   ;;  %v9284_v40 = vld [vmem:[%s12152_s7 + $0xa0] sm:$0xff]  }
 0x38a   : > { %v10408_v35 = vsel %vm10302_vm7, %v2189_v27, 0  ;;  %v2192_v37 = vsel %vm9908_vm2, 0, %v2176_v23  ;;  %8379 = vmatprep.subr.bf16.mxu1 %v9277_v36  ;;  %v2257_v32 = vshll.u32 %v10404_v31, 16  ;;  %v2276_v59 = vrot.slane %v10404_v31, 1  ;;  %v9285_v19 = vld [vmem:[%s12152_s7 + $0x220] sm:$0xff]  }
 0x38b   : > { %v10420_v63 = vsel %vm10302_vm7, %v2192_v37, 0  ;;  %v2190_v41 = vsel %vm9908_vm2, 0, %v2162_v28  ;;  %v2274_v45 = vrot.slane %v10408_v35, 1  ;;  %v2241_v47 = vshrl.u32 %v10408_v35, 16  ;;  %v9287_v28 = vld [vmem:[%s12152_s7 + $0xa8] sm:$0xff]   ;;  %v9289_v37 = vld [vmem:[%s12152_s7 + $0xf0] sm:$0xff]  }
 0x38c   : > { %v10431_v52 = vsel %vm10302_vm7, %v2190_v41, 0  ;;  %v2239_v54 = vor.u32 %v2238_v38, %v2234_v29  ;;  %v2243_v55 = vshll.u32 %v10408_v35, 16  ;;  %v10436_v57 = vcombine.low %v10335_v16, %v10408_v35  ;;  %8982 = vmatpush3.bf16.msra.mxu0 %v9276_v12  ;;  %2991 = vmatmul.mubr.bf16.gmra.mrb[28].mxu1 %v10383_v4  ;;  %v9288_v29 = vld [vmem:[%s12152_s7 + $0x228] sm:$0xff]   ;;  %v9291_v38 = vld [vmem:[%s12152_s7 + $0x230] sm:$0xff]   ;;  %v9293_v41 = vld [vmem:[%s12152_s7 + $0xb8] sm:$0xff]  }
 0x38d   : > { %v2275_v56 = vrot.slane %v10431_v52, 1  ;;  %v10440_v46 = vcombine.low %v2273_v1, %v2274_v45  ;;  %v2248_v49 = vshrl.u32 %v10431_v52, 16  ;;  %v2250_v51 = vshll.u32 %v10431_v52, 16  ;;  %8380 = vmatpush3.bf16.msra.mxu1 %v9278_v33  ;;  %8983 = vmatprep.subr.bf16.mxu0 %v9279_v26  ;;  %v9290_v33 = vld [vmem:[%s12152_s7 + $0xb0] sm:$0xff]  }
 0x38e   : > { %v7683_v60 = vcombine.low %v10361_v58, %v2239_v54  ;;  %v2245_v0 = vrot.slane %v2243_v55, 1  ;;  %8381 = vmatprep.subr.bf16.mxu1 %v9280_v42  ;;  %v9283_v58 = vld [vmem:[%s12152_s7 + $0xe0] sm:$0xff]   ;;  %v2285_v10 = vrot.slane %v10420_v63, 1  ;;  %v10459_v21 = vcombine.low %v10431_v52, %v10404_v31  ;;  %v9294_v42 = vld [vmem:[%s12152_s7 + $0x238] sm:$0xff]  }
 0x38f   : > { %v7690_v5 = vcombine.low %v2274_v45, %v2275_v56  ;;  %v2252_v48 = vrot.slane %v2250_v51, 1  ;;  %v2255_v2 = vshrl.u32 %v10404_v31, 16  ;;  %v2259_v22 = vrot.slane %v2257_v32, 1  ;;  %v9301_v55 = vld [vmem:[%s12152_s7 + $0x1d8] sm:$0xff]   ;;  %v9303_v51 = vld [vmem:[%s12152_s7 + $0x1e0] sm:$0xff]  }
 0x390   : > { %3121 = vmatmul.mubr.bf16.gmra.mrb[68].mxu0 %v7683_v60  ;;  %v2246_v1 = vor.u32 %v2245_v0, %v2241_v47  ;;  %v2280_v3 = vshll.u32 %v10420_v63, 16  ;;  %v7696_v9 = vcombine.low %v2276_v59, %v2285_v10  ;;  %v2278_v7 = vshrl.u32 %v10420_v63, 16  ;;  %v9295_v47 = vld [vmem:[%s12152_s7 + $0x1c0] sm:$0xff]   ;;  %v9305_v60 = vld [vmem:[%s12152_s7 + $0x1e8] sm:$0xff]   ;;  %v9308_v0 = vld [vmem:[%s12152_s7 + $0x1b0] sm:$0xff]  }
 0x391   : > { %8984 = vmatpush3.bf16.msra.mxu0 %v9279_v26  ;;  %3128 = vmatprep.mubr.bf16.mxu0 %v7690_v5  ;;  %v2253_v6 = vor.u32 %v2252_v48, %v2248_v49  ;;  %v7682_v8 = vcombine.low %v10321_v11, %v10335_v16  ;;  %v2260_v12 = vor.u32 %v2259_v22, %v2255_v2  ;;  %v9286_v11 = vld [vmem:[%s12152_s7 + $0xe8] sm:$0xff]   ;;  %v9292_v26 = vld [vmem:[%s12152_s7 + $0xf8] sm:$0xff]   ;;  %v10522_v45 = vrot.slane %v10312_v25, 1 }
 0x392   : > { %8382 = vmatpush3.bf16.msra.mxu1 %v9281_v39  ;;  %8985 = vmatprep.subr.bf16.mxu0 %v9282_v62  ;;  %v10468_v13 = vcombine.low %v2239_v54, %v2246_v1  ;;  %v2282_v17 = vrot.slane %v2280_v3, 1  ;;  %v10473_v18 = vcombine.low %v2275_v56, %v2276_v59  ;;  %v7688_v16 = vcombine.low %v10408_v35, %v10431_v52  ;;  %v9297_v52 = vld [vmem:[%s12152_s7 + $0x1c8] sm:$0xff]   ;;  %v9302_v49 = vld [vmem:[%s12152_s7 + $0x198] sm:$0xff]  }
 0x393   : > { %8383 = vmatprep.subr.bf16.mxu1 %v9283_v58  ;;  %v7689_v36 = vcombine.low %v2246_v1, %v2253_v6  ;;  %v7694_v23 = vcombine.low %v10404_v31, %v10420_v63  ;;  %v10486_v24 = vcombine.low %v2253_v6, %v2260_v12  ;;  %v9298_v54 = vld [vmem:[%s12152_s7 + $0x188] sm:$0xff]   ;;  %v7699_v56 = vcombine.low %v2285_v10, %v10522_v45  ;;  %v9309_v31 = vld [vmem:[%s12152_s7 + $0x1f8] sm:$0xff]  }
 0x394   : > { %2998 = vmatprep.mubr.bf16.mxu1 %v10468_v13  ;;  %v10488_v27 = vor.u32 %v2282_v17, %v2278_v7  ;;  %v9306_v39 = vld [vmem:[%s12152_s7 + $0x1a8] sm:$0xff]  }
 0x395   : > { %8986 = vmatpush3.bf16.msra.mxu0 %v9282_v62  ;;  %2999 = vmatmul.mubr.bf16.gmra.mrb[32].mxu1 %v10436_v57  ;;  %v9307_v62 = vld [vmem:[%s12152_s7 + $0x1f0] sm:$0xff]  }
 0x396   : > { %3006 = vmatprep.mubr.bf16.mxu1 %v10486_v24  ;;  %8384 = vmatpush3.bf16.msra.mxu1 %v9284_v40  ;;  %v7695_v35 = vcombine.low %v2260_v12, %v10488_v27  ;;  %v7698_v32 = vcombine.low %v10488_v27, %v10331_v15  ;;  %v9317_v27 = vld [vmem:[%s12099_s9 + $0x18] ss:$12 sps:$4 sm:$0xff]  }
 0x397   : > { %8987 = vmatprep.subr.bf16.mxu0 %v9285_v19  ;;  %8385 = vmatprep.subr.bf16.mxu1 %v9286_v11 }
 0x398   : > { %3129 = vmatmul.mubr.bf16.gmra.mrb[72].mxu0 %v7689_v36  ;;  %v9315_v36 = vld [vmem:[%s12099_s9 + $0x4] ss:$12 sps:$4 sm:$0xff]  }
 0x399   : > { %3136 = vmatprep.mubr.bf16.mxu0 %v7696_v9  ;;  %8988 = vmatpush3.bf16.msra.mxu0 %v9285_v19 }
 0x39a   : > { %8386 = vmatpush3.bf16.msra.mxu1 %v9287_v28  ;;  %8989 = vmatprep.subr.bf16.mxu0 %v9288_v29 }
 0x39b   : > { %8387 = vmatprep.subr.bf16.mxu1 %v9289_v37 }
 0x39d   : > { %8990 = vmatpush3.bf16.msra.mxu0 %v9288_v29  ;;  %3007 = vmatmul.mubr.bf16.gmra.mrb[36].mxu1 %v10459_v21 }
 0x39e   : > { %8388 = vmatpush3.bf16.msra.mxu1 %v9290_v33  ;;  %3047 = vmatprep.mubr.bf16.mxu1 %v7676_v61  ;;  %v7675_v61 = vcombine.low %v10522_v45, %v2270_v50  ;;  %v9300_v50 = vld [vmem:[%s12152_s7 + $0x190] sm:$0xff]  }
 0x39f   : > { %8991 = vmatprep.subr.bf16.mxu0 %v9291_v38  ;;  %8389 = vmatprep.subr.bf16.mxu1 %v9292_v26 }
 0x3a0   : > { %3137 = vmatmul.mubr.bf16.gmra.mrb[76].mxu0 %v7695_v35  ;;  %v9323_v35 = vld [vmem:[%s12099_s9 + $0x34] ss:$12 sps:$4 sm:$0xff]  }
 0x3a1   : > { %8992 = vmatpush3.bf16.msra.mxu0 %v9291_v38  ;;  %8995 = vmatprep.mubr.bf16.mxu0 %v10400_v30 }
 0x3a2   : > { %8390 = vmatpush3.bf16.msra.mxu1 %v9293_v41  ;;  %8993 = vmatprep.subr.bf16.mxu0 %v9294_v42  ;;  %v9321_v41 = vld [vmem:[%s12099_s9 + $0x30] ss:$12 sps:$4 sm:$0xff]  }
 0x3a3   : > { %8455 = vmatprep.subr.bf16.mxu1 %v9295_v47 }
 0x3a5   : > { %8994 = vmatpush3.bf16.msra.mxu0 %v9294_v42  ;;  %3048 = vmatmul.mubr.bf16.vlgmr.msra.gmra.mrb[40].mxu1 %v7675_v61 }
 0x3a6   : > { %3055 = vmatprep.mubr.bf16.mxu1 %v7682_v8  ;;  %8456 = vmatpush3.bf16.msra.mxu1 %v9296_v20 }
 0x3a7   : > { %8457 = vmatprep.subr.bf16.mxu1 %v9297_v52  ;;  %3827 = vmatprep.subr.bf16.mxu0 %v9315_v36  ;;  %v9327_v52 = vld [vmem:[%s12099_s9 + $0x4c] ss:$12 sps:$4 sm:$0xff]  }
 0x3a8   : > { %8996 = vmatmul.mubr.bf16.vlgmr.msra.gmra.mrb[80].mxu0 %v10440_v46 }
 0x3a9   : > { %8999 = vmatprep.mubr.bf16.mxu0 %v10473_v18 }
 0x3aa   : > { %8458 = vmatpush3.bf16.msra.mxu1 %v9298_v54 }
 0x3ab   : > { %8459 = vmatprep.subr.bf16.mxu1 %v9299_v14 }
 0x3ad   : > { %3056 = vmatmul.mubr.bf16.gmra.mrb[44].mxu1 %v10400_v30  ;;  %v9304_v30 = vld [vmem:[%s12152_s7 + $0x1a0] sm:$0xff]  }
 0x3ae   : > { %3063 = vmatprep.mubr.bf16.mxu1 %v7688_v16  ;;  %8460 = vmatpush3.bf16.msra.mxu1 %v9300_v50  ;;  %v9325_v50 = vld [vmem:[%s12099_s9 + $0x48] ss:$12 sps:$4 sm:$0xff]  }
 0x3af   : > { %8461 = vmatprep.subr.bf16.mxu1 %v9301_v55 }
 0x3b0   : > { %9000 = vmatmul.mubr.bf16.gmra.mrb[84].mxu0 %v7699_v56 }
 0x3b1   : > { %3859 = vmatprep.mubr.bf16.mxu0 %v9666_v44 }
 0x3b2   : > { %8462 = vmatpush3.bf16.msra.mxu1 %v9302_v49  ;;  %v9331_v49 = vld [vmem:[%s12099_s9 + $0x64] ss:$12 sps:$4 sm:$0xff]  }
 0x3b3   : > { %8463 = vmatprep.subr.bf16.mxu1 %v9303_v51 }
 0x3b5   : > { %3064 = vmatmul.mubr.bf16.gmra.mrb[48].mxu1 %v10440_v46  ;;  %v9310_v46 = vld [vmem:[%s12152_s7 + $0x1b8] sm:$0xff]   ;;  %s12168_s7 = sld [smem:[#allocation19_spill]] }
 0x3b6   : > { %3071 = vmatprep.mubr.bf16.mxu1 %v7694_v23  ;;  %8464 = vmatpush3.bf16.msra.mxu1 %v9304_v30  ;;  %v9319_v23 = vld [vmem:[%s12099_s9 + $0x1c] ss:$12 sps:$4 sm:$0xff]  }
 0x3b7   : > { %8465 = vmatprep.subr.bf16.mxu1 %v9305_v60 }
 0x3ba   : > { %8466 = vmatpush3.bf16.msra.mxu1 %v9306_v39 }
 0x3bb   : > { %8467 = vmatprep.subr.bf16.mxu1 %v9307_v62  ;;  %v9329_v62 = vld [vmem:[%s12099_s9 + $0x60] ss:$12 sps:$4 sm:$0xff]   ;;  %s12048_s2 = scalar_lea.hbm %s12168_s7, %s8145_s4 }
 0x3bd   : > { %3072 = vmatmul.mubr.bf16.gmra.mrb[52].mxu1 %v10473_v18  ;;  %v9313_v18 = vld [vmem:[%s12099_s9] ss:$12 sps:$4 sm:$0xff]  }
 0x3be   : > { %8468 = vmatpush3.bf16.msra.mxu1 %v9308_v0  ;;  %3177 = vmatprep.mubr.bf16.mxu1 %v10373_v53  ;;  %v7697_v53 = vcombine.low %v10420_v63, %v10312_v25  ;;  %v9311_v63 = vld [vmem:[%s12156_s26] sm:$0xff]   ;;  %s648_s26 = scalar_lea.vmem [#allocation2], %s647_s28 }
 0x3bf   : > { %8469 = vmatprep.subr.bf16.mxu1 %v9309_v31  ;;  %3828 = vmatpush1.bf16.msra.mxu0 %v9313_v18  ;;  %s7537_s21 = sshll.u32 %s648_s26, 4  ;;  %s12050_s21 = int_to_ptr.vmem [resolvable:$true] %s7537_s21 }
 0x3c0   : > { %3829 = vmatprep.subr.bf16.mxu0 %v9319_v23  ;;  %s9602_s22 = scalar_lea.vmem %s12050_s21, 16  ;;  %p9609_p0 = scmp.lt.s32.totalorder %s12050_s21, %s9607_s1 }
 0x3c1   : > { %p9603_p11 = scmp.ne.s32.totalorder %s12050_s21, %s9602_s22  ;;  %p9610_p1 = scmp.lt.s32.totalorder %s9608_s30, %s9602_s22 }
 0x3c2   : > { %8470 = vmatpush3.bf16.msra.mxu1 %v9310_v46 }
 0x3c3   : > { %3830 = vmatpush1.bf16.msra.mxu0 %v9317_v27  ;;  %p9604_p12 = pnand %p9603_p11, %p9816_p5  ;;  %p9611_p2 = por %p9610_p1, %p9609_p0 }
 0x3c4   : > { %3831 = vmatprep.subr.bf16.mxu0 %v9323_v35 }
 0x3c5   : > { %3178 = vmatmul.mubr.bf16.vlgmr.msra.gmra.mrb[56].mxu1 %v10383_v4  ;;  %p9605_p13 = pneg %p9604_p12 }
 0x3c6   : > { %3185 = vmatprep.mubr.bf16.mxu1 %v10468_v13 }
 0x3c7   : > { %3832 = vmatpush1.bf16.msra.mxu0 %v9321_v41  ;;  %p9612_p3 = pnand %p9611_p2, %p9605_p13 }
 0x3c8   : > { %3833 = vmatprep.subr.bf16.mxu0 %v9327_v52 }
 0x3cb   : > { %3834 = vmatpush1.bf16.msra.mxu0 %v9325_v50 }
 0x3cc   : > { %3835 = vmatprep.subr.bf16.mxu0 %v9331_v49 }
 0x3cd   : > { %3186 = vmatmul.mubr.bf16.gmra.mrb[60].mxu1 %v10436_v57 }
 0x3ce   : > { %3193 = vmatprep.mubr.bf16.mxu1 %v10486_v24 }
 0x3cf   : > { %3836 = vmatpush1.bf16.msra.mxu0 %v9329_v62 }
 0x3d5   : > { %3194 = vmatmul.mubr.bf16.gmra.mrb[64].mxu1 %v10459_v21 }
 0x3d6   : > { %3201 = vmatprep.mubr.bf16.mxu1 %v7698_v32 }
 0x3dd   : > { %3202 = vmatmul.mubr.bf16.gmra.mrb[68].mxu1 %v7697_v53  ;;  %v9335_v53 = vld [vmem:[%s12099_s9 + $0x7c] ss:$12 sps:$4 sm:$0xff]  }
 0x3de   : > { %9011 = vmatprep.mubr.msk.bf16.mxu1 %vm3579_vm8, %v9311_v63  ;;  %3837 = vmatprep.subr.bf16.mxu0 %v9335_v53 }
 0x457   : > { %v8351_v59 = vpop.f32.mrb[24].mxu1 }
 0x458   : > { %v8352_v5 = vpop.f32.mrb[25].mxu1 }
 0x459   : > { %v10598_v58 = vadd.f32 %v8352_v5, %v8351_v59  ;;  %v8431_v4 = vpop.f32.mrb[64].mxu0  ;;  %v8354_v48 = vpop.f32.mrb[26].mxu1  ;;  %v7672_v5 = vld [vmem:[%s12098_s8] ss:$0 sm:$0xff] }
 0x45a   : > { %v8432_v10 = vpop.f32.mrb[65].mxu0  ;;  %v8355_v57 = vpop.f32.mrb[27].mxu1 }
 0x45b   : > { %v10600_v1 = vadd.f32 %v8432_v10, %v8431_v4  ;;  %v10602_v2 = vadd.f32 %v8355_v57, %v8354_v48  ;;  %v8434_v22 = vpop.f32.mrb[66].mxu0  ;;  %v9333_v48 = vld [vmem:[%s12099_s9 + $0x78] ss:$12 sps:$4 sm:$0xff]  }
 0x45c   : > { %v8435_v3 = vpop.f32.mrb[67].mxu0  ;;  %3838 = vmatpush1.bf16.msra.mxu0 %v9333_v48 }
 0x45d   : > { %v10604_v21 = vadd.f32 %v8435_v3, %v8434_v22  ;;  %v9339_v22 = vld [vmem:[%s12099_s9 + $0x94] ss:$12 sps:$4 sm:$0xff]   ;;  %v2985_v3 = vadd.f32 %v10598_v58, %v7672_v5 }
 0x45e   : > { %3839 = vmatprep.subr.bf16.mxu0 %v9339_v22 }
 0x45f   : > { %v8357_v6 = vpop.f32.mrb[28].mxu1 }
 0x460   : > { %v8358_v9 = vpop.f32.mrb[29].mxu1 }
 0x461   : > { %v10609_v7 = vadd.f32 %v8358_v9, %v8357_v6  ;;  %v8360_v8 = vpop.f32.mrb[30].mxu1 }
 0x462   : > { %v8361_v12 = vpop.f32.mrb[31].mxu1 }
 0x463   : > { %v8437_v13 = vpop.f32.mrb[68].mxu0  ;;  %v10612_v17 = vadd.f32 %v8361_v12, %v8360_v8  ;;  %v2988_v12 = vadd.f32 %v10602_v2, %v7672_v5  ;;  %v2993_v35 = vadd.f32 %v10609_v7, %v7672_v5 }
 0x464   : > { %v8438_v40 = vpop.f32.mrb[69].mxu0 }
 0x465   : > { %v10620_v19 = vadd.f32 %v8438_v40, %v8437_v13  ;;  %v8440_v11 = vpop.f32.mrb[70].mxu0  ;;  %v9337_v13 = vld [vmem:[%s12099_s9 + $0x90] ss:$12 sps:$4 sm:$0xff]   ;;  %v2996_v41 = vadd.f32 %v10612_v17, %v7672_v5 }
 0x466   : > { %v8441_v16 = vpop.f32.mrb[71].mxu0  ;;  %3840 = vmatpush1.bf16.msra.mxu0 %v9337_v13 }
 0x467   : > { %v10625_v24 = vadd.f32 %v8441_v16, %v8440_v11 }
 0x468   : > { %v8363_v28 = vpop.f32.mrb[32].mxu1 }
 0x469   : > { %v8364_v29 = vpop.f32.mrb[33].mxu1 }
 0x46a   : > { %v10633_v37 = vadd.f32 %v8364_v29, %v8363_v28  ;;  %v8366_v33 = vpop.f32.mrb[34].mxu1 }
 0x46b   : > { %v8443_v38 = vpop.f32.mrb[72].mxu0  ;;  %v8367_v26 = vpop.f32.mrb[35].mxu1 }
 0x46c   : > { %v8444_v42 = vpop.f32.mrb[73].mxu0  ;;  %v10638_v47 = vadd.f32 %v8367_v26, %v8366_v33  ;;  %v3001_v49 = vadd.f32 %v10633_v37, %v7672_v5 }
 0x46d   : > { %v10640_v20 = vadd.f32 %v8444_v42, %v8443_v38  ;;  %v8446_v61 = vpop.f32.mrb[74].mxu0 }
 0x46e   : > { %v8447_v54 = vpop.f32.mrb[75].mxu0 }
 0x46f   : > { %v10645_v14 = vadd.f32 %v8447_v54, %v8446_v61 }
 0x470   : > { %v8369_v55 = vpop.f32.mrb[36].mxu1 }
 0x471   : > { %v8370_v56 = vpop.f32.mrb[37].mxu1 }
 0x472   : > { %v10653_v51 = vadd.f32 %v8370_v56, %v8369_v55  ;;  %v8372_v30 = vpop.f32.mrb[38].mxu1 }
 0x473   : > { %v8449_v60 = vpop.f32.mrb[76].mxu0  ;;  %v8373_v39 = vpop.f32.mrb[39].mxu1 }
 0x474   : > { %v8450_v0 = vpop.f32.mrb[77].mxu0  ;;  %v10658_v31 = vadd.f32 %v8373_v39, %v8372_v30  ;;  %v3004_v39 = vadd.f32 %v10638_v47, %v7672_v5 }
 0x475   : > { %v10660_v46 = vadd.f32 %v8450_v0, %v8449_v60  ;;  %v8452_v32 = vpop.f32.mrb[78].mxu0 }
 0x476   : > { %v8453_v59 = vpop.f32.mrb[79].mxu0  ;;  %v3012_v22 = vadd.f32 %v10658_v31, %v7672_v5 }
 0x477   : > { %v10668_v4 = vadd.f32 %v8453_v59, %v8452_v32 }
 0x478   : > { %v8391_v10 = vpop.f32.mrb[40].mxu1 }
 0x479   : > { %v8392_v57 = vpop.f32.mrb[41].mxu1 }
 0x47a   : > { %v8393_v6 = vadd.f32 %v8392_v57, %v8391_v10  ;;  %v8394_v9 = vpop.f32.mrb[42].mxu1 }
 0x47b   : > { %v10677_v63 = vpop.f32.mrb[80].mxu0  ;;  %v8395_v8 = vpop.f32.mrb[43].mxu1 }
 0x47c   : > { %v3050_v40 = vadd.f32 %v8393_v6, %v2985_v3  ;;  %v3244_v18 = vpop.f32.mrb[81].mxu0  ;;  %v8396_v36 = vadd.f32 %v8395_v8, %v8394_v9 }
 0x47d   : > { %v10683_v11 = vpop.f32.mrb[82].mxu0 }
 0x47e   : > { %v3053_v16 = vadd.f32 %v8396_v36, %v2988_v12  ;;  %v3247_v58 = vpop.f32.mrb[83].mxu0  ;;  %v3115_v23 = vadd.f32 %v10600_v1, %v3050_v40 }
 0x480   : > { %v8397_v27 = vpop.f32.mrb[44].mxu1  ;;  %v3118_v28 = vadd.f32 %v10604_v21, %v3053_v16 }
 0x481   : > { %v8398_v29 = vpop.f32.mrb[45].mxu1 }
 0x482   : > { %v8399_v33 = vadd.f32 %v8398_v29, %v8397_v27  ;;  %v8400_v38 = vpop.f32.mrb[46].mxu1 }
 0x483   : > { %v10688_v2 = vpop.f32.mrb[84].mxu0  ;;  %v8401_v26 = vpop.f32.mrb[47].mxu1 }
 0x484   : > { %v3058_v42 = vadd.f32 %v8399_v33, %v2993_v35  ;;  %v10691_v61 = vpop.f32.mrb[85].mxu0  ;;  %v8402_v52 = vadd.f32 %v8401_v26, %v8400_v38 }
 0x485   : > { %v10693_v54 = vpop.f32.mrb[86].mxu0 }
 0x486   : > { %v3061_v1 = vadd.f32 %v8402_v52, %v2996_v41  ;;  %v10695_v50 = vpop.f32.mrb[87].mxu0  ;;  %v3123_v21 = vadd.f32 %v10620_v19, %v3058_v42 }
 0x488   : > { %v8403_v55 = vpop.f32.mrb[48].mxu1  ;;  %v3126_v7 = vadd.f32 %v10625_v24, %v3061_v1  ;;  %v3009_v24 = vadd.f32 %v10653_v51, %v7672_v5 }
 0x489   : > { %v8404_v56 = vpop.f32.mrb[49].mxu1 }
 0x48a   : > { %v8405_v30 = vadd.f32 %v8404_v56, %v8403_v55  ;;  %v8406_v60 = vpop.f32.mrb[50].mxu1 }
 0x48b   : > { %v8407_v17 = vpop.f32.mrb[51].mxu1 }
 0x48c   : > { %v3066_v62 = vadd.f32 %v8405_v30, %v3001_v49  ;;  %v8408_v0 = vadd.f32 %v8407_v17, %v8406_v60 }
 0x48e   : > { %v3069_v32 = vadd.f32 %v8408_v0, %v3004_v39  ;;  %v3131_v53 = vadd.f32 %v10640_v20, %v3066_v62  ;;  %v3444_v0 = vmax.bf16 %v10331_v15, %v10312_v25 }
 0x490   : > { %v8409_v59 = vpop.f32.mrb[52].mxu1  ;;  %v10703_v48 = vadd.f32 %v10645_v14, %v3069_v32 }
 0x491   : > { %v8410_v19 = vpop.f32.mrb[53].mxu1 }
 0x492   : > { %v8411_v10 = vadd.f32 %v8410_v19, %v8409_v59  ;;  %v8412_v57 = vpop.f32.mrb[54].mxu1 }
 0x493   : > { %v8413_v37 = vpop.f32.mrb[55].mxu1 }
 0x494   : > { %v3074_v3 = vadd.f32 %v8411_v10, %v3009_v24  ;;  %v8414_v6 = vadd.f32 %v8413_v37, %v8412_v57 }
 0x496   : > { %v3077_v47 = vadd.f32 %v8414_v6, %v3012_v22  ;;  %v10708_v9 = vadd.f32 %v10660_v46, %v3074_v3 }
 0x498   : > { %v8471_v8 = vpop.f32.mrb[56].mxu1  ;;  %v10711_v20 = vadd.f32 %v10668_v4, %v3077_v47  ;;  %v10730_v47 = vmax.bf16 %v3444_v0, %v10522_v45 }
 0x499   : > { %v8472_v14 = vpop.f32.mrb[57].mxu1 }
 0x49a   : > { %v8473_v13 = vadd.f32 %v8472_v14, %v8471_v8  ;;  %v8474_v12 = vpop.f32.mrb[58].mxu1 }
 0x49b   : > { %v8475_v40 = vpop.f32.mrb[59].mxu1 }
 0x49c   : > { %v3180_v51 = vadd.f32 %v8473_v13, %v3115_v23  ;;  %v8476_v36 = vadd.f32 %v8475_v40, %v8474_v12 }
 0x49e   : > { %v3245_v16 = vadd.f32 %v3244_v18, %v3180_v51  ;;  %v3183_v27 = vadd.f32 %v8476_v36, %v3118_v28 }
 0x4a0   : > { %v3275_v29 = vmax.f32 %v3245_v16, 0.0  ;;  %v3248_v31 = vadd.f32 %v3247_v58, %v3183_v27  ;;  %v8477_v5 = vpop.f32.mrb[60].mxu1 }
 0x4a1   : > { %v8478_v35 = vpop.f32.mrb[61].mxu1 }
 0x4a2   : > { %v8157_v33 = vpack.c.bf16 %v3275_v29, %v3275_v29  ;;  %v3276_v38 = vmax.f32 %v3248_v31, 0.0  ;;  %v8479_v46 = vadd.f32 %v8478_v35, %v8477_v5  ;;  %v8480_v26 = vpop.f32.mrb[62].mxu1 }
 0x4a3   : > { %v8481_v41 = vpop.f32.mrb[63].mxu1 }
 0x4a4   : > { %v3308_v42 = vshrl.u32 %v8157_v33, 16  ;;  %v8158_v4 = vpack.c.bf16 %v3276_v38, %v3276_v38  ;;  %v3188_v52 = vadd.f32 %v8479_v46, %v3123_v21  ;;  %v8482_v1 = vadd.f32 %v8481_v41, %v8480_v26 }
 0x4a5   : > { %v3311_v56 = vshll.u32 %v8157_v33, 16 }
 0x4a6   : > { %v3310_v55 = vrot.slane %v3308_v42, 7  ;;  %v3315_v49 = vshrl.u32 %v8158_v4, 16  ;;  %v3253_v23 = vadd.f32 %v10677_v63, %v3188_v52  ;;  %v3191_v18 = vadd.f32 %v8482_v1, %v3126_v7 }
 0x4a7   : > { %v3318_v58 = vshll.u32 %v8158_v4, 16 }
 0x4a8   : > { %v3313_v28 = vor.u32 %v3311_v56, %v3310_v55  ;;  %v3317_v30 = vrot.slane %v3315_v49, 7  ;;  %v3277_v60 = vmax.f32 %v3253_v23, 0.0  ;;  %v8483_v17 = vpop.f32.mrb[64].mxu1  ;;  %v3256_v39 = vadd.f32 %v10683_v11, %v3191_v18 }
 0x4a9   : > { %v8484_v62 = vpop.f32.mrb[65].mxu1 }
 0x4aa   : > { %v3371_v21 = vsel %vm9908_vm2, 0, %v3313_v28  ;;  %v3320_v32 = vor.u32 %v3318_v58, %v3317_v30  ;;  %v8159_v59 = vpack.c.bf16 %v3277_v60, %v3277_v60  ;;  %v8485_v19 = vadd.f32 %v8484_v62, %v8483_v17  ;;  %v8486_v24 = vpop.f32.mrb[66].mxu1 }
 0x4ab   : > { %v10721_v63 = vsel %vm10302_vm7, %v3371_v21, 0  ;;  %v3278_v7 = vmax.f32 %v3256_v39, 0.0  ;;  %v8487_v10 = vpop.f32.mrb[67].mxu1 }
 0x4ac   : > { %v3372_v11 = vsel %vm9908_vm2, 0, %v3320_v32  ;;  %v3322_v57 = vshrl.u32 %v8159_v59, 16  ;;  %v3196_v37 = vadd.f32 %v8485_v19, %v3131_v53  ;;  %v8488_v6 = vadd.f32 %v8487_v10, %v8486_v24 }
 0x4ad   : > { %v10727_v22 = vsel %vm10302_vm7, %v3372_v11, 0  ;;  %v8160_v3 = vpack.c.bf16 %v3278_v7, %v3278_v7  ;;  %v3325_v14 = vshll.u32 %v8159_v59, 16  ;;  %v3390_v12 = vshll.u32 %v10721_v63, 16 }
 0x4ae   : > { %v3324_v8 = vrot.slane %v3322_v57, 7  ;;  %v3261_v13 = vadd.f32 %v10691_v61, %v3196_v37  ;;  %v3199_v51 = vadd.f32 %v8488_v6, %v10703_v48  ;;  %v3388_v53 = vshrl.u32 %v10721_v63, 16 }
 0x4af   : > { %v3329_v40 = vshrl.u32 %v8160_v3, 16  ;;  %v3397_v36 = vshll.u32 %v10727_v22, 16  ;;  %v3392_v31 = vrot.slane %v3390_v12, 1  ;;  %v3395_v5 = vshrl.u32 %v10727_v22, 16 }
 0x4b0   : > { %v3327_v16 = vor.u32 %v3325_v14, %v3324_v8  ;;  %v3279_v27 = vmax.f32 %v3261_v13, 0.0  ;;  %v8489_v29 = vpop.f32.mrb[68].mxu1  ;;  %v3332_v33 = vshll.u32 %v8160_v3, 16  ;;  %v3264_v38 = vadd.f32 %v10695_v50, %v3199_v51 }
 0x4b1   : > { %v3331_v35 = vrot.slane %v3329_v40, 7  ;;  %v8490_v61 = vpop.f32.mrb[69].mxu1  ;;  %v3399_v46 = vrot.slane %v3397_v36, 1  ;;  %v3459_v4 = vrot.slane %v10721_v63, 1  ;;  %v3393_v49 = vor.u32 %v3392_v31, %v3388_v53 }
 0x4b2   : > { %v3373_v26 = vsel %vm9908_vm2, 0, %v3327_v16  ;;  %v8161_v48 = vpack.c.bf16 %v3279_v27, %v3279_v27  ;;  %v8491_v41 = vadd.f32 %v8490_v61, %v8489_v29  ;;  %v8492_v42 = vpop.f32.mrb[70].mxu1  ;;  %v3280_v55 = vmax.f32 %v3264_v38, 0.0 }
 0x4b3   : > { %v10744_v52 = vsel %vm10302_vm7, %v3373_v26, 0  ;;  %v3334_v1 = vor.u32 %v3332_v33, %v3331_v35  ;;  %v8493_v56 = vpop.f32.mrb[71].mxu1  ;;  %v3400_v28 = vor.u32 %v3399_v46, %v3395_v5  ;;  %v10749_v17 = vrot.slane %v10727_v22, 1 }
 0x4b4   : > { %v3336_v23 = vshrl.u32 %v8161_v48, 16  ;;  %v3204_v50 = vadd.f32 %v8491_v41, %v10708_v9  ;;  %v8494_v18 = vadd.f32 %v8493_v56, %v8492_v42  ;;  %v3339_v30 = vshll.u32 %v8161_v48, 16 }
 0x4b5   : > { %v8162_v58 = vpack.c.bf16 %v3280_v55, %v3280_v55  ;;  %v3404_v60 = vshll.u32 %v10744_v52, 16  ;;  %v3374_v39 = vsel %vm9908_vm2, 0, %v3334_v1  ;;  %v3402_v9 = vshrl.u32 %v10744_v52, 16 }
 0x4b6   : > { %v3338_v62 = vrot.slane %v3336_v23, 7  ;;  %v3269_v0 = vadd.f32 %v10688_v2, %v3204_v50  ;;  %v3207_v21 = vadd.f32 %v8494_v18, %v10711_v20  ;;  %v3445_v19 = vmax.bf16 %v3393_v49, %v10721_v63 }
 0x4b7   : > { %v3343_v32 = vshrl.u32 %v8162_v58, 16  ;;  %v3406_v59 = vrot.slane %v3404_v60, 1  ;;  %v3446_v11 = vmax.bf16 %v3400_v28, %v10727_v22  ;;  %v3346_v37 = vshll.u32 %v8162_v58, 16 }
 0x4b8   : > { %v3341_v24 = vor.u32 %v3339_v30, %v3338_v62  ;;  %v3281_v7 = vmax.f32 %v3269_v0, 0.0  ;;  %v3272_v10 = vadd.f32 %v10693_v54, %v3207_v21  ;;  %v3475_v6 = vmax.bf16 %v3459_v4, %v3445_v19 }
 0x4b9   : > { %v3345_v57 = vrot.slane %v3343_v32, 7  ;;  %v3407_v3 = vor.u32 %v3406_v59, %v3402_v9  ;;  %v3382_v2 = vsel %vm10302_vm7, %v3374_v39, 0  ;;  %v3461_v40 = vrot.slane %v10744_v52, 1 }
 0x4ba   : > { %v3375_v20 = vsel %vm9908_vm2, 0, %v3341_v24  ;;  %v8163_v8 = vpack.c.bf16 %v3281_v7, %v3281_v7  ;;  %v3282_v14 = vmax.f32 %v3272_v10, 0.0  ;;  %v3482_v54 = vmax.bf16 %v10730_v47, %v10721_v63 }
 0x4bb   : > { %v3348_v13 = vor.u32 %v3346_v37, %v3345_v57  ;;  %v3447_v12 = vmax.bf16 %v3407_v3, %v10744_v52  ;;  %v3476_v36 = vmax.bf16 %v10749_v17, %v3446_v11  ;;  %v3483_v16 = vmax.bf16 %v3475_v6, %v10727_v22 }
 0x4bc   : > { %v3350_v51 = vshrl.u32 %v8163_v8, 16  ;;  %v8164_v53 = vpack.c.bf16 %v3282_v14, %v3282_v14  ;;  %v10771_v27 = vsel %vm10302_vm7, %v3375_v20, 0  ;;  %v3353_v31 = vshll.u32 %v8163_v8, 16 }
 0x4bd   : > { %v3376_v29 = vsel %vm9908_vm2, 0, %v3348_v13  ;;  %v3498_v5 = vmax.bf16 %v3482_v54, %v3393_v49  ;;  %v3477_v38 = vmax.bf16 %v3461_v40, %v3447_v12  ;;  %v3409_v61 = vshrl.u32 %v3382_v2, 16 }
 0x4be   : > { %v3352_v35 = vrot.slane %v3350_v51, 7  ;;  %v3357_v33 = vshrl.u32 %v8164_v53, 16  ;;  %v10777_v63 = vsel %vm10302_vm7, %v3376_v29, 0  ;;  %v3499_v47 = vmax.bf16 %v3483_v16, %v3400_v28 }
 0x4bf   : > { %v3509_v46 = vmax.bf16 %v3498_v5, %v3459_v4  ;;  %v3411_v26 = vshll.u32 %v3382_v2, 16  ;;  %v3360_v42 = vshll.u32 %v8164_v53, 16  ;;  %v3418_v1 = vshll.u32 %v10771_v27, 16 }
 0x4c0   : > { %v3355_v48 = vor.u32 %v3353_v31, %v3352_v35  ;;  %v3359_v41 = vrot.slane %v3357_v33, 7  ;;  %v3510_v55 = vmax.bf16 %v3499_v47, %v10749_v17  ;;  %v3416_v23 = vshrl.u32 %v10771_v27, 16 }
 0x4c1   : > { %v3517_v56 = vmax.bf16 %v3509_v46, %v10727_v22  ;;  %v3413_v49 = vrot.slane %v3411_v26, 1  ;;  %v3420_v30 = vrot.slane %v3418_v1, 1  ;;  %v3484_v4 = vmax.bf16 %v3476_v36, %v10744_v52 }
 0x4c2   : > { %v3377_v50 = vsel %vm9908_vm2, 0, %v3355_v48  ;;  %v3362_v18 = vor.u32 %v3360_v42, %v3359_v41  ;;  %v3518_v58 = vmax.bf16 %v3510_v55, %v10744_v52  ;;  %v3462_v62 = vrot.slane %v3382_v2, 1 }
 0x4c3   : > { %v3525_v60 = vmax.bf16 %v3517_v56, %v3400_v28  ;;  %v3414_v39 = vor.u32 %v3413_v49, %v3409_v61  ;;  %v3421_v21 = vor.u32 %v3420_v30, %v3416_v23  ;;  %v3485_v22 = vmax.bf16 %v3477_v38, %v3382_v2 }
 0x4c4   : > { %v3378_v0 = vsel %vm9908_vm2, 0, %v3362_v18  ;;  %v3500_v32 = vmax.bf16 %v3484_v4, %v3407_v3  ;;  %v3385_v9 = vsel %vm10302_vm7, %v3377_v50, 0  ;;  %v3526_v59 = vmax.bf16 %v3518_v58, %v3407_v3 }
 0x4c5   : > { %v3533_v19 = vmax.bf16 %v3525_v60, %v10749_v17  ;;  %v3448_v24 = vmax.bf16 %v3414_v39, %v3382_v2  ;;  %v3449_v7 = vmax.bf16 %v3421_v21, %v10771_v27  ;;  %v3463_v52 = vrot.slane %v10771_v27, 1 }
 0x4c6   : > { %v3501_v28 = vmax.bf16 %v3485_v22, %v3414_v39  ;;  %v3511_v10 = vmax.bf16 %v3500_v32, %v3461_v40  ;;  %v3386_v11 = vsel %vm10302_vm7, %v3378_v0, 0  ;;  %v3534_v57 = vmax.bf16 %v3526_v59, %v3461_v40 }
 0x4c7   : > { %v3478_v37 = vmax.bf16 %v3462_v62, %v3448_v24  ;;  %v3425_v6 = vshll.u32 %v10777_v63, 16  ;;  %v3479_v20 = vmax.bf16 %v3463_v52, %v3449_v7  ;;  %v3432_v3 = vshll.u32 %v3385_v9, 16 }
 0x4c8   : > { %v3512_v8 = vmax.bf16 %v3501_v28, %v3462_v62  ;;  %v3519_v14 = vmax.bf16 %v3511_v10, %v3382_v2  ;;  %v7782_v13 = vcombine.low %v3533_v19, %v3534_v57  ;;  %v3423_v17 = vshrl.u32 %v10777_v63, 16  ;;  %v9316_v57 = vld [vmem:[%s12099_s9 + $0x8] ss:$12 sps:$4 sm:$0xff]  }
 0x4c9   : > { %v3427_v12 = vrot.slane %v3425_v6, 1  ;;  %v3430_v54 = vshrl.u32 %v3385_v9, 16  ;;  %v3434_v36 = vrot.slane %v3432_v3, 1  ;;  %v3486_v16 = vmax.bf16 %v3478_v37, %v10771_v27  ;;  %v9320_v37 = vld [vmem:[%s12099_s9 + $0x20] ss:$12 sps:$4 sm:$0xff]  }
 0x4ca   : > { %v3520_v51 = vmax.bf16 %v3512_v8, %v10771_v27  ;;  %v3527_v53 = vmax.bf16 %v3519_v14, %v3414_v39  ;;  %9003 = vmatprep.subr.bf16.mxu1 %v7782_v13  ;;  %v3487_v29 = vmax.bf16 %v3479_v20, %v10777_v63  ;;  %v3493_v31 = vshll.u32 %v3386_v11, 16  ;;  %v9324_v6 = vld [vmem:[%s12099_s9 + $0x38] ss:$12 sps:$4 sm:$0xff]   ;;  %v9328_v20 = vld [vmem:[%s12099_s9 + $0x50] ss:$12 sps:$4 sm:$0xff]  }
 0x4cb   : > { %v3428_v40 = vor.u32 %v3427_v12, %v3423_v17  ;;  %9004 = vmatpush3.bf16.msra.mxu1 %v7782_v13  ;;  %v3435_v35 = vor.u32 %v3434_v36, %v3430_v54  ;;  %v3502_v33 = vmax.bf16 %v3486_v16, %v3421_v21  ;;  %v3464_v61 = vrot.slane %v10777_v63, 1  ;;  %v9332_v8 = vld [vmem:[%s12099_s9 + $0x68] ss:$12 sps:$4 sm:$0xff]   ;;  %v9336_v14 = vld [vmem:[%s12099_s9 + $0x80] ss:$12 sps:$4 sm:$0xff]  }
 0x4cc   : > { %v3528_v5 = vmax.bf16 %v3520_v51, %v3421_v21  ;;  %v3535_v2 = vmax.bf16 %v3527_v53, %v3462_v62  ;;  %v3465_v47 = vrot.slane %v3385_v9, 1  ;;  %v3495_v27 = vrot.slane %v3493_v31, 1  ;;  %v9340_v3 = vld [vmem:[%s12099_s9 + $0x98] ss:$12 sps:$4 sm:$0xff]   ;;  %v9341_v13 = vld [vmem:[%s12099_s9 + $0xa8] ss:$12 sps:$4 sm:$0xff]  }
 0x4cd   : > { %v3450_v38 = vmax.bf16 %v3428_v40, %v10777_v63  ;;  %v3503_v46 = vmax.bf16 %v3487_v29, %v3428_v40  ;;  %v3451_v48 = vmax.bf16 %v3435_v35, %v3385_v9  ;;  %v3513_v41 = vmax.bf16 %v3502_v33, %v3463_v52  ;;  %v9343_v17 = vld [vmem:[%s12099_s9 + $0xac] ss:$12 sps:$4 sm:$0xff]   ;;  %v9344_v12 = vld [vmem:[%s12099_s9 + $0xb0] ss:$12 sps:$4 sm:$0xff]   ;;  %v9345_v54 = vld [vmem:[%s12101_s11 + $0xc0] sm:$0xff]  }
 0x4ce   : > { %v3536_v26 = vmax.bf16 %v3528_v5, %v3463_v52  ;;  %v3491_v23 = vshrl.u32 %v3386_v11, 16  ;;  %v3507_v21 = vrot.slane %v3386_v11, 1  ;;  %3841 = vmatprep.subr.bf16.mxu0 %v9343_v17  ;;  %v9348_v51 = vld [vmem:[%s12101_s11 + $0x40] sm:$0xff]   ;;  %v10848_v53 = vunpack.c.l.bf16 %v10312_v25 }
 0x4cf   : > { %v3480_v42 = vmax.bf16 %v3464_v61, %v3450_v38  ;;  %v3514_v1 = vmax.bf16 %v3503_v46, %v3464_v61  ;;  %v3481_v56 = vmax.bf16 %v3465_v47, %v3451_v48  ;;  %v3521_v49 = vmax.bf16 %v3513_v41, %v10777_v63  ;;  %3842 = vmatpush1.bf16.msra.mxu0 %v9341_v13 }
 0x4d0   : > { %v7783_v55 = vcombine.low %v3535_v2, %v3536_v26  ;;  %v3496_v58 = vor.u32 %v3495_v27, %v3491_v23  ;;  %8523 = vmatprep.subr.bf16.mxu0 %v9348_v51  ;;  %v6912_v36 = vunpack.c.h.bf16 %v10312_v25  ;;  %v6934_v16 = vrot.slane %v10848_v53, 1 }
 0x4d1   : > { %v3522_v50 = vmax.bf16 %v3514_v1, %v3385_v9  ;;  %v3488_v18 = vmax.bf16 %v3480_v42, %v3385_v9  ;;  %v3529_v30 = vmax.bf16 %v3521_v49, %v3428_v40  ;;  %v3489_v4 = vmax.bf16 %v3481_v56, %v3386_v11  ;;  %v9346_v42 = vld [vmem:[%s12101_s11 + $0x80] sm:$0xff]  }
 0x4d2   : > { %9005 = vmatprep.subr.bf16.mxu1 %v7783_v55  ;;  %v6935_v40 = vrot.slane %v6912_v36, 1  ;;  %v6955_v26 = vrot.slane %v10848_v53, 2  ;;  %v9350_v1 = vld [vmem:[%s12101_s11] sm:$0xff]  }
 0x4d3   : > { %9006 = vmatpush3.bf16.msra.mxu1 %v7783_v55  ;;  %v3530_v60 = vmax.bf16 %v3522_v50, %v3435_v35  ;;  %v3504_v39 = vmax.bf16 %v3488_v18, %v3435_v35  ;;  %v3537_v62 = vmax.bf16 %v3529_v30, %v3464_v61  ;;  %v3505_v0 = vmax.bf16 %v3496_v58, %v3489_v4  ;;  %v9347_v50 = vld [vmem:[%s12101_s11 + $0xc8] sm:$0xff]  }
 0x4d4   : > { %v10853_v33 = vsel %vm1640_vm4, %v6934_v16, %v6935_v40  ;;  %v6956_v55 = vrot.slane %v6912_v36, 2 }
 0x4d5   : > { %v3538_v22 = vmax.bf16 %v3530_v60, %v3465_v47  ;;  %v3515_v32 = vmax.bf16 %v3504_v39, %v3465_v47  ;;  %v3516_v59 = vmax.bf16 %v3507_v21, %v3505_v0 }
 0x4d7   : > { %v7784_v19 = vcombine.low %v3537_v62, %v3538_v22  ;;  %v3523_v24 = vmax.bf16 %v3515_v32, %v3386_v11  ;;  %v3524_v63 = vmax.bf16 %v3516_v59, %v10312_v25  ;;  %v9312_v11 = vld [vmem:[%s12157_s29 + $0x8] sm:$0xff]   ;;  %v6950_v62 = vadd.f32 %v10853_v33, %v10848_v53 }
 0x4d8   : > { %v9349_v32 = vld [vmem:[%s12101_s11 + $0x88] sm:$0xff]   ;;  %v10872_v59 = vsel %vm6954_vm9, %v6955_v26, %v6956_v55 }
 0x4d9   : > { %9007 = vmatprep.subr.bf16.mxu1 %v7784_v19  ;;  %v3531_v7 = vmax.bf16 %v3523_v24, %v3496_v58  ;;  %v3532_v9 = vmax.bf16 %v3524_v63, %v10331_v15 }
 0x4da   : > { %9008 = vmatpush3.bf16.msra.mxu1 %v7784_v19 }
 0x4db   : > { %v3539_v52 = vmax.bf16 %v3531_v7, %v3507_v21  ;;  %v3540_v28 = vmax.bf16 %v3532_v9, %v10522_v45 }
 0x4dd   : > { %v7785_v10 = vcombine.low %v3539_v52, %v3540_v28 }
 0x4df   : > { %9009 = vmatprep.subr.bf16.mxu1 %v7785_v10 }
 0x4e0   : > { %9010 = vmatpush3.bf16.msra.mxu1 %v7785_v10 }
 0x4e1   : > { %9015 = vmatprep.subr.bf16.mxu1 %v9316_v57 }
 0x4e3   : > { %9012 = vmatmul.mubr.msk.bf16.vlgmr.msra.gmra.mrb[72].mxu1 %vm3579_vm8, %v9312_v11 }
 0x4e4   : > { %9016 = vmatpush3.bf16.msra.mxu1 %v9316_v57  ;;  %v6971_v57 = vadd.f32 %v10872_v59, %v6950_v62 }
 0x4e5   : > { %9017 = vmatprep.subr.bf16.mxu1 %v9320_v37 }
 0x4e8   : > { %9018 = vmatpush3.bf16.msra.mxu1 %v9320_v37 }
 0x4e9   : > { %9019 = vmatprep.subr.bf16.mxu1 %v9324_v6 }
 0x4ec   : > { %9020 = vmatpush3.bf16.msra.mxu1 %v9324_v6 }
 0x4ed   : > { %9021 = vmatprep.subr.bf16.mxu1 %v9328_v20 }
 0x4f0   : > { %9022 = vmatpush3.bf16.msra.mxu1 %v9328_v20 }
 0x4f1   : > { %9023 = vmatprep.subr.bf16.mxu1 %v9332_v8 }
 0x4f4   : > { %9024 = vmatpush3.bf16.msra.mxu1 %v9332_v8 }
 0x4f5   : > { %9025 = vmatprep.subr.bf16.mxu1 %v9336_v14 }
 0x4f8   : > { %9026 = vmatpush3.bf16.msra.mxu1 %v9336_v14 }
 0x4f9   : > { %9027 = vmatprep.subr.bf16.mxu1 %v9340_v3 }
 0x4fc   : > { %9028 = vmatpush3.bf16.msra.mxu1 %v9340_v3 }
 0x4fd   : > { %9029 = vmatprep.subr.bf16.mxu1 %v9344_v12 }
 0x500   : > { %9030 = vmatpush3.bf16.msra.mxu1 %v9344_v12 }
 0x501   : > { %8551 = vmatprep.subr.bf16.mxu1 %v9345_v54 }
 0x5b6   : > { %v9013_v29 = vpop.f32.mrb[72].mxu1 }
 0x5b7   : > { %v8167_v31 = vpack.c.bf16 %v9013_v29, %v9013_v29  ;;  %v3620_v5 = vpop.f32.mrb[73].mxu1 }
 0x5b8   : > { %v8165_v2 = vpack.c.bf16 %v3620_v5, %v3620_v5  ;;  %v9014_v35 = vpop.f32.mrb[74].mxu1 }
 0x5b9   : > { %v6886_v38 = vshrl.u32 %v8167_v31, 16  ;;  %v3636_v61 = vpack.c.bf16 %v9014_v35, %v9013_v29  ;;  %v8168_v47 = vpack.c.bf16 %v9014_v35, %v9014_v35  ;;  %v3623_v46 = vpop.f32.mrb[75].mxu1  ;;  %v6889_v49 = vshll.u32 %v8167_v31, 16 }
 0x5ba   : > { %v6872_v48 = vshrl.u32 %v8165_v2, 16  ;;  %v3635_v41 = vpack.c.bf16 %v3623_v46, %v3620_v5  ;;  %v8166_v27 = vpack.c.bf16 %v3623_v46, %v3623_v46  ;;  %v6875_v30 = vshll.u32 %v8165_v2, 16 }
 0x5bb   : > { %v6888_v56 = vrot.slane %v6886_v38, 7  ;;  %v6893_v23 = vshrl.u32 %v8168_v47, 16  ;;  %v6896_v39 = vshll.u32 %v8168_v47, 16 }
 0x5bc   : > { %v6874_v18 = vrot.slane %v6872_v48, 7  ;;  %v6879_v4 = vshrl.u32 %v8166_v27, 16  ;;  %3860 = vmatmul.mubr.bf16.vlgmr.msra.gmra.mrb[88].mxu0 %v3635_v41  ;;  %9031 = vmatprep.mubr.bf16.mxu1 %v3635_v41  ;;  %v6882_v22 = vshll.u32 %v8166_v27, 16 }
 0x5bd   : > { %v6891_v58 = vor.u32 %v6889_v49, %v6888_v56  ;;  %v6895_v60 = vrot.slane %v6893_v23, 7  ;;  %9032 = vmatmul.mubr.bf16.vlgmr.msra.gmra.mrb[76].mxu1 %v3636_v61  ;;  %3869 = vmatprep.mubr.bf16.mxu0 %v9666_v44 }
 0x5be   : > { %v6877_v0 = vor.u32 %v6875_v30, %v6874_v18  ;;  %v6881_v21 = vrot.slane %v6879_v4, 7  ;;  %8552 = vmatpush3.bf16.msra.mxu1 %v9346_v42  ;;  %8524 = vmatpush3.bf16.msra.mxu0 %v9350_v1 }
 0x5bf   : > { %v6905_v19 = vsel %vm9908_vm2, 0, %v6891_v58  ;;  %v6898_v24 = vor.u32 %v6896_v39, %v6895_v60  ;;  %8553 = vmatprep.subr.bf16.mxu1 %v9347_v50 }
 0x5c0   : > { %v6909_v63 = vsel %vm10302_vm7, %v6905_v19, 0  ;;  %v6903_v7 = vsel %vm9908_vm2, 0, %v6877_v0  ;;  %v6884_v9 = vor.u32 %v6882_v22, %v6881_v21 }
 0x5c1   : > { %v6918_v52 = vunpack.c.h.bf16 %v6909_v63  ;;  %v6907_v28 = vsel %vm10302_vm7, %v6903_v7, 0  ;;  %v6906_v10 = vsel %vm9908_vm2, 0, %v6898_v24  ;;  %v6917_v11 = vunpack.c.l.bf16 %v6909_v63 }
 0x5c2   : > { %v6913_v37 = vunpack.c.l.bf16 %v6907_v28  ;;  %v6914_v6 = vunpack.c.h.bf16 %v6907_v28  ;;  %v6910_v20 = vsel %vm10302_vm7, %v6906_v10, 0  ;;  %8554 = vmatpush3.bf16.msra.mxu1 %v9349_v32  ;;  %v6904_v13 = vsel %vm9908_vm2, 0, %v6884_v9 }
 0x5c3   : > { %v6944_v8 = vrot.slane %v6918_v52, 1  ;;  %v6919_v14 = vunpack.c.l.bf16 %v6910_v20  ;;  %v6920_v3 = vunpack.c.h.bf16 %v6910_v20  ;;  %v6965_v36 = vrot.slane %v6918_v52, 2 }
 0x5c4   : > { %v6937_v17 = vrot.slane %v6913_v37, 1  ;;  %v6938_v12 = vrot.slane %v6914_v6, 1  ;;  %v6958_v54 = vrot.slane %v6913_v37, 2  ;;  %v6959_v51 = vrot.slane %v6914_v6, 2  ;;  %3870 = vmatmul.mubr.bf16.gmra.mrb[92].mxu0 %v3636_v61 }
 0x5c5   : > { %v6981_v16 = vrot.slane %v6919_v14, 1  ;;  %v6908_v40 = vsel %vm10302_vm7, %v6904_v13, 0  ;;  %v6943_v31 = vrot.slane %v6917_v11, 1  ;;  %v6964_v38 = vrot.slane %v6917_v11, 2 }
 0x5c6   : > { %v6939_v29 = vsel %vm1640_vm4, %v6937_v17, %v6938_v12  ;;  %v6915_v5 = vunpack.c.l.bf16 %v6908_v40  ;;  %v6916_v2 = vunpack.c.h.bf16 %v6908_v40  ;;  %v6982_v47 = vrot.slane %v6920_v3, 1  ;;  %v9352_v40 = vld [vmem:[%s12101_s11 + $0x48] sm:$0xff]  }
 0x5c7   : > { %v6951_v35 = vadd.f32 %v6939_v29, %v6913_v37  ;;  %v6945_v46 = vsel %vm1640_vm4, %v6943_v31, %v6944_v8  ;;  %v6960_v26 = vsel %vm6954_vm9, %v6958_v54, %v6959_v51  ;;  %v6975_v48 = vadd.f32 %v6971_v57, %v6913_v37  ;;  %8525 = vmatprep.subr.bf16.mxu0 %v9352_v40  ;;  %v9355_v31 = vld [vmem:[%s12101_s11 + $0xd8] sm:$0xff]  }
 0x5c8   : > { %v6941_v41 = vrot.slane %v6916_v2, 1  ;;  %v6962_v61 = vrot.slane %v6916_v2, 2  ;;  %v6940_v27 = vrot.slane %v6915_v5, 1  ;;  %v6953_v42 = vadd.f32 %v6945_v46, %v6917_v11  ;;  %v9357_v2 = vld [vmem:[%s12101_s11 + $0x98] sm:$0xff]  }
 0x5c9   : > { %v6961_v1 = vrot.slane %v6915_v5, 2  ;;  %v6966_v55 = vsel %vm6954_vm9, %v6964_v38, %v6965_v36  ;;  %v6972_v56 = vadd.f32 %v6960_v26, %v6951_v35  ;;  %v6985_v49 = vadd.f32 %v6975_v48, %v6939_v29  ;;  %v9354_v29 = vld [vmem:[%s12101_s11 + $0x8] sm:$0xff]   ;;  %v9358_v35 = vld [vmem:[%s12101_s11 + $0x10] sm:$0xff]   ;;  %v9359_v38 = vld [vmem:[%s12101_s11 + $0xe0] sm:$0xff]  }
 0x5ca   : > { %v6989_v23 = vrot.slane %v6919_v14, 2  ;;  %v6942_v50 = vsel %vm1640_vm4, %v6940_v27, %v6941_v41  ;;  %v6974_v18 = vadd.f32 %v6966_v55, %v6953_v42  ;;  %v6990_v30 = vrot.slane %v6920_v3, 2  ;;  %8526 = vmatpush3.bf16.msra.mxu0 %v9354_v29  ;;  %v9363_v48 = vld [vmem:[%s12101_s11 + $0xe8] sm:$0xff]   ;;  %v9364_v41 = vld [vmem:[%s12101_s11 + $0x60] sm:$0xff]   ;;  %v9367_v42 = vld [vmem:[%s12101_s11 + $0xf0] sm:$0xff]  }
 0x5cb   : > { %v6952_v4 = vadd.f32 %v6942_v50, %v6915_v5  ;;  %v6976_v58 = vadd.f32 %v6972_v56, %v6915_v5  ;;  %v6993_v60 = vadd.f32 %v6985_v49, %v6960_v26  ;;  %v6963_v39 = vsel %vm6954_vm9, %v6961_v1, %v6962_v61  ;;  %v9362_v26 = vld [vmem:[%s12101_s11 + $0x18] sm:$0xff]   ;;  %v9365_v61 = vld [vmem:[%s12101_s11 + $0xa8] sm:$0xff]   ;;  %v9366_v27 = vld [vmem:[%s12101_s11 + $0x20] sm:$0xff]  }
 0x5cc   : > { %v6978_v62 = vadd.f32 %v6974_v18, %v6919_v14  ;;  %v6983_v21 = vsel %vm1640_vm4, %v6981_v16, %v6982_v47  ;;  %v6991_v9 = vsel %vm6954_vm9, %v6989_v23, %v6990_v30  ;;  %v9360_v47 = vld [vmem:[%s12101_s11 + $0x58] sm:$0xff]   ;;  %v9368_v1 = vld [vmem:[%s12101_s11 + $0x68] sm:$0xff]   ;;  %v9372_v23 = vld [vmem:[%s12101_s11 + $0x70] sm:$0xff]  }
 0x5cd   : > { %v6973_v0 = vadd.f32 %v6963_v39, %v6952_v4  ;;  %v6986_v22 = vadd.f32 %v6976_v58, %v6942_v50  ;;  %v6997_v32 = vadd.f32 %v6993_v60, %v6915_v5  ;;  %v9356_v5 = vld [vmem:[%s12101_s11 + $0x50] sm:$0xff]   ;;  %v9370_v56 = vld [vmem:[%s12101_s11 + $0x28] sm:$0xff]   ;;  %v9371_v49 = vld [vmem:[%s12101_s11 + $0xf8] sm:$0xff]  }
 0x5ce   : > { %v6988_v19 = vadd.f32 %v6983_v21, %v6978_v62  ;;  %8527 = vmatprep.subr.bf16.mxu0 %v9356_v5  ;;  %v9374_v18 = vld [vmem:[%s12101_s11 + $0x30] sm:$0xff]   ;;  %v9375_v30 = vld [vmem:[%s12101_s11 + $0x1c0] sm:$0xff]   ;;  %v9376_v4 = vld [vmem:[%s12101_s11 + $0x78] sm:$0xff]  }
 0x5cf   : > { %v6977_v24 = vadd.f32 %v6973_v0, %v6917_v11  ;;  %v6994_v63 = vadd.f32 %v6986_v22, %v6963_v39  ;;  %v7001_v7 = vadd.f32 %v6997_v32, %v6942_v50  ;;  %8528 = vmatpush3.bf16.msra.mxu0 %v9358_v35  ;;  %v9373_v50 = vld [vmem:[%s12101_s11 + $0xb8] sm:$0xff]   ;;  %v9380_v60 = vld [vmem:[%s12101_s11 + $0x140] sm:$0xff]  }
 0x5d0   : > { %v6996_v52 = vadd.f32 %v6991_v9, %v6988_v19  ;;  %8529 = vmatprep.subr.bf16.mxu0 %v9360_v47  ;;  %v9378_v58 = vld [vmem:[%s12101_s11 + $0x38] sm:$0xff]  }
 0x5d1   : > { %v6987_v28 = vadd.f32 %v6977_v24, %v6945_v46  ;;  %v6998_v10 = vadd.f32 %v6994_v63, %v6917_v11  ;;  %v7005_v57 = vadd.f32 %v7001_v7, %v6963_v39  ;;  %v3637_v39 = vlaneseq }
 0x5d2   : > { %v7000_v37 = vadd.f32 %v6996_v52, %v10848_v53 }
 0x5d3   : > { %v6995_v6 = vadd.f32 %v6987_v28, %v6966_v55  ;;  %v7002_v20 = vadd.f32 %v6998_v10, %v6945_v46  ;;  %v10901_v12 = vmul.f32 0.11111111, %v7005_v57  ;;  %v9361_v46 = vld [vmem:[%s12101_s11 + $0xa0] sm:$0xff]   ;;  %8530 = vmatpush3.bf16.msra.mxu0 %v9362_v26  ;;  %v3638_v62 = vshrl.u32 %v3637_v39, 7 }
 0x5d4   : > { %v7004_v8 = vadd.f32 %v7000_v37, %v10853_v33  ;;  %8531 = vmatprep.subr.bf16.mxu0 %v9364_v41  ;;  %v3682_v10 = vld [vmem:[%s12100_s10] sm:$0x7] }
 0x5d5   : > { %v6999_v3 = vadd.f32 %v6995_v6, %v6919_v14  ;;  %v7006_v13 = vadd.f32 %v7002_v20, %v6966_v55  ;;  %v9351_v14 = vld [vmem:[%s12101_s11 + $0xd0] sm:$0xff]   ;;  %v3639_v0 = vadd.s32 8, %v3638_v62  ;;  %v3641_v22 = vadd.s32 24, %v3638_v62 }
 0x5d6   : > { %v7008_v51 = vadd.f32 %v7004_v8, %v10872_v59  ;;  %v9353_v59 = vld [vmem:[%s12101_s11 + $0x90] sm:$0xff]   ;;  %8555 = vmatprep.subr.bf16.mxu1 %v9351_v14  ;;  %v3642_v32 = vand.u32 7, %v3638_v62  ;;  %v3686_v52 = vsub.s32 0, %v3638_v62  ;;  %v3690_v57 = vsub.s32 1, %v3638_v62 }
 0x5d7   : > { %v7003_v17 = vadd.f32 %v6999_v3, %v6983_v21  ;;  %v10903_v54 = vmul.f32 0.11111111, %v7006_v13  ;;  %8556 = vmatpush3.bf16.msra.mxu1 %v9353_v59  ;;  %8532 = vmatpush3.bf16.msra.mxu0 %v9366_v27  ;;  %v9369_v55 = vld [vmem:[%s12101_s11 + $0xb0] sm:$0xff]   ;;  %v3640_v21 = vadd.s32 16, %v3638_v62  ;;  %v3643_v19 = vand.u32 7, %v3639_v0 }
 0x5d8   : > { %v10910_v53 = vmul.f32 0.11111111, %v7008_v51  ;;  %8557 = vmatprep.subr.bf16.mxu1 %v9355_v31  ;;  %8533 = vmatprep.subr.bf16.mxu0 %v9368_v1  ;;  %v3645_v63 = vand.u32 7, %v3641_v22  ;;  %vm10998_vm10 = vcmp.lt.s32.totalorder %v3642_v32, 4  ;;  %v3694_v37 = vsub.s32 2, %v3638_v62 }
 0x5d9   : > { %v8169_v36 = vpack.c.bf16 %v10903_v54, %v10901_v12  ;;  %v7007_v11 = vadd.f32 %v7003_v17, %v6991_v9  ;;  %v3644_v24 = vand.u32 7, %v3640_v21  ;;  %vm11002_vm11 = vcmp.lt.s32.totalorder %v3643_v19, 4  ;;  %vm3947_vm13 = vmpackc.low %vm10998_vm10, %vm10998_vm10  ;;  %v9562_v12 = vld [vmem:[%s12107_s17 + $0x28] sm:$0xff]   ;;  %v9563_v54 = vld [vmem:[%s12105_s15 + $0x220] sm:$0xff]  }
 0x5da   : > { %vm3649_vm14 = vcmp.lt.s32.totalorder %v3645_v63, 4  ;;  %vm3948_vm15 = vmpackc.low %vm11002_vm11, %vm11002_vm11  ;;  %v3687_v6 = vrot.slane %v3682_v10, %v3686_v52  ;;  %v3691_v20 = vrot.slane %v3682_v10, %v3690_v57  ;;  %v3695_v8 = vrot.slane %v3682_v10, %v3694_v37 }
 0x5db   : > { %v10908_v16 = vmul.f32 0.11111111, %v7007_v11  ;;  %8558 = vmatpush3.bf16.msra.mxu1 %v9357_v2  ;;  %8534 = vmatpush3.bf16.msra.mxu0 %v9370_v56  ;;  %vm11006_vm12 = vcmp.lt.s32.totalorder %v3644_v24, 4  ;;  %vm3950_vm1 = vmpackc.low %vm3649_vm14, %vm3649_vm14  ;;  %v3951_v3 = vsel %vm3947_vm13, 65537, %v9666_v44  ;;  %v3952_v13 = vsel %vm3948_vm15, 65537, %v9666_v44 }
 0x5dc   : > { %8559 = vmatprep.subr.bf16.mxu1 %v9359_v38  ;;  %8535 = vmatprep.subr.bf16.mxu0 %v9372_v23  ;;  %vm3949_vm0 = vmpackc.low %vm11006_vm12, %vm11006_vm12  ;;  %v3954_v11 = vsel %vm3950_vm1, 65537, %v9666_v44  ;;  %v7812_v29 = vcombine.low %v3951_v3, %v3952_v13 }
 0x5dd   : > { %v8170_v33 = vpack.c.bf16 %v10910_v53, %v10908_v16  ;;  %v3953_v51 = vsel %vm3949_vm0, 65537, %v9666_v44  ;;  %v9572_v16 = vld [vmem:[%s12109_s19 + $0x8] sm:$0xff]   ;;  %v9574_v53 = vld [vmem:[%s12109_s19 + $0x10] sm:$0xff]  }
 0x5de   : > { %vm11026_vm3 = vcmp.ne.s16.totalorder %v7812_v29, 0 }
 0x5df   : > { %8560 = vmatpush3.bf16.msra.mxu1 %v9361_v46  ;;  %8536 = vmatpush3.bf16.msra.mxu0 %v9374_v18 }
 0x5e0   : > { %8561 = vmatprep.subr.bf16.mxu1 %v9363_v48  ;;  %8537 = vmatprep.subr.bf16.mxu0 %v9376_v4  ;;  %v7813_v48 = vcombine.low %v3953_v51, %v3954_v11 }
 0x5e2   : > { %vm11032_vm4 = vcmp.ne.s16.totalorder %v7813_v48, 0 }
 0x5e3   : > { %8562 = vmatpush3.bf16.msra.mxu1 %v9365_v61  ;;  %8538 = vmatpush3.bf16.msra.mxu0 %v9378_v58 }
 0x5e4   : > { %8563 = vmatprep.subr.bf16.mxu1 %v9367_v42  ;;  %8579 = vmatprep.subr.bf16.mxu0 %v9380_v60 }
 0x5e7   : > { %8564 = vmatpush3.bf16.msra.mxu1 %v9369_v55 }
 0x5e8   : > { %8565 = vmatprep.subr.bf16.mxu1 %v9371_v49 }
 0x5eb   : > { %8566 = vmatpush3.bf16.msra.mxu1 %v9373_v50 }
 0x5ec   : > { %8607 = vmatprep.subr.bf16.mxu1 %v9375_v30 }
 0x68f   : > { %v3861_v17 = vpop.f32.mrb[88].mxu0 }
 0x690   : > { %v3862_v14 = vadd.f32 %v3861_v17, %v3687_v6  ;;  %v3863_v40 = vpop.f32.mrb[89].mxu0  ;;  %v9033_v59 = vpop.f32.mrb[76].mxu1 }
 0x691   : > { %v3864_v31 = vadd.f32 %v3863_v40, %v3691_v20  ;;  %v3923_v5 = vadd.f32 %v9033_v59, %v3695_v8  ;;  %v3865_v2 = vpop.f32.mrb[90].mxu0  ;;  %v3914_v35 = vpop.f32.mrb[77].mxu1 }
 0x692   : > { %v3866_v38 = vadd.f32 %v3865_v2, %v3687_v6  ;;  %v3915_v47 = vadd.f32 %v3914_v35, %v3695_v8  ;;  %v3867_v46 = vpop.f32.mrb[91].mxu0  ;;  %v9034_v26 = vpop.f32.mrb[78].mxu1  ;;  %v3929_v42 = vmax.f32 %v3862_v14, 0.0 }
 0x693   : > { %v3868_v41 = vadd.f32 %v3867_v46, %v3691_v20  ;;  %v3926_v61 = vadd.f32 %v9034_v26, %v3695_v8  ;;  %v3917_v27 = vpop.f32.mrb[79].mxu1  ;;  %v3930_v56 = vmax.f32 %v3864_v31, 0.0  ;;  %v3937_v49 = vmax.f32 %v3923_v5, 0.0 }
 0x694   : > { %v3932_v1 = vmax.f32 %v3866_v38, 0.0  ;;  %v3918_v55 = vadd.f32 %v3917_v27, %v3695_v8  ;;  %v3931_v30 = vmax.f32 %v3915_v47, 0.0 }
 0x695   : > { %v3933_v23 = vmax.f32 %v3868_v41, 0.0  ;;  %v3940_v50 = vmax.f32 %v3926_v61, 0.0 }
 0x696   : > { %v11030_v18 = vpack.c.bf16 %v3932_v1, %v3929_v42  ;;  %v3934_v58 = vmax.f32 %v3918_v55, 0.0 }
 0x697   : > { %v3942_v60 = vpack.c.bf16 %v3933_v23, %v3930_v56  ;;  %v3946_v39 = vpack.c.bf16 %v3940_v50, %v3937_v49  ;;  %v3871_v62 = vpop.f32.mrb[92].mxu0 }
 0x698   : > { %v3943_v0 = vpack.c.bf16 %v3934_v58, %v3931_v30  ;;  %v3873_v21 = vpop.f32.mrb[93].mxu0  ;;  %v3872_v37 = vadd.f32 %v3871_v62, %v3687_v6 }
 0x699   : > { %v3965_v22 = vsel %vm11026_vm3, %v3942_v60, 0  ;;  %v11040_v32 = vsel %vm11032_vm4, %v3946_v39, 0  ;;  %v3875_v19 = vpop.f32.mrb[94].mxu0  ;;  %v3874_v13 = vadd.f32 %v3873_v21, %v3691_v20  ;;  %v9377_v39 = vld [vmem:[%s12101_s11 + $0x180] sm:$0xff]  }
 0x69a   : > { %v7814_v24 = vcombine.low %v3965_v22, %v3965_v22  ;;  %v7815_v63 = vcombine.high %v3965_v22, %v3965_v22  ;;  %v7908_v7 = vcombine.low %v11040_v32, %v11040_v32  ;;  %v3877_v9 = vpop.f32.mrb[95].mxu0  ;;  %v11046_v52 = vsel %vm11026_vm3, %v3943_v0, 0  ;;  %v9379_v0 = vld [vmem:[%s12101_s11 + $0x1c8] sm:$0xff]  }
 0x69b   : > { %v3876_v28 = vadd.f32 %v3875_v19, %v3687_v6  ;;  %v7907_v14 = vcombine.high %v11046_v52, %v11046_v52  ;;  %v3878_v59 = vadd.f32 %v3877_v9, %v3691_v20  ;;  %v3935_v5 = vmax.f32 %v3872_v37, 0.0 }
 0x69c   : > { %v3980_v10 = vshrl.u32 %v7814_v24, 16  ;;  %v3987_v57 = vshrl.u32 %v7815_v63, 16  ;;  %v3983_v8 = vshll.u32 %v7814_v24, 16  ;;  %v3990_v3 = vshll.u32 %v7815_v63, 16 }
 0x69d   : > { %v4958_v11 = vshrl.u32 %v7908_v7, 16  ;;  %v3938_v40 = vmax.f32 %v3876_v28, 0.0  ;;  %v4951_v2 = vshrl.u32 %v7907_v14, 16  ;;  %v3936_v35 = vmax.f32 %v3874_v13, 0.0  ;;  %v9382_v13 = vld [vmem:[%s12101_s11 + $0x100] sm:$0xff]  }
 0x69e   : > { %v3982_v17 = vrot.slane %v3980_v10, 7  ;;  %v3989_v51 = vrot.slane %v3987_v57, 7  ;;  %v3939_v6 = vmax.f32 %v3878_v59, 0.0  ;;  %v4954_v48 = vshll.u32 %v7907_v14, 16 }
 0x69f   : > { %v4960_v38 = vrot.slane %v4958_v11, 7  ;;  %v11050_v47 = vpack.c.bf16 %v3938_v40, %v3935_v5  ;;  %v4953_v26 = vrot.slane %v4951_v2, 7  ;;  %v4961_v61 = vshll.u32 %v7908_v7, 16 }
 0x6a0   : > { %v3985_v29 = vor.u32 %v3983_v8, %v3982_v17  ;;  %v3992_v31 = vor.u32 %v3990_v3, %v3989_v51  ;;  %v3945_v27 = vpack.c.bf16 %v3939_v6, %v3936_v35  ;;  %v9381_v8 = vld [vmem:[%s12101_s11 + $0x188] sm:$0xff]   ;;  %v9383_v17 = vld [vmem:[%s12101_s11 + $0x1d0] sm:$0xff]  }
 0x6a1   : > { %v4956_v42 = vor.u32 %v4954_v48, %v4953_v26  ;;  %v4963_v56 = vor.u32 %v4961_v61, %v4960_v38  ;;  %v9385_v6 = vld [vmem:[%s12101_s11 + $0x190] sm:$0xff]   ;;  %v9386_v26 = vld [vmem:[%s12101_s11 + $0x108] sm:$0xff]   ;;  %v9387_v48 = vld [vmem:[%s12101_s11 + $0x1d8] sm:$0xff]  }
 0x6a2   : > { %v4011_v46 = vsel %vm9908_vm2, 0, %v3985_v29  ;;  %v4012_v41 = vsel %vm9908_vm2, 0, %v3992_v31  ;;  %v3966_v49 = vsel %vm11032_vm4, %v3945_v27, 0  ;;  %v9384_v29 = vld [vmem:[%s12101_s11 + $0x148] sm:$0xff]   ;;  %v11113_v31 = vcombine.low %v11046_v52, %v11046_v52 }
 0x6a3   : > { %v11058_v20 = vsel %vm10302_vm7, %v4011_v46, 0  ;;  %v11062_v1 = vsel %vm10302_vm7, %v4012_v41, 0  ;;  %v4976_v30 = vsel %vm9908_vm2, 0, %v4956_v42  ;;  %v7816_v58 = vcombine.low %v3966_v49, %v3966_v49 }
 0x6a4   : > { %v4043_v55 = vrot.slane %v11058_v20, 1  ;;  %v7822_v23 = vcombine.low %v11058_v20, %v11062_v1  ;;  %v4022_v50 = vshll.u32 %v11058_v20, 16  ;;  %v7817_v60 = vcombine.high %v3966_v49, %v3966_v49  ;;  %v9388_v49 = vld [vmem:[%s12101_s11 + $0x150] sm:$0xff]  }
 0x6a5   : > { %v4020_v21 = vshrl.u32 %v11058_v20, 16  ;;  %v3994_v19 = vshrl.u32 %v7816_v58, 16  ;;  %v4977_v63 = vsel %vm9908_vm2, 0, %v4963_v56  ;;  %v11086_v7 = vsel %vm10302_vm7, %v4976_v30, 0 }
 0x6a6   : > { %4761 = vmatprep.mubr.bf16.mxu1 %v7822_v23  ;;  %v7821_v62 = vcombine.low %v10522_v45, %v4043_v55  ;;  %v4024_v22 = vrot.slane %v4022_v50, 1  ;;  %v4001_v24 = vshrl.u32 %v7817_v60, 16  ;;  %v3997_v10 = vshll.u32 %v7816_v58, 16 }
 0x6a7   : > { %v3996_v28 = vrot.slane %v3994_v19, 7  ;;  %v4004_v37 = vshll.u32 %v7817_v60, 16  ;;  %v4029_v51 = vshll.u32 %v11062_v1, 16  ;;  %v11104_v11 = vsel %vm10302_vm7, %v4977_v63, 0  ;;  %v9391_v19 = vld [vmem:[%s12101_s11 + $0x1e0] sm:$0xff]  }
 0x6a8   : > { %4762 = vmatmul.mubr.bf16.vlgmr.msra.gmra.mrb[80].mxu1 %v7821_v62  ;;  %v11088_v9 = vor.u32 %v4024_v22, %v4020_v21  ;;  %v4003_v57 = vrot.slane %v4001_v24, 7  ;;  %v7819_v59 = vcombine.low %v10312_v25, %v11058_v20  ;;  %v4993_v5 = vshll.u32 %v11086_v7, 16  ;;  %v9397_v20 = vld [vmem:[%s12101_s11 + $0x1a8] sm:$0xff]  }
 0x6a9   : > { %8608 = vmatpush3.bf16.msra.mxu1 %v9377_v39  ;;  %v3999_v14 = vor.u32 %v3997_v10, %v3996_v28  ;;  %v4044_v38 = vrot.slane %v11062_v1, 1  ;;  %v4031_v41 = vrot.slane %v4029_v51, 1  ;;  %v5000_v61 = vshll.u32 %v11104_v11, 16 }
 0x6aa   : > { %8609 = vmatprep.subr.bf16.mxu1 %v9379_v0  ;;  %v7820_v3 = vcombine.low %v10331_v15, %v11088_v9  ;;  %v4006_v40 = vor.u32 %v4004_v37, %v4003_v57  ;;  %v4995_v23 = vrot.slane %v4993_v5, 1  ;;  %v4944_v50 = vshrl.u32 %v11113_v31, 16  ;;  %v9389_v0 = vld [vmem:[%s12101_s11 + $0x198] sm:$0xff]  }
 0x6ab   : > { %v4013_v2 = vsel %vm9908_vm2, 0, %v3999_v14  ;;  %v4027_v30 = vshrl.u32 %v11062_v1, 16  ;;  %v4991_v21 = vshrl.u32 %v11086_v7, 16  ;;  %v4998_v24 = vshrl.u32 %v11104_v11, 16  ;;  %v9392_v37 = vld [vmem:[%s12101_s11 + $0x158] sm:$0xff]  }
 0x6ac   : > { %4712 = vmatprep.mubr.bf16.mxu0 %v7820_v3  ;;  %v4014_v35 = vsel %vm9908_vm2, 0, %v4006_v40  ;;  %v11126_v52 = vsel %vm10302_vm7, %v4013_v2, 0  ;;  %v5002_v10 = vrot.slane %v5000_v61, 1  ;;  %v11177_v57 = vcombine.low %v11086_v7, %v11104_v11  ;;  %v9394_v40 = vld [vmem:[%s12101_s11 + $0x118] sm:$0xff]   ;;  %v9396_v2 = vld [vmem:[%s12101_s11 + $0x160] sm:$0xff]   ;;  %v9401_v61 = vld [vmem:[%s12101_s11 + $0x1b0] sm:$0xff]  }
 0x6ad   : > { %8610 = vmatpush3.bf16.msra.mxu1 %v9381_v8  ;;  %4713 = vmatmul.mubr.bf16.vlgmr.msra.gmra.mrb[96].mxu0 %v7819_v59  ;;  %v11130_v46 = vsel %vm10302_vm7, %v4014_v35, 0  ;;  %v4045_v42 = vrot.slane %v11126_v52, 1  ;;  %v4036_v56 = vshll.u32 %v11126_v52, 16  ;;  %v11150_v58 = vcombine.low %v11062_v1, %v11126_v52  ;;  %v9390_v1 = vld [vmem:[%s12101_s11 + $0x110] sm:$0xff]   ;;  %v9395_v59 = vld [vmem:[%s12101_s11 + $0x1e8] sm:$0xff]  }
 0x6ae   : > { %8580 = vmatpush3.bf16.msra.mxu0 %v9382_v13  ;;  %8611 = vmatprep.subr.bf16.mxu1 %v9383_v17  ;;  %v7828_v27 = vcombine.low %v11126_v52, %v11130_v46  ;;  %v4034_v39 = vshrl.u32 %v11126_v52, 16  ;;  %v11161_v22 = vor.u32 %v4031_v41, %v4027_v30  ;;  %v11173_v28 = vor.u32 %v4995_v23, %v4991_v21  ;;  %v9393_v17 = vld [vmem:[%s12101_s11 + $0x1a0] sm:$0xff]   ;;  %v9405_v30 = vld [vmem:[%s12101_s11 + $0x1b8] sm:$0xff]  }
 0x6af   : > { %8581 = vmatprep.subr.bf16.mxu0 %v9384_v29  ;;  %v11154_v60 = vcombine.low %v4044_v38, %v4045_v42  ;;  %v4038_v62 = vrot.slane %v4036_v56, 1  ;;  %v5008_v8 = vrot.slane %v11086_v7, 1  ;;  %v4946_v3 = vrot.slane %v4944_v50, 7  ;;  %v9403_v56 = vld [vmem:[%s12101_s11 + $0x1f8] sm:$0xff]  }
 0x6b0   : > { %4769 = vmatprep.mubr.bf16.mxu1 %v7828_v27  ;;  %v11188_v51 = vor.u32 %v5002_v10, %v4998_v24  ;;  %v5009_v14 = vrot.slane %v11104_v11, 1  ;;  %v4947_v29 = vshll.u32 %v11113_v31, 16  ;;  %v7824_v5 = vcombine.low %v4043_v55, %v4044_v38  ;;  %v9398_v55 = vld [vmem:[%s12101_s11 + $0x120] sm:$0xff]   ;;  %v9399_v38 = vld [vmem:[%s12101_s11 + $0x1f0] sm:$0xff]   ;;  %v9402_v27 = vld [vmem:[%s12101_s11 + $0x128] sm:$0xff]  }
 0x6b1   : > { %8612 = vmatpush3.bf16.msra.mxu1 %v9385_v6  ;;  %v11171_v63 = vor.u32 %v4038_v62, %v4034_v39  ;;  %v4047_v39 = vshrl.u32 %v11130_v46, 16  ;;  %v9406_v62 = vld [vmem:[%s12101_s11 + $0x130] sm:$0xff]   ;;  %v9408_v21 = vld [vmem:[%s12101_s11 + $0x178] sm:$0xff]   ;;  %v9409_v24 = vld [vmem:[%s12103_s13] sm:$0xff]  }
 0x6b2   : > { %8582 = vmatpush3.bf16.msra.mxu0 %v9386_v26  ;;  %8613 = vmatprep.subr.bf16.mxu1 %v9387_v48  ;;  %v11205_v35 = vcombine.low %v11173_v28, %v11188_v51  ;;  %v11212_v31 = vcombine.low %v5008_v8, %v5009_v14  ;;  %v4949_v6 = vor.u32 %v4947_v29, %v4946_v3  ;;  %v9400_v26 = vld [vmem:[%s12101_s11 + $0x168] sm:$0xff]   ;;  %v4049_v48 = vshll.u32 %v11130_v46, 16  ;;  %v9410_v10 = vld [vmem:[%s12101_s11 + $0x138] sm:$0xff]  }
 0x6b3   : > { %4770 = vmatmul.mubr.bf16.gmra.mrb[84].mxu1 %v11154_v60  ;;  %8583 = vmatprep.subr.bf16.mxu0 %v9388_v49  ;;  %v7826_v13 = vcombine.low %v11161_v22, %v11171_v63  ;;  %v9404_v49 = vld [vmem:[%s12101_s11 + $0x170] sm:$0xff]  }
 0x6b4   : > { %v4975_v41 = vsel %vm9908_vm2, 0, %v4949_v6  ;;  %v4051_v23 = vrot.slane %v4049_v48, 1  ;;  %v9420_v48 = vld [vmem:[%s12103_s13 + $0x60] sm:$0xff]  }
 0x6b5   : > { %8614 = vmatpush3.bf16.msra.mxu1 %v9389_v0  ;;  %4720 = vmatprep.mubr.bf16.mxu0 %v7826_v13  ;;  %v11243_v50 = vsel %vm10302_vm7, %v4975_v41, 0  ;;  %v9407_v0 = vld [vmem:[%s12103_s13 + $0x40] sm:$0xff]   ;;  %v9421_v41 = vld [vmem:[%s12101_s11 + $0x218] sm:$0xff]  }
 0x6b6   : > { %8584 = vmatpush3.bf16.msra.mxu0 %v9390_v1  ;;  %8615 = vmatprep.subr.bf16.mxu1 %v9391_v19  ;;  %v4052_v1 = vor.u32 %v4051_v23, %v4047_v39  ;;  %v4986_v19 = vshll.u32 %v11243_v50, 16  ;;  %v4984_v29 = vshrl.u32 %v11243_v50, 16  ;;  %v9428_v23 = vld [vmem:[%s12103_s13 + $0x30] sm:$0xff]  }
 0x6b7   : > { %4859 = vmatprep.mubr.bf16.mxu1 %v7826_v13  ;;  %4721 = vmatmul.mubr.bf16.gmra.mrb[100].mxu0 %v11150_v58  ;;  %v9412_v13 = vld [vmem:[%s12101_s11 + $0x200] sm:$0xff]   ;;  %v9430_v39 = vld [vmem:[%s12101_s11 + $0x230] sm:$0xff]  }
 0x6b8   : > { %8585 = vmatprep.subr.bf16.mxu0 %v9392_v37  ;;  %4810 = vmatprep.mubr.bf16.mxu0 %v7824_v5  ;;  %v9411_v37 = vld [vmem:[%s12103_s13 + $0x48] sm:$0xff]   ;;  %v7832_v3 = vcombine.low %v4052_v1, %v10331_v15  ;;  %v7823_v5 = vcombine.low %v11088_v9, %v11161_v22  ;;  %v9416_v9 = vld [vmem:[%s12103_s13 + $0x10] sm:$0xff]   ;;  %v7831_v22 = vcombine.low %v11130_v46, %v10312_v25 }
 0x6b9   : > { %8616 = vmatpush3.bf16.msra.mxu1 %v9393_v17  ;;  %v4988_v17 = vrot.slane %v4986_v19, 1  ;;  %v7911_v19 = vcombine.low %v10312_v25, %v11243_v50 }
 0x6ba   : > { %8586 = vmatpush3.bf16.msra.mxu0 %v9394_v40  ;;  %8617 = vmatprep.subr.bf16.mxu1 %v9395_v59  ;;  %v4054_v40 = vrot.slane %v11130_v46, 1  ;;  %v9413_v59 = vld [vmem:[%s12103_s13 + $0x8] sm:$0xff]   ;;  %v9441_v46 = vld [vmem:[%s12103_s13 + $0x110] sm:$0xff]  }
 0x6bb   : > { %8587 = vmatprep.subr.bf16.mxu0 %v9396_v2  ;;  %v9415_v2 = vld [vmem:[%s12101_s11 + $0x208] sm:$0xff]   ;;  %v11286_v6 = vor.u32 %v4988_v17, %v4984_v29  ;;  %v9439_v17 = vld [vmem:[%s12103_s13 + $0x150] sm:$0xff]   ;;  %v5007_v29 = vrot.slane %v11243_v50, 1 }
 0x6bd   : > { %8618 = vmatpush3.bf16.msra.mxu1 %v9397_v20  ;;  %v7830_v20 = vcombine.low %v4045_v42, %v4054_v40  ;;  %v7912_v52 = vcombine.low %v10331_v15, %v11286_v6  ;;  %v9418_v42 = vld [vmem:[%s12101_s11 + $0x210] sm:$0xff]  }
 0x6be   : > { %8588 = vmatpush3.bf16.msra.mxu0 %v9398_v55  ;;  %8619 = vmatprep.subr.bf16.mxu1 %v9399_v38  ;;  %v9417_v55 = vld [vmem:[%s12103_s13 + $0x58] sm:$0xff]  }
 0x6bf   : > { %8589 = vmatprep.subr.bf16.mxu0 %v9400_v26  ;;  %v9419_v38 = vld [vmem:[%s12103_s13 + $0x18] sm:$0xff]   ;;  %v7829_v26 = vcombine.low %v11171_v63, %v4052_v1  ;;  %v9423_v63 = vld [vmem:[%s12103_s13 + $0x68] sm:$0xff]   ;;  %v9434_v1 = vld [vmem:[%s12103_s13 + $0x100] sm:$0xff]  }
 0x6c1   : > { %8620 = vmatpush3.bf16.msra.mxu1 %v9401_v61  ;;  %v9422_v61 = vld [vmem:[%s12103_s13 + $0x20] sm:$0xff]  }
 0x6c2   : > { %8590 = vmatpush3.bf16.msra.mxu0 %v9402_v27  ;;  %8621 = vmatprep.subr.bf16.mxu1 %v9403_v56  ;;  %v9424_v27 = vld [vmem:[%s12101_s11 + $0x220] sm:$0xff]   ;;  %v9425_v56 = vld [vmem:[%s12103_s13 + $0x28] sm:$0xff]  }
 0x6c3   : > { %8591 = vmatprep.subr.bf16.mxu0 %v9404_v49  ;;  %v9427_v49 = vld [vmem:[%s12101_s11 + $0x228] sm:$0xff]  }
 0x6c5   : > { %8622 = vmatpush3.bf16.msra.mxu1 %v9405_v30  ;;  %v9429_v30 = vld [vmem:[%s12103_s13 + $0x78] sm:$0xff]  }
 0x6c6   : > { %8592 = vmatpush3.bf16.msra.mxu0 %v9406_v62  ;;  %8645 = vmatprep.subr.bf16.mxu1 %v9407_v0  ;;  %v9431_v62 = vld [vmem:[%s12103_s13 + $0x38] sm:$0xff]   ;;  %v9432_v0 = vld [vmem:[%s12103_s13 + $0x140] sm:$0xff]  }
 0x6c7   : > { %8593 = vmatprep.subr.bf16.mxu0 %v9408_v21  ;;  %v9433_v21 = vld [vmem:[%s12101_s11 + $0x238] sm:$0xff]  }
 0x6c8   : > { %4860 = vmatmul.mubr.bf16.vlgmr.msra.gmra.mrb[88].mxu1 %v11150_v58  ;;  %v9414_v58 = vld [vmem:[%s12103_s13 + $0x50] sm:$0xff]  }
 0x6c9   : > { %4867 = vmatprep.mubr.bf16.mxu1 %v7832_v3  ;;  %8646 = vmatpush3.bf16.msra.mxu1 %v9409_v24  ;;  %v9435_v24 = vld [vmem:[%s12103_s13 + $0x148] sm:$0xff]   ;;  %v9438_v3 = vld [vmem:[%s12103_s13 + $0x80] sm:$0xff]  }
 0x6ca   : > { %8594 = vmatpush3.bf16.msra.mxu0 %v9410_v10  ;;  %8647 = vmatprep.subr.bf16.mxu1 %v9411_v37  ;;  %v9436_v10 = vld [vmem:[%s12103_s13 + $0xc0] sm:$0xff]   ;;  %v9437_v37 = vld [vmem:[%s12103_s13 + $0x108] sm:$0xff]  }
 0x6cb   : > { %9035 = vmatprep.subr.bf16.mxu0 %v9412_v13 }
 0x6cd   : > { %4811 = vmatmul.mubr.bf16.vlgmr.msra.gmra.mrb[104].mxu0 %v7823_v5  ;;  %8648 = vmatpush3.bf16.msra.mxu1 %v9413_v59  ;;  %v9440_v59 = vld [vmem:[%s12103_s13 + $0xc8] sm:$0xff]   ;;  %v7909_v5 = vcombine.high %v11040_v32, %v11040_v32  ;;  %v7916_v32 = vcombine.low %v5007_v29, %v5008_v8  ;;  %v9447_v8 = vld [vmem:[%s12103_s13 + $0x160] sm:$0xff]  }
 0x6ce   : > { %4818 = vmatprep.mubr.bf16.mxu0 %v7830_v20  ;;  %9036 = vmatpush3.bf16.msra.mxu0 %v9412_v13  ;;  %v7833_v13 = vcombine.low %v4054_v40, %v10522_v45  ;;  %v9442_v40 = vld [vmem:[%s12103_s13 + $0x88] sm:$0xff]   ;;  %v9444_v20 = vld [vmem:[%s12103_s13 + $0xd0] sm:$0xff]  }
 0x6cf   : > { %8649 = vmatprep.subr.bf16.mxu1 %v9414_v58  ;;  %9037 = vmatprep.subr.bf16.mxu0 %v9415_v2  ;;  %v7914_v58 = vcombine.low %v11243_v50, %v11086_v7  ;;  %v9446_v7 = vld [vmem:[%s12103_s13 + $0x90] sm:$0xff]  }
 0x6d0   : > { %4868 = vmatmul.mubr.bf16.gmra.mrb[92].mxu1 %v7831_v22  ;;  %v9445_v22 = vld [vmem:[%s12103_s13 + $0x118] sm:$0xff]  }
 0x6d1   : > { %8650 = vmatpush3.bf16.msra.mxu1 %v9416_v9  ;;  %5676 = vmatprep.mubr.bf16.mxu1 %v7912_v52  ;;  %v4965_v9 = vshrl.u32 %v7909_v5, 16 }
 0x6d2   : > { %9038 = vmatpush3.bf16.msra.mxu0 %v9415_v2  ;;  %8651 = vmatprep.subr.bf16.mxu1 %v9417_v55  ;;  %v9443_v2 = vld [vmem:[%s12103_s13 + $0x158] sm:$0xff]  }
 0x6d3   : > { %9039 = vmatprep.subr.bf16.mxu0 %v9418_v42  ;;  %v9448_v55 = vld [vmem:[%s12103_s13 + $0xd8] sm:$0xff]   ;;  %v4967_v52 = vrot.slane %v4965_v9, 7  ;;  %v9475_v9 = vld [vmem:[%s12103_s13 + $0x220] sm:$0xff]  }
 0x6d5   : > { %4819 = vmatmul.mubr.bf16.gmra.mrb[108].mxu0 %v7829_v26  ;;  %8652 = vmatpush3.bf16.msra.mxu1 %v9419_v38  ;;  %v4968_v38 = vshll.u32 %v7909_v5, 16  ;;  %v9450_v26 = vld [vmem:[%s12103_s13 + $0x98] sm:$0xff]  }
 0x6d6   : > { %9040 = vmatpush3.bf16.msra.mxu0 %v9418_v42  ;;  %9051 = vmatprep.mubr.bf16.mxu0 %v11154_v60  ;;  %v9426_v60 = vld [vmem:[%s12103_s13 + $0x70] sm:$0xff]   ;;  %v9449_v42 = vld [vmem:[%s12103_s13 + $0x120] sm:$0xff]  }
 0x6d7   : > { %8653 = vmatprep.subr.bf16.mxu1 %v9420_v48  ;;  %9041 = vmatprep.subr.bf16.mxu0 %v9421_v41  ;;  %v9451_v48 = vld [vmem:[%s12103_s13 + $0x168] sm:$0xff]  }
 0x6d9   : > { %8654 = vmatpush3.bf16.msra.mxu1 %v9422_v61  ;;  %v4970_v61 = vor.u32 %v4968_v38, %v4967_v52  ;;  %v9482_v52 = vld [vmem:[%s12103_s13 + $0x1e8] sm:$0xff]   ;;  %v9484_v38 = vld [vmem:[%s12103_s13 + $0x238] sm:$0xff]  }
 0x6da   : > { %9042 = vmatpush3.bf16.msra.mxu0 %v9421_v41  ;;  %8655 = vmatprep.subr.bf16.mxu1 %v9423_v63  ;;  %v9452_v41 = vld [vmem:[%s12103_s13 + $0xe0] sm:$0xff]   ;;  %v9453_v63 = vld [vmem:[%s12103_s13 + $0x128] sm:$0xff]  }
 0x6db   : > { %9043 = vmatprep.subr.bf16.mxu0 %v9424_v27 }
 0x6dd   : > { %8656 = vmatpush3.bf16.msra.mxu1 %v9425_v56  ;;  %v9455_v56 = vld [vmem:[%s12103_s13 + $0x170] sm:$0xff]  }
 0x6de   : > { %9044 = vmatpush3.bf16.msra.mxu0 %v9424_v27  ;;  %8657 = vmatprep.subr.bf16.mxu1 %v9426_v60  ;;  %v9454_v27 = vld [vmem:[%s12103_s13 + $0xa0] sm:$0xff]   ;;  %v9456_v60 = vld [vmem:[%s12103_s13 + $0xe8] sm:$0xff]  }
 0x6df   : > { %9045 = vmatprep.subr.bf16.mxu0 %v9427_v49 }
 0x6e1   : > { %8658 = vmatpush3.bf16.msra.mxu1 %v9428_v23  ;;  %v9457_v23 = vld [vmem:[%s12103_s13 + $0x130] sm:$0xff]  }
 0x6e2   : > { %9046 = vmatpush3.bf16.msra.mxu0 %v9427_v49  ;;  %8659 = vmatprep.subr.bf16.mxu1 %v9429_v30  ;;  %v4978_v49 = vsel %vm9908_vm2, 0, %v4970_v61  ;;  %v9458_v30 = vld [vmem:[%s12103_s13 + $0xa8] sm:$0xff]  }
 0x6e3   : > { %9047 = vmatprep.subr.bf16.mxu0 %v9430_v39 }
 0x6e5   : > { %8660 = vmatpush3.bf16.msra.mxu1 %v9431_v62  ;;  %v9460_v62 = vld [vmem:[%s12103_s13 + $0xf0] sm:$0xff]  }
 0x6e6   : > { %9048 = vmatpush3.bf16.msra.mxu0 %v9430_v39  ;;  %8701 = vmatprep.subr.bf16.mxu1 %v9432_v0  ;;  %v9459_v39 = vld [vmem:[%s12103_s13 + $0x178] sm:$0xff]   ;;  %v11453_v0 = vsel %vm10302_vm7, %v4978_v49, 0 }
 0x6e7   : > { %9049 = vmatprep.subr.bf16.mxu0 %v9433_v21 }
 0x6e8   : > { %5677 = vmatmul.mubr.bf16.vlgmr.msra.gmra.mrb[96].mxu1 %v7911_v19  ;;  %v9463_v19 = vld [vmem:[%s12103_s13 + $0x200] sm:$0xff]  }
 0x6e9   : > { %5684 = vmatprep.mubr.bf16.mxu1 %v11205_v35  ;;  %8702 = vmatpush3.bf16.msra.mxu1 %v9434_v1  ;;  %v9462_v1 = vld [vmem:[%s12103_s13 + $0xb0] sm:$0xff]  }
 0x6ea   : > { %9050 = vmatpush3.bf16.msra.mxu0 %v9433_v21  ;;  %8703 = vmatprep.subr.bf16.mxu1 %v9435_v24  ;;  %v9461_v21 = vld [vmem:[%s12103_s13 + $0x138] sm:$0xff]   ;;  %v5013_v24 = vshll.u32 %v11453_v0, 16 }
 0x6eb   : > { %8673 = vmatprep.subr.bf16.mxu0 %v9436_v10  ;;  %v9464_v10 = vld [vmem:[%s12103_s13 + $0xf8] sm:$0xff]  }
 0x6ed   : > { %9052 = vmatmul.mubr.bf16.vlgmr.msra.gmra.mrb[112].mxu0 %v7833_v13  ;;  %8704 = vmatpush3.bf16.msra.mxu1 %v9437_v37  ;;  %v5018_v37 = vrot.slane %v11453_v0, 1  ;;  %v9465_v13 = vld [vmem:[%s12103_s13 + $0xb8] sm:$0xff]  }
 0x6ee   : > { %8674 = vmatpush3.bf16.msra.mxu0 %v9438_v3  ;;  %5725 = vmatprep.mubr.bf16.mxu0 %v7914_v58  ;;  %v7915_v3 = vcombine.low %v11286_v6, %v11173_v28  ;;  %v9467_v28 = vld [vmem:[%s12103_s13 + $0x1c0] sm:$0xff]   ;;  %v5011_v6 = vshrl.u32 %v11453_v0, 16 }
 0x6ef   : > { %8705 = vmatprep.subr.bf16.mxu1 %v9439_v17  ;;  %8675 = vmatprep.subr.bf16.mxu0 %v9440_v59  ;;  %v9466_v17 = vld [vmem:[%s12103_s13 + $0x208] sm:$0xff]   ;;  %v5015_v59 = vrot.slane %v5013_v24, 1  ;;  %v7922_v5 = vcombine.low %v5009_v14, %v5018_v37  ;;  %v9468_v58 = vld [vmem:[%s12103_s13 + $0x180] sm:$0xff]   ;;  %v7913_v14 = vcombine.low %v10522_v45, %v5007_v29  ;;  %v7925_v61 = vcombine.low %v5018_v37, %v10522_v45 }
 0x6f0   : > { %5685 = vmatmul.mubr.bf16.gmra.mrb[100].mxu1 %v11177_v57  ;;  %v9471_v29 = vld [vmem:[%s12103_s13 + $0x188] sm:$0xff]  }
 0x6f1   : > { %8706 = vmatpush3.bf16.msra.mxu1 %v9441_v46  ;;  %5774 = vmatprep.mubr.bf16.mxu1 %v7916_v32  ;;  %v11488_v46 = vor.u32 %v5015_v59, %v5011_v6  ;;  %v7920_v32 = vcombine.low %v11104_v11, %v11453_v0  ;;  %v9473_v11 = vld [vmem:[%s12103_s13 + $0x1d0] sm:$0xff]  }
 0x6f2   : > { %8676 = vmatpush3.bf16.msra.mxu0 %v9442_v40  ;;  %8707 = vmatprep.subr.bf16.mxu1 %v9443_v2  ;;  %v9469_v40 = vld [vmem:[%s12103_s13 + $0x210] sm:$0xff]   ;;  %v9470_v2 = vld [vmem:[%s12103_s13 + $0x1c8] sm:$0xff]  }
 0x6f3   : > { %8677 = vmatprep.subr.bf16.mxu0 %v9444_v20  ;;  %v7921_v50 = vcombine.low %v11188_v51, %v11488_v46  ;;  %v9472_v20 = vld [vmem:[%s12103_s13 + $0x218] sm:$0xff]   ;;  %v9474_v51 = vld [vmem:[%s12103_s13 + $0x190] sm:$0xff]  }
 0x6f5   : > { %8708 = vmatpush3.bf16.msra.mxu1 %v9445_v22  ;;  %v9476_v22 = vld [vmem:[%s12103_s13 + $0x1d8] sm:$0xff]  }
 0x6f6   : > { %8678 = vmatpush3.bf16.msra.mxu0 %v9446_v7  ;;  %8709 = vmatprep.subr.bf16.mxu1 %v9447_v8  ;;  %v9477_v7 = vld [vmem:[%s12103_s13 + $0x198] sm:$0xff]   ;;  %v9478_v8 = vld [vmem:[%s12103_s13 + $0x228] sm:$0xff]  }
 0x6f7   : > { %8679 = vmatprep.subr.bf16.mxu0 %v9448_v55  ;;  %v9479_v55 = vld [vmem:[%s12103_s13 + $0x1e0] sm:$0xff]  }
 0x6f9   : > { %8710 = vmatpush3.bf16.msra.mxu1 %v9449_v42  ;;  %v9483_v42 = vld [vmem:[%s12103_s13 + $0x1a8] sm:$0xff]  }
 0x6fa   : > { %8680 = vmatpush3.bf16.msra.mxu0 %v9450_v26  ;;  %8711 = vmatprep.subr.bf16.mxu1 %v9451_v48  ;;  %v9485_v26 = vld [vmem:[%s12103_s13 + $0x1f0] sm:$0xff]  }
 0x6fb   : > { %8681 = vmatprep.subr.bf16.mxu0 %v9452_v41  ;;  %v9486_v48 = vld [vmem:[%s12103_s13 + $0x1b0] sm:$0xff]   ;;  %v9487_v41 = vld [vmem:[%s12103_s13 + $0x1f8] sm:$0xff]  }
 0x6fd   : > { %8712 = vmatpush3.bf16.msra.mxu1 %v9453_v63  ;;  %v9488_v63 = vld [vmem:[%s12103_s13 + $0x1b8] sm:$0xff]  }
 0x6fe   : > { %8682 = vmatpush3.bf16.msra.mxu0 %v9454_v27  ;;  %8713 = vmatprep.subr.bf16.mxu1 %v9455_v56  ;;  %v7924_v27 = vcombine.low %v11488_v46, %v10331_v15  ;;  %v7923_v56 = vcombine.low %v11453_v0, %v10312_v25  ;;  %v9491_v0 = vld [vmem:[%s12105_s15 + $0xc8] sm:$0xff]  }
 0x6ff   : > { %8683 = vmatprep.subr.bf16.mxu0 %v9456_v60 }
 0x701   : > { %8714 = vmatpush3.bf16.msra.mxu1 %v9457_v23  ;;  %v9489_v23 = vld [vmem:[%s12105_s15 + $0xc0] sm:$0xff]  }
 0x702   : > { %8684 = vmatpush3.bf16.msra.mxu0 %v9458_v30  ;;  %8715 = vmatprep.subr.bf16.mxu1 %v9459_v39 }
 0x703   : > { %8685 = vmatprep.subr.bf16.mxu0 %v9460_v62  ;;  %v9490_v62 = vld [vmem:[%s12105_s15 + $0x80] sm:$0xff]  }
 0x705   : > { %8716 = vmatpush3.bf16.msra.mxu1 %v9461_v21 }
 0x706   : > { %8686 = vmatpush3.bf16.msra.mxu0 %v9462_v1  ;;  %9055 = vmatprep.subr.bf16.mxu1 %v9463_v19 }
 0x707   : > { %8687 = vmatprep.subr.bf16.mxu0 %v9464_v10 }
 0x708   : > { %5775 = vmatmul.mubr.bf16.vlgmr.msra.gmra.mrb[104].mxu1 %v7915_v3 }
 0x709   : > { %5782 = vmatprep.mubr.bf16.mxu1 %v7922_v5  ;;  %9056 = vmatpush3.bf16.msra.mxu1 %v9463_v19  ;;  %v7818_v19 = vld [vmem:[%s12102_s12] ss:$0 sm:$0xff] }
 0x70a   : > { %8688 = vmatpush3.bf16.msra.mxu0 %v9465_v13  ;;  %9057 = vmatprep.subr.bf16.mxu1 %v9466_v17 }
 0x70b   : > { %8729 = vmatprep.subr.bf16.mxu0 %v9467_v28 }
 0x70d   : > { %5726 = vmatmul.mubr.bf16.vlgmr.msra.gmra.mrb[116].mxu0 %v7913_v14  ;;  %9058 = vmatpush3.bf16.msra.mxu1 %v9466_v17 }
 0x70e   : > { %5733 = vmatprep.mubr.bf16.mxu0 %v7920_v32  ;;  %8730 = vmatpush3.bf16.msra.mxu0 %v9468_v58  ;;  %v9494_v32 = vld [vmem:[%s12105_s15] sm:$0xff]  }
 0x70f   : > { %9059 = vmatprep.subr.bf16.mxu1 %v9469_v40  ;;  %8731 = vmatprep.subr.bf16.mxu0 %v9470_v2  ;;  %v9493_v2 = vld [vmem:[%s12105_s15 + $0x88] sm:$0xff]  }
 0x710   : > { %5783 = vmatmul.mubr.bf16.gmra.mrb[108].mxu1 %v7921_v50 }
 0x711   : > { %9060 = vmatpush3.bf16.msra.mxu1 %v9469_v40  ;;  %9071 = vmatprep.mubr.bf16.mxu1 %v11212_v31  ;;  %v9492_v40 = vld [vmem:[%s12105_s15 + $0x40] sm:$0xff]  }
 0x712   : > { %8732 = vmatpush3.bf16.msra.mxu0 %v9471_v29  ;;  %9061 = vmatprep.subr.bf16.mxu1 %v9472_v20 }
 0x713   : > { %8733 = vmatprep.subr.bf16.mxu0 %v9473_v11 }
 0x715   : > { %5734 = vmatmul.mubr.bf16.gmra.mrb[120].mxu0 %v11212_v31  ;;  %9062 = vmatpush3.bf16.msra.mxu1 %v9472_v20  ;;  %v9481_v31 = vld [vmem:[%s12103_s13 + $0x230] sm:$0xff]  }
 0x716   : > { %8734 = vmatpush3.bf16.msra.mxu0 %v9474_v51  ;;  %5823 = vmatprep.mubr.bf16.mxu0 %v11205_v35  ;;  %v9480_v35 = vld [vmem:[%s12103_s13 + $0x1a0] sm:$0xff]  }
 0x717   : > { %9063 = vmatprep.subr.bf16.mxu1 %v9475_v9  ;;  %8735 = vmatprep.subr.bf16.mxu0 %v9476_v22 }
 0x719   : > { %9064 = vmatpush3.bf16.msra.mxu1 %v9475_v9 }
 0x71a   : > { %8736 = vmatpush3.bf16.msra.mxu0 %v9477_v7  ;;  %9065 = vmatprep.subr.bf16.mxu1 %v9478_v8 }
 0x71b   : > { %8737 = vmatprep.subr.bf16.mxu0 %v9479_v55 }
 0x71d   : > { %9066 = vmatpush3.bf16.msra.mxu1 %v9478_v8 }
 0x71e   : > { %8738 = vmatpush3.bf16.msra.mxu0 %v9480_v35  ;;  %9067 = vmatprep.subr.bf16.mxu1 %v9481_v31 }
 0x71f   : > { %8739 = vmatprep.subr.bf16.mxu0 %v9482_v52  ;;  %v9495_v52 = vld [vmem:[%s12105_s15 + $0xd0] sm:$0xff]  }
 0x721   : > { %9068 = vmatpush3.bf16.msra.mxu1 %v9481_v31 }
 0x722   : > { %8740 = vmatpush3.bf16.msra.mxu0 %v9483_v42  ;;  %9069 = vmatprep.subr.bf16.mxu1 %v9484_v38  ;;  %v9496_v42 = vld [vmem:[%s12105_s15 + $0x48] sm:$0xff]  }
 0x723   : > { %8741 = vmatprep.subr.bf16.mxu0 %v9485_v26  ;;  %v9498_v26 = vld [vmem:[%s12105_s15 + $0x8] sm:$0xff]  }
 0x725   : > { %9070 = vmatpush3.bf16.msra.mxu1 %v9484_v38  ;;  %v9497_v38 = vld [vmem:[%s12105_s15 + $0x90] sm:$0xff]  }
 0x726   : > { %8742 = vmatpush3.bf16.msra.mxu0 %v9486_v48  ;;  %8795 = vmatprep.subr.bf16.mxu1 %v9489_v23  ;;  %v9499_v48 = vld [vmem:[%s12105_s15 + $0xd8] sm:$0xff]  }
 0x727   : > { %8743 = vmatprep.subr.bf16.mxu0 %v9487_v41  ;;  %v9500_v41 = vld [vmem:[%s12105_s15 + $0x50] sm:$0xff]  }
 0x728   : > { %9072 = vmatmul.mubr.bf16.vlgmr.msra.gmra.mrb[112].mxu1 %v7925_v61  ;;  %v9501_v61 = vld [vmem:[%s12105_s15 + $0x98] sm:$0xff]  }
 0x729   : > { %8796 = vmatpush3.bf16.msra.mxu1 %v9490_v62  ;;  %v9508_v62 = vld [vmem:[%s12105_s15 + $0x60] sm:$0xff]  }
 0x72a   : > { %8744 = vmatpush3.bf16.msra.mxu0 %v9488_v63  ;;  %8797 = vmatprep.subr.bf16.mxu1 %v9491_v0  ;;  %v9502_v63 = vld [vmem:[%s12105_s15 + $0x10] sm:$0xff]   ;;  %v9509_v0 = vld [vmem:[%s12105_s15 + $0xa8] sm:$0xff]  }
 0x72b   : > { %8767 = vmatprep.subr.bf16.mxu0 %v9492_v40  ;;  %v9515_v40 = vld [vmem:[%s12105_s15 + $0xf8] sm:$0xff]  }
 0x72d   : > { %5824 = vmatmul.mubr.bf16.vlgmr.msra.gmra.mrb[124].mxu0 %v11177_v57  ;;  %8798 = vmatpush3.bf16.msra.mxu1 %v9493_v2  ;;  %v9516_v2 = vld [vmem:[%s12105_s15 + $0x70] sm:$0xff]  }
 0x72e   : > { %5831 = vmatprep.mubr.bf16.mxu0 %v7924_v27  ;;  %8768 = vmatpush3.bf16.msra.mxu0 %v9494_v32 }
 0x72f   : > { %8799 = vmatprep.subr.bf16.mxu1 %v9495_v52  ;;  %8769 = vmatprep.subr.bf16.mxu0 %v9496_v42 }
 0x731   : > { %8800 = vmatpush3.bf16.msra.mxu1 %v9497_v38 }
 0x732   : > { %8770 = vmatpush3.bf16.msra.mxu0 %v9498_v26  ;;  %8801 = vmatprep.subr.bf16.mxu1 %v9499_v48 }
 0x733   : > { %8771 = vmatprep.subr.bf16.mxu0 %v9500_v41  ;;  %v9522_v41 = vld [vmem:[%s12105_s15 + $0x38] sm:$0xff]  }
 0x735   : > { %5832 = vmatmul.mubr.bf16.gmra.mrb[128].mxu0 %v7923_v56  ;;  %8802 = vmatpush3.bf16.msra.mxu1 %v9501_v61  ;;  %v9503_v56 = vld [vmem:[%s12105_s15 + $0xe0] sm:$0xff]  }
 0x736   : > { %8772 = vmatpush3.bf16.msra.mxu0 %v9502_v63  ;;  %8803 = vmatprep.subr.bf16.mxu1 %v9503_v56  ;;  %v9524_v63 = vld [vmem:[%s12105_s15 + $0x140] sm:$0xff]  }
 0x77b   : > { %v8567_v60 = vpop.f32.mrb[80].mxu1 }
 0x77c   : > { %v8568_v49 = vpop.f32.mrb[81].mxu1 }
 0x77d   : > { %v8569_v30 = vadd.f32 %v8568_v49, %v8567_v60  ;;  %v8570_v39 = vpop.f32.mrb[82].mxu1  ;;  %v9504_v60 = vld [vmem:[%s12105_s15 + $0x58] sm:$0xff]   ;;  %v9505_v49 = vld [vmem:[%s12105_s15 + $0xa0] sm:$0xff]  }
 0x77e   : > { %v8571_v21 = vpop.f32.mrb[83].mxu1  ;;  %8773 = vmatprep.subr.bf16.mxu0 %v9504_v60  ;;  %8804 = vmatpush3.bf16.msra.mxu1 %v9505_v49 }
 0x77f   : > { %v8572_v57 = vadd.f32 %v8571_v21, %v8570_v39  ;;  %v9507_v39 = vld [vmem:[%s12105_s15 + $0xe8] sm:$0xff]  }
 0x780   : > { %v8539_v1 = vpop.f32.mrb[96].mxu0  ;;  %8805 = vmatprep.subr.bf16.mxu1 %v9507_v39 }
 0x781   : > { %v8540_v24 = vpop.f32.mrb[97].mxu0 }
 0x782   : > { %v8541_v10 = vadd.f32 %v8540_v24, %v8539_v1  ;;  %v8542_v37 = vpop.f32.mrb[98].mxu0  ;;  %8806 = vmatpush3.bf16.msra.mxu1 %v9509_v0 }
 0x783   : > { %v8543_v3 = vpop.f32.mrb[99].mxu0 }
 0x784   : > { %v4715_v13 = vadd.f32 %v8541_v10, %v7818_v19  ;;  %v8544_v17 = vadd.f32 %v8543_v3, %v8542_v37  ;;  %v9511_v10 = vld [vmem:[%s12105_s15 + $0xf0] sm:$0xff]   ;;  %v9512_v37 = vld [vmem:[%s12105_s15 + $0x68] sm:$0xff]  }
 0x785   : > { %8807 = vmatprep.subr.bf16.mxu1 %v9511_v10 }
 0x786   : > { %v4718_v59 = vadd.f32 %v8544_v17, %v7818_v19  ;;  %v8573_v5 = vpop.f32.mrb[84].mxu1  ;;  %v11580_v28 = vadd.f32 %v8569_v30, %v4715_v13  ;;  %v9506_v30 = vld [vmem:[%s12105_s15 + $0x18] sm:$0xff]  }
 0x787   : > { %v8574_v6 = vpop.f32.mrb[85].mxu1  ;;  %8774 = vmatpush3.bf16.msra.mxu0 %v9506_v30 }
 0x788   : > { %v8575_v58 = vadd.f32 %v8574_v6, %v8573_v5  ;;  %v8576_v46 = vpop.f32.mrb[86].mxu1  ;;  %v11582_v14 = vadd.f32 %v8572_v57, %v4718_v59  ;;  %8775 = vmatprep.subr.bf16.mxu0 %v9508_v62  ;;  %v9513_v5 = vld [vmem:[%s12105_s15 + $0xb0] sm:$0xff]   ;;  %v9514_v6 = vld [vmem:[%s12105_s15 + $0x28] sm:$0xff]  }
 0x789   : > { %v8577_v50 = vpop.f32.mrb[87].mxu1  ;;  %8808 = vmatpush3.bf16.msra.mxu1 %v9513_v5 }
 0x78a   : > { %v8578_v29 = vadd.f32 %v8577_v50, %v8576_v46  ;;  %v8545_v20 = vpop.f32.mrb[100].mxu0  ;;  %8809 = vmatprep.subr.bf16.mxu1 %v9515_v40 }
 0x78b   : > { %v8546_v11 = vpop.f32.mrb[101].mxu0 }
 0x78c   : > { %v8547_v51 = vadd.f32 %v8546_v11, %v8545_v20  ;;  %v8548_v9 = vpop.f32.mrb[102].mxu0 }
 0x78d   : > { %v8549_v22 = vpop.f32.mrb[103].mxu0 }
 0x78e   : > { %v4723_v7 = vadd.f32 %v8547_v51, %v7818_v19  ;;  %v8550_v8 = vadd.f32 %v8549_v22, %v8548_v9 }
 0x790   : > { %v4726_v55 = vadd.f32 %v8550_v8, %v7818_v19  ;;  %v11593_v35 = vadd.f32 %v8575_v58, %v4723_v7  ;;  %v9510_v19 = vld [vmem:[%s12105_s15 + $0x20] sm:$0xff]   ;;  %v9517_v7 = vld [vmem:[%s12105_s15 + $0xb8] sm:$0xff]   ;;  %v9518_v8 = vld [vmem:[%s12105_s15 + $0x30] sm:$0xff]  }
 0x791   : > { %8776 = vmatpush3.bf16.msra.mxu0 %v9510_v19  ;;  %8810 = vmatpush3.bf16.msra.mxu1 %v9517_v7  ;;  %v7910_v7 = vld [vmem:[%s12104_s14] ss:$0 sm:$0xff] }
 0x792   : > { %v11595_v31 = vadd.f32 %v8578_v29, %v4726_v55  ;;  %8777 = vmatprep.subr.bf16.mxu0 %v9512_v37 }
 0x795   : > { %8778 = vmatpush3.bf16.msra.mxu0 %v9514_v6 }
 0x796   : > { %8779 = vmatprep.subr.bf16.mxu0 %v9516_v2 }
 0x799   : > { %8780 = vmatpush3.bf16.msra.mxu0 %v9518_v8 }
 0x79b   : > { %v8623_v27 = vpop.f32.mrb[88].mxu1 }
 0x79c   : > { %v8624_v23 = vpop.f32.mrb[89].mxu1 }
 0x79d   : > { %v8625_v21 = vadd.f32 %v8624_v23, %v8623_v27  ;;  %v8626_v57 = vpop.f32.mrb[90].mxu1 }
 0x79e   : > { %v8627_v1 = vpop.f32.mrb[91].mxu1 }
 0x79f   : > { %v8628_v24 = vadd.f32 %v8627_v1, %v8626_v57 }
 0x7a0   : > { %v8595_v3 = vpop.f32.mrb[104].mxu0 }
 0x7a1   : > { %v8596_v13 = vpop.f32.mrb[105].mxu0 }
 0x7a2   : > { %v8597_v17 = vadd.f32 %v8596_v13, %v8595_v3  ;;  %v8598_v59 = vpop.f32.mrb[106].mxu0 }
 0x7a3   : > { %v8599_v58 = vpop.f32.mrb[107].mxu0  ;;  %v8629_v46 = vpop.f32.mrb[92].mxu1 }
 0x7a4   : > { %v4813_v32 = vadd.f32 %v8597_v17, %v11580_v28  ;;  %v8600_v50 = vadd.f32 %v8599_v58, %v8598_v59  ;;  %v8630_v29 = vpop.f32.mrb[93].mxu1  ;;  %v9519_v28 = vld [vmem:[%s12105_s15 + $0x1c0] sm:$0xff]  }
 0x7a5   : > { %v8631_v20 = vadd.f32 %v8630_v29, %v8629_v46  ;;  %v8632_v11 = vpop.f32.mrb[94].mxu1  ;;  %8851 = vmatprep.subr.bf16.mxu1 %v9519_v28 }
 0x7a6   : > { %v4816_v51 = vadd.f32 %v8600_v50, %v11582_v14  ;;  %v8633_v9 = vpop.f32.mrb[95].mxu1  ;;  %v4862_v22 = vadd.f32 %v8625_v21, %v4813_v32  ;;  %v9520_v14 = vld [vmem:[%s12105_s15 + $0x78] sm:$0xff]  }
 0x7a7   : > { %v8634_v55 = vadd.f32 %v8633_v9, %v8632_v11  ;;  %8781 = vmatprep.subr.bf16.mxu0 %v9520_v14 }
 0x7a8   : > { %v8601_v52 = vpop.f32.mrb[108].mxu0  ;;  %v4865_v42 = vadd.f32 %v8628_v24, %v4816_v51  ;;  %8782 = vmatpush3.bf16.msra.mxu0 %v9522_v41 }
 0x7a9   : > { %v8602_v38 = vpop.f32.mrb[109].mxu0  ;;  %8823 = vmatprep.subr.bf16.mxu0 %v9524_v63 }
 0x7aa   : > { %v8603_v26 = vadd.f32 %v8602_v38, %v8601_v52  ;;  %v8604_v48 = vpop.f32.mrb[110].mxu0 }
 0x7ab   : > { %v8605_v61 = vpop.f32.mrb[111].mxu0 }
 0x7ac   : > { %v4821_v27 = vadd.f32 %v8603_v26, %v11593_v35  ;;  %v8606_v56 = vadd.f32 %v8605_v61, %v8604_v48 }
 0x7ae   : > { %v4824_v60 = vadd.f32 %v8606_v56, %v11595_v31  ;;  %v4870_v49 = vadd.f32 %v8631_v20, %v4821_v27 }
 0x7b0   : > { %v4873_v23 = vadd.f32 %v8634_v55, %v4824_v60 }
 0x7bb   : > { %v8661_v30 = vpop.f32.mrb[96].mxu1 }
 0x7bc   : > { %v8662_v39 = vpop.f32.mrb[97].mxu1 }
 0x7bd   : > { %v8663_v62 = vadd.f32 %v8662_v39, %v8661_v30  ;;  %v8664_v21 = vpop.f32.mrb[98].mxu1 }
 0x7be   : > { %v8665_v57 = vpop.f32.mrb[99].mxu1 }
 0x7bf   : > { %v8666_v1 = vadd.f32 %v8665_v57, %v8664_v21  ;;  %v5679_v14 = vadd.f32 %v8663_v62, %v7910_v7 }
 0x7c0   : > { %v9053_v0 = vpop.f32.mrb[112].mxu0 }
 0x7c1   : > { %v4919_v19 = vadd.f32 %v9053_v0, %v4870_v49  ;;  %v4910_v24 = vpop.f32.mrb[113].mxu0  ;;  %v5682_v48 = vadd.f32 %v8666_v1, %v7910_v7 }
 0x7c2   : > { %v4911_v10 = vadd.f32 %v4910_v24, %v4862_v22  ;;  %v9054_v37 = vpop.f32.mrb[114].mxu0 }
 0x7c3   : > { %v4922_v3 = vadd.f32 %v9054_v37, %v4873_v23  ;;  %v4913_v35 = vpop.f32.mrb[115].mxu0  ;;  %v8667_v13 = vpop.f32.mrb[100].mxu1  ;;  %v4927_v59 = vmax.f32 %v4919_v19, 0.0 }
 0x7c4   : > { %v4914_v17 = vadd.f32 %v4913_v35, %v4865_v42  ;;  %v8668_v31 = vpop.f32.mrb[101].mxu1  ;;  %v4925_v46 = vmax.f32 %v4911_v10, 0.0 }
 0x7c5   : > { %v4928_v5 = vmax.f32 %v4922_v3, 0.0  ;;  %v8669_v6 = vadd.f32 %v8668_v31, %v8667_v13  ;;  %v8670_v58 = vpop.f32.mrb[102].mxu1 }
 0x7c6   : > { %v4926_v40 = vmax.f32 %v4914_v17, 0.0  ;;  %v8671_v2 = vpop.f32.mrb[103].mxu1 }
 0x7c7   : > { %v11685_v32 = vpack.c.bf16 %v4928_v5, %v4927_v59  ;;  %v8672_v50 = vadd.f32 %v8671_v2, %v8670_v58  ;;  %v5687_v0 = vadd.f32 %v8669_v6, %v7910_v7 }
 0x7c8   : > { %v11687_v29 = vpack.c.bf16 %v4926_v40, %v4925_v46 }
 0x7c9   : > { %v5690_v10 = vadd.f32 %v8672_v50, %v7910_v7 }
 0x7db   : > { %v8717_v20 = vpop.f32.mrb[104].mxu1 }
 0x7dc   : > { %v8718_v11 = vpop.f32.mrb[105].mxu1 }
 0x7dd   : > { %v8719_v51 = vadd.f32 %v8718_v11, %v8717_v20  ;;  %v8720_v9 = vpop.f32.mrb[106].mxu1 }
 0x7de   : > { %v8721_v22 = vpop.f32.mrb[107].mxu1 }
 0x7df   : > { %v8722_v8 = vadd.f32 %v8721_v22, %v8720_v9 }
 0x7e0   : > { %v8689_v55 = vpop.f32.mrb[116].mxu0 }
 0x7e1   : > { %v8690_v28 = vpop.f32.mrb[117].mxu0 }
 0x7e2   : > { %v8691_v52 = vadd.f32 %v8690_v28, %v8689_v55  ;;  %v8692_v42 = vpop.f32.mrb[118].mxu0 }
 0x7e3   : > { %v8693_v38 = vpop.f32.mrb[119].mxu0  ;;  %v8723_v26 = vpop.f32.mrb[108].mxu1 }
 0x7e4   : > { %v5728_v41 = vadd.f32 %v8691_v52, %v5679_v14  ;;  %v8694_v61 = vadd.f32 %v8693_v38, %v8692_v42  ;;  %v8724_v63 = vpop.f32.mrb[109].mxu1 }
 0x7e5   : > { %v8725_v27 = vadd.f32 %v8724_v63, %v8723_v26  ;;  %v8726_v56 = vpop.f32.mrb[110].mxu1 }
 0x7e6   : > { %v5731_v60 = vadd.f32 %v8694_v61, %v5682_v48  ;;  %v8727_v49 = vpop.f32.mrb[111].mxu1  ;;  %v5777_v23 = vadd.f32 %v8719_v51, %v5728_v41 }
 0x7e7   : > { %v8728_v30 = vadd.f32 %v8727_v49, %v8726_v56 }
 0x7e8   : > { %v8695_v39 = vpop.f32.mrb[120].mxu0  ;;  %v5780_v21 = vadd.f32 %v8722_v8, %v5731_v60 }
 0x7e9   : > { %v8696_v57 = vpop.f32.mrb[121].mxu0 }
 0x7ea   : > { %v8697_v19 = vadd.f32 %v8696_v57, %v8695_v39  ;;  %v8698_v62 = vpop.f32.mrb[122].mxu0 }
 0x7eb   : > { %v8699_v24 = vpop.f32.mrb[123].mxu0 }
 0x7ec   : > { %v5736_v37 = vadd.f32 %v8697_v19, %v5687_v0  ;;  %v8700_v3 = vadd.f32 %v8699_v24, %v8698_v62 }
 0x7ee   : > { %v5739_v1 = vadd.f32 %v8700_v3, %v5690_v10  ;;  %v5785_v35 = vadd.f32 %v8725_v27, %v5736_v37 }
 0x7f0   : > { %v5788_v13 = vadd.f32 %v8728_v30, %v5739_v1 }
 0x7fb   : > { %v9073_v17 = vpop.f32.mrb[112].mxu1 }
 0x7fc   : > { %v5874_v31 = vpop.f32.mrb[113].mxu1 }
 0x7fd   : > { %v9074_v59 = vpop.f32.mrb[114].mxu1 }
 0x7fe   : > { %v5877_v5 = vpop.f32.mrb[115].mxu1 }
 0x800   : > { %v8745_v58 = vpop.f32.mrb[124].mxu0 }
 0x801   : > { %v8746_v46 = vpop.f32.mrb[125].mxu0 }
 0x802   : > { %v8747_v40 = vadd.f32 %v8746_v46, %v8745_v58  ;;  %v8748_v2 = vpop.f32.mrb[126].mxu0 }
 0x803   : > { %v8749_v20 = vpop.f32.mrb[127].mxu0 }
 0x804   : > { %v5826_v11 = vadd.f32 %v8747_v40, %v5777_v23  ;;  %v8750_v6 = vadd.f32 %v8749_v20, %v8748_v2 }
 0x806   : > { %v5875_v51 = vadd.f32 %v5874_v31, %v5826_v11  ;;  %v5829_v9 = vadd.f32 %v8750_v6, %v5780_v21  ;;  %v9521_v6 = vld [vmem:[%s12105_s15 + $0x180] sm:$0xff]  }
 0x808   : > { %v5878_v22 = vadd.f32 %v5877_v5, %v5829_v9  ;;  %v8751_v50 = vpop.f32.mrb[128].mxu0  ;;  %v5889_v8 = vmax.f32 %v5875_v51, 0.0  ;;  %v9523_v9 = vld [vmem:[%s12105_s15 + $0x1c8] sm:$0xff]  }
 0x809   : > { %v8752_v7 = vpop.f32.mrb[129].mxu0 }
 0x80a   : > { %v5890_v55 = vmax.f32 %v5878_v22, 0.0  ;;  %v8753_v28 = vadd.f32 %v8752_v7, %v8751_v50  ;;  %v8754_v14 = vpop.f32.mrb[130].mxu0 }
 0x80b   : > { %v8755_v52 = vpop.f32.mrb[131].mxu0 }
 0x80c   : > { %v5893_v42 = vpack.c.bf16 %v5890_v55, %v5889_v8  ;;  %v5834_v38 = vadd.f32 %v8753_v28, %v5785_v35  ;;  %v8756_v26 = vadd.f32 %v8755_v52, %v8754_v14  ;;  %v9525_v14 = vld [vmem:[%s12105_s15 + $0x188] sm:$0xff]  }
 0x80e   : > { %v5895_v48 = vsel %vm11026_vm3, %v5893_v42, 0  ;;  %v5883_v41 = vadd.f32 %v9073_v17, %v5834_v38  ;;  %v5837_v61 = vadd.f32 %v8756_v26, %v5788_v13 }
 0x80f   : > { %v7998_v63 = vcombine.low %v5895_v48, %v5895_v48  ;;  %v7999_v27 = vcombine.high %v5895_v48, %v5895_v48  ;;  %v9526_v48 = vld [vmem:[%s12105_s15 + $0x100] sm:$0xff]  }
 0x810   : > { %v5886_v56 = vadd.f32 %v9074_v59, %v5837_v61  ;;  %v5891_v23 = vmax.f32 %v5883_v41, 0.0 }
 0x811   : > { %v5908_v60 = vshrl.u32 %v7998_v63, 16  ;;  %v5915_v49 = vshrl.u32 %v7999_v27, 16  ;;  %v5911_v21 = vshll.u32 %v7998_v63, 16  ;;  %v5918_v0 = vshll.u32 %v7999_v27, 16  ;;  %v9527_v27 = vld [vmem:[%s12105_s15 + $0x1d0] sm:$0xff]  }
 0x812   : > { %v5892_v30 = vmax.f32 %v5886_v56, 0.0 }
 0x813   : > { %v5910_v39 = vrot.slane %v5908_v60, 7  ;;  %v5917_v57 = vrot.slane %v5915_v49, 7  ;;  %v9528_v60 = vld [vmem:[%s12105_s15 + $0x148] sm:$0xff]  }
 0x814   : > { %v5894_v19 = vpack.c.bf16 %v5892_v30, %v5891_v23 }
 0x815   : > { %v5913_v62 = vor.u32 %v5911_v21, %v5910_v39  ;;  %v5920_v24 = vor.u32 %v5918_v0, %v5917_v57  ;;  %v9529_v39 = vld [vmem:[%s12105_s15 + $0x190] sm:$0xff]  }
 0x816   : > { %v5896_v10 = vsel %vm11032_vm4, %v5894_v19, 0  ;;  %v9530_v19 = vld [vmem:[%s12105_s15 + $0x108] sm:$0xff]  }
 0x817   : > { %v8000_v37 = vcombine.low %v5896_v10, %v5896_v10  ;;  %v8001_v3 = vcombine.high %v5896_v10, %v5896_v10  ;;  %v5939_v1 = vsel %vm9908_vm2, 0, %v5913_v62  ;;  %v5940_v35 = vsel %vm9908_vm2, 0, %v5920_v24  ;;  %v9531_v62 = vld [vmem:[%s12105_s15 + $0x1d8] sm:$0xff]  }
 0x818   : > { %v11702_v13 = vsel %vm10302_vm7, %v5939_v1, 0  ;;  %v11706_v17 = vsel %vm10302_vm7, %v5940_v35, 0  ;;  %v9533_v1 = vld [vmem:[%s12105_s15 + $0x198] sm:$0xff]   ;;  %v9534_v35 = vld [vmem:[%s12105_s15 + $0x110] sm:$0xff]  }
 0x819   : > { %v5922_v31 = vshrl.u32 %v8000_v37, 16  ;;  %v5929_v59 = vshrl.u32 %v8001_v3, 16  ;;  %v8006_v5 = vcombine.low %v11702_v13, %v11706_v17  ;;  %v5971_v58 = vrot.slane %v11702_v13, 1 }
 0x81a   : > { %v5950_v46 = vshll.u32 %v11702_v13, 16  ;;  %v5925_v2 = vshll.u32 %v8000_v37, 16  ;;  %v5932_v11 = vshll.u32 %v8001_v3, 16  ;;  %v5948_v22 = vshrl.u32 %v11702_v13, 16  ;;  %v9532_v37 = vld [vmem:[%s12105_s15 + $0x150] sm:$0xff]  }
 0x81b   : > { %v5924_v40 = vrot.slane %v5922_v31, 7  ;;  %v5931_v20 = vrot.slane %v5929_v59, 7  ;;  %6689 = vmatprep.mubr.bf16.mxu1 %v8006_v5  ;;  %v8005_v51 = vcombine.low %v10522_v45, %v5971_v58  ;;  %v5957_v55 = vshll.u32 %v11706_v17, 16  ;;  %v9536_v31 = vld [vmem:[%s12105_s15 + $0x158] sm:$0xff]   ;;  %v9537_v5 = vld [vmem:[%s12105_s15 + $0x1a0] sm:$0xff]  }
 0x81c   : > { %v5952_v50 = vrot.slane %v5950_v46, 1  ;;  %v8003_v52 = vcombine.low %v10312_v25, %v11702_v13  ;;  %v5972_v63 = vrot.slane %v11706_v17, 1  ;;  %v5955_v21 = vshrl.u32 %v11706_v17, 16  ;;  %v9538_v46 = vld [vmem:[%s12105_s15 + $0x118] sm:$0xff]   ;;  %v9540_v13 = vld [vmem:[%s12105_s15 + $0x160] sm:$0xff]  }
 0x81d   : > { %v5927_v7 = vor.u32 %v5925_v2, %v5924_v40  ;;  %v5934_v8 = vor.u32 %v5932_v11, %v5931_v20  ;;  %6690 = vmatmul.mubr.bf16.vlgmr.msra.gmra.mrb[116].mxu1 %v8005_v51  ;;  %v5959_v49 = vrot.slane %v5957_v55, 1  ;;  %v9539_v40 = vld [vmem:[%s12105_s15 + $0x1e8] sm:$0xff]   ;;  %v9542_v2 = vld [vmem:[%s12105_s15 + $0x120] sm:$0xff]   ;;  %v9543_v20 = vld [vmem:[%s12105_s15 + $0x1f0] sm:$0xff]  }
 0x81e   : > { %v11723_v28 = vor.u32 %v5952_v50, %v5948_v22  ;;  %8852 = vmatpush3.bf16.msra.mxu1 %v9521_v6  ;;  %v8008_v59 = vcombine.low %v5971_v58, %v5972_v63  ;;  %v9541_v58 = vld [vmem:[%s12105_s15 + $0x1a8] sm:$0xff]   ;;  %v9545_v51 = vld [vmem:[%s12105_s15 + $0x1b0] sm:$0xff]   ;;  %v9547_v22 = vld [vmem:[%s12105_s15 + $0x1f8] sm:$0xff]  }
 0x81f   : > { %v5941_v42 = vsel %vm9908_vm2, 0, %v5927_v7  ;;  %v5942_v38 = vsel %vm9908_vm2, 0, %v5934_v8  ;;  %8853 = vmatprep.subr.bf16.mxu1 %v9523_v9  ;;  %v11777_v24 = vor.u32 %v5959_v49, %v5955_v21  ;;  %v9544_v11 = vld [vmem:[%s12105_s15 + $0x168] sm:$0xff]   ;;  %v9548_v50 = vld [vmem:[%s12105_s15 + $0x170] sm:$0xff]   ;;  %v9549_v8 = vld [vmem:[%s12105_s15 + $0x1b8] sm:$0xff]  }
 0x820   : > { %v8004_v26 = vcombine.low %v10331_v15, %v11723_v28  ;;  %v11741_v41 = vsel %vm10302_vm7, %v5941_v42, 0  ;;  %v11745_v61 = vsel %vm10302_vm7, %v5942_v38, 0  ;;  %v9546_v9 = vld [vmem:[%s12105_s15 + $0x128] sm:$0xff]   ;;  %v9552_v42 = vld [vmem:[%s12105_s15 + $0x178] sm:$0xff]   ;;  %v9567_v21 = vld [vmem:[%s12105_s15 + $0x230] sm:$0xff]  }
 0x821   : > { %v8012_v43 = vcombine.low %v11741_v41, %v11745_v61  ;;  %v5973_v56 = vrot.slane %v11741_v41, 1  ;;  %v5964_v34 = vshll.u32 %v11741_v41, 16  ;;  %v11760_v23 = vcombine.low %v11706_v17, %v11741_v41  ;;  %v9535_v17 = vld [vmem:[%s12105_s15 + $0x1e0] sm:$0xff]   ;;  %v9557_v49 = vld [vmem:[%s12105_s15 + $0x208] sm:$0xff]  }
 0x822   : > { %6640 = vmatprep.mubr.bf16.mxu0 %v8004_v26  ;;  %8854 = vmatpush3.bf16.msra.mxu1 %v9525_v14  ;;  %v5962_v57 = vshrl.u32 %v11741_v41, 16  ;;  %v5977_v6 = vshll.u32 %v11745_v61, 16  ;;  %v5975_v55 = vshrl.u32 %v11745_v61, 16  ;;  %v9550_v14 = vld [vmem:[%s12105_s15 + $0x130] sm:$0xff]   ;;  %v9553_v26 = vld [vmem:[%s12105_s15 + $0x138] sm:$0xff]   ;;  %v9560_v41 = vld [vmem:[%s12107_s17 + $0x20] sm:$0xff]  }
 0x823   : > { %6641 = vmatmul.mubr.bf16.vlgmr.msra.gmra.mrb[132].mxu0 %v8003_v52  ;;  %v11764_v30 = vcombine.low %v5972_v63, %v5973_v56  ;;  %v5966_v0 = vrot.slane %v5964_v34, 1  ;;  %6697 = vmatprep.mubr.bf16.mxu1 %v8012_v43  ;;  %v9551_v52 = vld [vmem:[%s12107_s17] sm:$0xff]  }
 0x824   : > { %8824 = vmatpush3.bf16.msra.mxu0 %v9526_v48  ;;  %8855 = vmatprep.subr.bf16.mxu1 %v9527_v27  ;;  %v5979_v7 = vrot.slane %v5977_v6, 1  ;;  %v9554_v48 = vld [vmem:[%s12107_s17 + $0x8] sm:$0xff]   ;;  %v9555_v43 = vld [vmem:[%s12105_s15 + $0x200] sm:$0xff]   ;;  %v5982_v27 = vrot.slane %v11745_v61, 1 }
 0x825   : > { %8825 = vmatprep.subr.bf16.mxu0 %v9528_v60  ;;  %v11779_v10 = vor.u32 %v5966_v0, %v5962_v57  ;;  %6698 = vmatmul.mubr.bf16.gmra.mrb[120].mxu1 %v11764_v30  ;;  %v8007_v60 = vcombine.low %v11723_v28, %v11777_v24  ;;  %v9558_v28 = vld [vmem:[%s12107_s17 + $0x18] sm:$0xff]   ;;  %v9569_v0 = vld [vmem:[%s12109_s19 + $0x40] sm:$0xff]   ;;  %v9596_v6 = vld [vmem:[%s12109_s19 + $0xa8] sm:$0xff]  }
 0x826   : > { %8856 = vmatpush3.bf16.msra.mxu1 %v9529_v39  ;;  %v5980_v38 = vor.u32 %v5979_v7, %v5975_v55  ;;  %v8014_v34 = vcombine.low %v5973_v56, %v5982_v27  ;;  %v9559_v39 = vld [vmem:[%s12105_s15 + $0x210] sm:$0xff]   ;;  %v9565_v56 = vld [vmem:[%s12105_s15 + $0x228] sm:$0xff]   ;;  %v9568_v57 = vld [vmem:[%s12105_s15 + $0x238] sm:$0xff]  }
 0x827   : > { %v8010_v3 = vcombine.low %v11777_v24, %v11779_v10  ;;  %8857 = vmatprep.subr.bf16.mxu1 %v9531_v62  ;;  %v8017_v62 = vcombine.low %v5982_v27, %v10522_v45  ;;  %v9571_v24 = vld [vmem:[%s12109_s19 + $0x48] sm:$0xff]   ;;  %v9573_v45 = vld [vmem:[%s12109_s19 + $0x50] sm:$0xff]  }
 0x828   : > { %8826 = vmatpush3.bf16.msra.mxu0 %v9530_v19  ;;  %v8016_v63 = vcombine.low %v5980_v38, %v10331_v15  ;;  %v9556_v15 = vld [vmem:[%s12107_s17 + $0x10] sm:$0xff]   ;;  %v9570_v19 = vld [vmem:[%s12109_s19] sm:$0xff]  }
 0x829   : > { %6648 = vmatprep.mubr.bf16.mxu0 %v8010_v3  ;;  %8827 = vmatprep.subr.bf16.mxu0 %v9532_v37  ;;  %v9578_v37 = vld [vmem:[%s12109_s19 + $0x20] sm:$0xff]  }
 0x82a   : > { %6787 = vmatprep.mubr.bf16.mxu1 %v8010_v3  ;;  %8858 = vmatpush3.bf16.msra.mxu1 %v9533_v1  ;;  %v9579_v3 = vld [vmem:[%s12109_s19 + $0x68] sm:$0xff]  }
 0x82b   : > { %6649 = vmatmul.mubr.bf16.gmra.mrb[136].mxu0 %v11760_v23  ;;  %8859 = vmatprep.subr.bf16.mxu1 %v9535_v17  ;;  %v9580_v1 = vld [vmem:[%s12109_s19 + $0x28] sm:$0xff]   ;;  %v9582_v17 = vld [vmem:[%s12109_s19 + $0x30] sm:$0xff]  }
 0x82c   : > { %8828 = vmatpush3.bf16.msra.mxu0 %v9534_v35  ;;  %6738 = vmatprep.mubr.bf16.mxu0 %v8008_v59  ;;  %v9581_v35 = vld [vmem:[%s12109_s19 + $0x70] sm:$0xff]   ;;  %v9584_v59 = vld [vmem:[%s12109_s19 + $0x38] sm:$0xff]  }
 0x82d   : > { %8829 = vmatprep.subr.bf16.mxu0 %v9536_v31  ;;  %v9583_v31 = vld [vmem:[%s12109_s19 + $0x78] sm:$0xff]  }
 0x82e   : > { %8860 = vmatpush3.bf16.msra.mxu1 %v9537_v5  ;;  %v9585_v5 = vld [vmem:[%s12109_s19 + $0xc0] sm:$0xff]  }
 0x82f   : > { %8861 = vmatprep.subr.bf16.mxu1 %v9539_v40  ;;  %v9590_v40 = vld [vmem:[%s12109_s19 + $0x90] sm:$0xff]  }
 0x830   : > { %8830 = vmatpush3.bf16.msra.mxu0 %v9538_v46  ;;  %v9586_v46 = vld [vmem:[%s12109_s19 + $0x80] sm:$0xff]  }
 0x831   : > { %8831 = vmatprep.subr.bf16.mxu0 %v9540_v13  ;;  %v9591_v13 = vld [vmem:[%s12109_s19 + $0xd8] sm:$0xff]  }
 0x832   : > { %8862 = vmatpush3.bf16.msra.mxu1 %v9541_v58  ;;  %v9592_v58 = vld [vmem:[%s12109_s19 + $0x98] sm:$0xff]  }
 0x833   : > { %8863 = vmatprep.subr.bf16.mxu1 %v9543_v20  ;;  %v9594_v20 = vld [vmem:[%s12109_s19 + $0xa0] sm:$0xff]  }
 0x834   : > { %8832 = vmatpush3.bf16.msra.mxu0 %v9542_v2  ;;  %v9593_v2 = vld [vmem:[%s12109_s19 + $0xe0] sm:$0xff]  }
 0x835   : > { %8833 = vmatprep.subr.bf16.mxu0 %v9544_v11  ;;  %v9595_v11 = vld [vmem:[%s12109_s19 + $0xe8] sm:$0xff]  }
 0x836   : > { %8864 = vmatpush3.bf16.msra.mxu1 %v9545_v51  ;;  %v9597_v51 = vld [vmem:[%s12109_s19 + $0xf0] sm:$0xff]  }
 0x837   : > { %8865 = vmatprep.subr.bf16.mxu1 %v9547_v22  ;;  %v9599_v22 = vld [vmem:[%s12109_s19 + $0xf8] sm:$0xff]  }
 0x838   : > { %8834 = vmatpush3.bf16.msra.mxu0 %v9546_v9  ;;  %v9598_v9 = vld [vmem:[%s12109_s19 + $0xb0] sm:$0xff]  }
 0x839   : > { %8835 = vmatprep.subr.bf16.mxu0 %v9548_v50  ;;  %v9600_v50 = vld [vmem:[%s12109_s19 + $0xb8] sm:$0xff]  }
 0x83a   : > { %8866 = vmatpush3.bf16.msra.mxu1 %v9549_v8 }
 0x83b   : > { %9095 = vmatprep.subr.bf16.mxu1 %v9551_v52 }
 0x83c   : > { %8836 = vmatpush3.bf16.msra.mxu0 %v9550_v14 }
 0x83d   : > { %8837 = vmatprep.subr.bf16.mxu0 %v9552_v42  ;;  %6788 = vmatmul.mubr.bf16.vlgmr.msra.gmra.mrb[124].mxu1 %v11760_v23  ;;  %v8015_v23 = vcombine.low %v11745_v61, %v10312_v25  ;;  %v8013_v25 = vcombine.low %v11779_v10, %v5980_v38  ;;  %v9561_v61 = vld [vmem:[%s12105_s15 + $0x218] sm:$0xff]   ;;  %v9577_v10 = vld [vmem:[%s12109_s19 + $0x60] sm:$0xff]  }
 0x83e   : > { %6795 = vmatprep.mubr.bf16.mxu1 %v8016_v63  ;;  %9096 = vmatpush3.bf16.msra.mxu1 %v9551_v52 }
 0x83f   : > { %9097 = vmatprep.subr.bf16.mxu1 %v9554_v48 }
 0x840   : > { %8838 = vmatpush3.bf16.msra.mxu0 %v9553_v26  ;;  %v8002_v26 = vld [vmem:[%s12106_s16] ss:$0 sm:$0xff] }
 0x841   : > { %9075 = vmatprep.subr.bf16.mxu0 %v9555_v43 }
 0x842   : > { %9098 = vmatpush3.bf16.msra.mxu1 %v9554_v48 }
 0x843   : > { %6739 = vmatmul.mubr.bf16.vlgmr.msra.gmra.mrb[140].mxu0 %v8007_v60  ;;  %9099 = vmatprep.subr.bf16.mxu1 %v9556_v15 }
 0x844   : > { %6746 = vmatprep.mubr.bf16.mxu0 %v8014_v34  ;;  %9076 = vmatpush3.bf16.msra.mxu0 %v9555_v43 }
 0x845   : > { %9077 = vmatprep.subr.bf16.mxu0 %v9557_v49  ;;  %6796 = vmatmul.mubr.bf16.gmra.mrb[128].mxu1 %v8015_v23 }
 0x846   : > { %9100 = vmatpush3.bf16.msra.mxu1 %v9556_v15  ;;  %9111 = vmatprep.mubr.bf16.mxu1 %v8169_v36  ;;  %v9564_v36 = vld [vmem:[%s12107_s17 + $0x30] sm:$0xff]  }
 0x847   : > { %9101 = vmatprep.subr.bf16.mxu1 %v9558_v28 }
 0x848   : > { %9078 = vmatpush3.bf16.msra.mxu0 %v9557_v49 }
 0x849   : > { %9079 = vmatprep.subr.bf16.mxu0 %v9559_v39 }
 0x84a   : > { %9102 = vmatpush3.bf16.msra.mxu1 %v9558_v28 }
 0x84b   : > { %6747 = vmatmul.mubr.bf16.gmra.mrb[144].mxu0 %v8013_v25  ;;  %9103 = vmatprep.subr.bf16.mxu1 %v9560_v41 }
 0x84c   : > { %9080 = vmatpush3.bf16.msra.mxu0 %v9559_v39  ;;  %9091 = vmatprep.mubr.bf16.mxu0 %v11764_v30  ;;  %v9566_v30 = vld [vmem:[%s12107_s17 + $0x38] sm:$0xff]  }
 0x84d   : > { %9081 = vmatprep.subr.bf16.mxu0 %v9561_v61 }
 0x84e   : > { %9104 = vmatpush3.bf16.msra.mxu1 %v9560_v41 }
 0x84f   : > { %9105 = vmatprep.subr.bf16.mxu1 %v9562_v12 }
 0x850   : > { %9082 = vmatpush3.bf16.msra.mxu0 %v9561_v61 }
 0x851   : > { %9083 = vmatprep.subr.bf16.mxu0 %v9563_v54 }
 0x852   : > { %9106 = vmatpush3.bf16.msra.mxu1 %v9562_v12 }
 0x853   : > { %9107 = vmatprep.subr.bf16.mxu1 %v9564_v36 }
 0x854   : > { %9084 = vmatpush3.bf16.msra.mxu0 %v9563_v54 }
 0x855   : > { %9085 = vmatprep.subr.bf16.mxu0 %v9565_v56 }
 0x856   : > { %9108 = vmatpush3.bf16.msra.mxu1 %v9564_v36 }
 0x857   : > { %9109 = vmatprep.subr.bf16.mxu1 %v9566_v30 }
 0x858   : > { %9086 = vmatpush3.bf16.msra.mxu0 %v9565_v56 }
 0x859   : > { %9087 = vmatprep.subr.bf16.mxu0 %v9567_v21 }
 0x85a   : > { %9110 = vmatpush3.bf16.msra.mxu1 %v9566_v30 }
 0x85b   : > { %8927 = vmatprep.subr.bf16.mxu1 %v9585_v5 }
 0x85c   : > { %9088 = vmatpush3.bf16.msra.mxu0 %v9567_v21 }
 0x85d   : > { %9089 = vmatprep.subr.bf16.mxu0 %v9568_v57  ;;  %9112 = vmatmul.mubr.bf16.vlgmr.msra.gmra.mrb[132].mxu1 %v8170_v33  ;;  %v9575_v33 = vld [vmem:[%s12109_s19 + $0x58] sm:$0xff]  }
 0x85e   : > { %8928 = vmatpush3.bf16.msra.mxu1 %v9586_v46 }
 0x860   : > { %9090 = vmatpush3.bf16.msra.mxu0 %v9568_v57 }
 0x861   : > { %8899 = vmatprep.subr.bf16.mxu0 %v9569_v0 }
 0x863   : > { %9092 = vmatmul.mubr.bf16.vlgmr.msra.gmra.mrb[148].mxu0 %v8017_v62 }
 0x864   : > { %8900 = vmatpush3.bf16.msra.mxu0 %v9570_v19  ;;  %8137 = vmatprep.mubr.msk.bf16.mxu0 %vm11026_vm3, %v11687_v29  ;;  %v9576_v29 = vld [vmem:[%s12109_s19 + $0x18] sm:$0xff]  }
 0x865   : > { %8901 = vmatprep.subr.bf16.mxu0 %v9571_v24 }
 0x868   : > { %8902 = vmatpush3.bf16.msra.mxu0 %v9572_v16 }
 0x869   : > { %8903 = vmatprep.subr.bf16.mxu0 %v9573_v45 }
 0x86c   : > { %8904 = vmatpush3.bf16.msra.mxu0 %v9574_v53 }
 0x86d   : > { %8905 = vmatprep.subr.bf16.mxu0 %v9575_v33 }
 0x870   : > { %8906 = vmatpush3.bf16.msra.mxu0 %v9576_v29 }
 0x871   : > { %8907 = vmatprep.subr.bf16.mxu0 %v9577_v10 }
 0x874   : > { %8908 = vmatpush3.bf16.msra.mxu0 %v9578_v37 }
 0x875   : > { %8909 = vmatprep.subr.bf16.mxu0 %v9579_v3 }
 0x878   : > { %8910 = vmatpush3.bf16.msra.mxu0 %v9580_v1 }
 0x879   : > { %8911 = vmatprep.subr.bf16.mxu0 %v9581_v35 }
 0x87c   : > { %8912 = vmatpush3.bf16.msra.mxu0 %v9582_v17 }
 0x87d   : > { %8913 = vmatprep.subr.bf16.mxu0 %v9583_v31 }
 0x880   : > { %8914 = vmatpush3.bf16.msra.mxu0 %v9584_v59 }
 0x883   : > { %8138 = vmatmul.mubr.msk.bf16.vlgmr.msra.gmra.mrb[152].mxu0 %vm11026_vm3, %v11030_v18  ;;  %v9587_v18 = vld [vmem:[%s12109_s19 + $0xc8] sm:$0xff]  }
 0x884   : > { %8139 = vmatprep.mubr.msk.bf16.mxu0 %vm11032_vm4, %v11685_v32  ;;  %v9588_v32 = vld [vmem:[%s12109_s19 + $0x88] sm:$0xff]   ;;  %8929 = vmatprep.subr.bf16.mxu1 %v9587_v18 }
 0x885   : > { %8930 = vmatpush3.bf16.msra.mxu1 %v9588_v32 }
 0x88b   : > { %8140 = vmatmul.mubr.msk.bf16.gmra.mrb[156].mxu0 %vm11032_vm4, %v11050_v47  ;;  %v9589_v47 = vld [vmem:[%s12109_s19 + $0xd0] sm:$0xff]  }
 0x88c   : > { %8931 = vmatprep.subr.bf16.mxu1 %v9589_v47 }
 0x88d   : > { %8932 = vmatpush3.bf16.msra.mxu1 %v9590_v40 }
 0x88e   : > { %8933 = vmatprep.subr.bf16.mxu1 %v9591_v13 }
 0x891   : > { %8934 = vmatpush3.bf16.msra.mxu1 %v9592_v58 }
 0x892   : > { %8935 = vmatprep.subr.bf16.mxu1 %v9593_v2 }
 0x895   : > { %8936 = vmatpush3.bf16.msra.mxu1 %v9594_v20 }
 0x896   : > { %8937 = vmatprep.subr.bf16.mxu1 %v9595_v11 }
 0x899   : > { %8938 = vmatpush3.bf16.msra.mxu1 %v9596_v6 }
 0x89a   : > { %8939 = vmatprep.subr.bf16.mxu1 %v9597_v51 }
 0x89d   : > { %8940 = vmatpush3.bf16.msra.mxu1 %v9598_v9 }
 0x89e   : > { %8941 = vmatprep.subr.bf16.mxu1 %v9599_v22 }
 0x8a1   : > { %8942 = vmatpush3.bf16.msra.mxu1 %v9600_v50 }
 0x8f0   : > { %v8811_v7 = vpop.f32.mrb[116].mxu1 }
 0x8f1   : > { %v8812_v8 = vpop.f32.mrb[117].mxu1 }
 0x8f2   : > { %v8813_v55 = vadd.f32 %v8812_v8, %v8811_v7  ;;  %v8814_v14 = vpop.f32.mrb[118].mxu1 }
 0x8f3   : > { %v8815_v52 = vpop.f32.mrb[119].mxu1 }
 0x8f4   : > { %v8816_v42 = vadd.f32 %v8815_v52, %v8814_v14  ;;  %v8094_v14 = vld [vmem:[%s12108_s18] ss:$0 sm:$0xff] }
 0x8f6   : > { %v8783_v38 = vpop.f32.mrb[132].mxu0 }
 0x8f7   : > { %v8784_v48 = vpop.f32.mrb[133].mxu0 }
 0x8f8   : > { %v8785_v63 = vadd.f32 %v8784_v48, %v8783_v38  ;;  %v8786_v43 = vpop.f32.mrb[134].mxu0  ;;  %v8817_v60 = vpop.f32.mrb[120].mxu1 }
 0x8f9   : > { %v8787_v27 = vpop.f32.mrb[135].mxu0  ;;  %v8818_v34 = vpop.f32.mrb[121].mxu1 }
 0x8fa   : > { %v6643_v15 = vadd.f32 %v8785_v63, %v8002_v26  ;;  %v8788_v49 = vadd.f32 %v8787_v27, %v8786_v43  ;;  %v8819_v23 = vadd.f32 %v8818_v34, %v8817_v60  ;;  %v8820_v28 = vpop.f32.mrb[122].mxu1 }
 0x8fb   : > { %v8821_v25 = vpop.f32.mrb[123].mxu1 }
 0x8fc   : > { %v6646_v39 = vadd.f32 %v8788_v49, %v8002_v26  ;;  %v6692_v41 = vadd.f32 %v8813_v55, %v6643_v15  ;;  %v8822_v61 = vadd.f32 %v8821_v25, %v8820_v28 }
 0x8fe   : > { %v8789_v12 = vpop.f32.mrb[136].mxu0  ;;  %v6695_v54 = vadd.f32 %v8816_v42, %v6646_v39 }
 0x8ff   : > { %v8790_v36 = vpop.f32.mrb[137].mxu0 }
 0x900   : > { %v8791_v56 = vadd.f32 %v8790_v36, %v8789_v12  ;;  %v8792_v30 = vpop.f32.mrb[138].mxu0 }
 0x901   : > { %v8793_v21 = vpop.f32.mrb[139].mxu0 }
 0x902   : > { %v6651_v57 = vadd.f32 %v8791_v56, %v8002_v26  ;;  %v8794_v0 = vadd.f32 %v8793_v21, %v8792_v30 }
 0x904   : > { %v6654_v19 = vadd.f32 %v8794_v0, %v8002_v26  ;;  %v6700_v62 = vadd.f32 %v8819_v23, %v6651_v57 }
 0x906   : > { %v6703_v24 = vadd.f32 %v8822_v61, %v6654_v19 }
 0x910   : > { %v8867_v16 = vpop.f32.mrb[124].mxu1 }
 0x911   : > { %v8868_v45 = vpop.f32.mrb[125].mxu1 }
 0x912   : > { %v8869_v53 = vadd.f32 %v8868_v45, %v8867_v16  ;;  %v8870_v33 = vpop.f32.mrb[126].mxu1 }
 0x913   : > { %v8871_v29 = vpop.f32.mrb[127].mxu1 }
 0x914   : > { %v8872_v10 = vadd.f32 %v8871_v29, %v8870_v33 }
 0x916   : > { %v8839_v37 = vpop.f32.mrb[140].mxu0 }
 0x917   : > { %v8840_v3 = vpop.f32.mrb[141].mxu0 }
 0x918   : > { %v8841_v1 = vadd.f32 %v8840_v3, %v8839_v37  ;;  %v8842_v35 = vpop.f32.mrb[142].mxu0  ;;  %v8873_v31 = vpop.f32.mrb[128].mxu1 }
 0x919   : > { %v8843_v17 = vpop.f32.mrb[143].mxu0  ;;  %v8874_v46 = vpop.f32.mrb[129].mxu1 }
 0x91a   : > { %v6741_v59 = vadd.f32 %v8841_v1, %v6692_v41  ;;  %v8844_v5 = vadd.f32 %v8843_v17, %v8842_v35  ;;  %v8875_v18 = vadd.f32 %v8874_v46, %v8873_v31  ;;  %v8876_v32 = vpop.f32.mrb[130].mxu1 }
 0x91b   : > { %v8877_v40 = vpop.f32.mrb[131].mxu1 }
 0x91c   : > { %v6744_v47 = vadd.f32 %v8844_v5, %v6695_v54  ;;  %v6790_v13 = vadd.f32 %v8869_v53, %v6741_v59  ;;  %v8878_v58 = vadd.f32 %v8877_v40, %v8876_v32 }
 0x91e   : > { %v8845_v2 = vpop.f32.mrb[144].mxu0  ;;  %v6793_v20 = vadd.f32 %v8872_v10, %v6744_v47 }
 0x91f   : > { %v8846_v11 = vpop.f32.mrb[145].mxu0 }
 0x920   : > { %v8847_v6 = vadd.f32 %v8846_v11, %v8845_v2  ;;  %v8848_v51 = vpop.f32.mrb[146].mxu0 }
 0x921   : > { %v8849_v9 = vpop.f32.mrb[147].mxu0 }
 0x922   : > { %v6749_v22 = vadd.f32 %v8847_v6, %v6700_v62  ;;  %v8850_v50 = vadd.f32 %v8849_v9, %v8848_v51 }
 0x924   : > { %v6752_v7 = vadd.f32 %v8850_v50, %v6703_v24  ;;  %v6798_v8 = vadd.f32 %v8875_v18, %v6749_v22 }
 0x926   : > { %v6801_v55 = vadd.f32 %v8878_v58, %v6752_v7 }
 0x930   : > { %v9113_v52 = vpop.f32.mrb[132].mxu1 }
 0x931   : > { %v7143_v42 = vadd.f32 %v9113_v52, %v8094_v14  ;;  %v7134_v38 = vpop.f32.mrb[133].mxu1 }
 0x932   : > { %v7135_v26 = vadd.f32 %v8094_v14, %v7134_v38  ;;  %v9114_v48 = vpop.f32.mrb[134].mxu1 }
 0x933   : > { %v7146_v63 = vadd.f32 %v9114_v48, %v8094_v14  ;;  %v7137_v43 = vpop.f32.mrb[135].mxu1  ;;  %v7151_v60 = vmax.f32 %v7143_v42, 0.0  ;;  %v7521_v42 = vld [vmem:[%s12110_s20] sm:$0x1] }
 0x934   : > { %v7138_v27 = vadd.f32 %v8094_v14, %v7137_v43  ;;  %v7149_v34 = vmax.f32 %v7135_v26, 0.0 }
 0x935   : > { %v7152_v15 = vmax.f32 %v7146_v63, 0.0 }
 0x936   : > { %v9093_v49 = vpop.f32.mrb[148].mxu0  ;;  %v7150_v23 = vmax.f32 %v7138_v27, 0.0 }
 0x937   : > { %v6847_v28 = vadd.f32 %v9093_v49, %v6798_v8  ;;  %v6838_v39 = vpop.f32.mrb[149].mxu0  ;;  %v7154_v25 = vpack.c.bf16 %v7152_v15, %v7151_v60 }
 0x938   : > { %v6839_v41 = vadd.f32 %v6838_v39, %v6790_v13  ;;  %v9094_v61 = vpop.f32.mrb[150].mxu0  ;;  %v7153_v12 = vpack.c.bf16 %v7150_v23, %v7149_v34 }
 0x939   : > { %v6850_v54 = vadd.f32 %v9094_v61, %v6801_v55  ;;  %v6841_v36 = vpop.f32.mrb[151].mxu0  ;;  %v6855_v30 = vmax.f32 %v6847_v28, 0.0 }
 0x93a   : > { %v6842_v56 = vadd.f32 %v6841_v36, %v6793_v20  ;;  %8141 = vmatprep.mubr.msk.bf16.mxu1 %vm11026_vm3, %v7153_v12  ;;  %v6853_v57 = vmax.f32 %v6839_v41, 0.0 }
 0x93b   : > { %v6856_v21 = vmax.f32 %v6850_v54, 0.0 }
 0x93c   : > { %v6854_v0 = vmax.f32 %v6842_v56, 0.0 }
 0x93d   : > { %v6858_v19 = vpack.c.bf16 %v6856_v21, %v6855_v30 }
 0x93e   : > { %v6857_v62 = vpack.c.bf16 %v6854_v0, %v6853_v57 }
 0x940   : > { %8142 = vmatmul.mubr.msk.bf16.vlgmr.msra.gmra.mrb[136].mxu1 %vm11026_vm3, %v6857_v62 }
 0x941   : > { %8143 = vmatprep.mubr.msk.bf16.mxu1 %vm11032_vm4, %v7154_v25 }
 0x948   : > { %8144 = vmatmul.mubr.msk.bf16.gmra.mrb[140].mxu1 %vm11032_vm4, %v6858_v19 }
 0x956   : > { %v8915_v24 = vpop.f32.mrb[152].mxu0 }
 0x957   : > { %v8916_v16 = vpop.f32.mrb[153].mxu0 }
 0x958   : > { %v8917_v45 = vadd.f32 %v8916_v16, %v8915_v24  ;;  %v8918_v53 = vpop.f32.mrb[154].mxu0 }
 0x959   : > { %v8919_v33 = vpop.f32.mrb[155].mxu0 }
 0x95a   : > { %v8920_v29 = vadd.f32 %v8919_v33, %v8918_v53 }
 0x95e   : > { %v8921_v10 = vpop.f32.mrb[156].mxu0 }
 0x95f   : > { %v8922_v37 = vpop.f32.mrb[157].mxu0 }
 0x960   : > { %v8923_v3 = vadd.f32 %v8922_v37, %v8921_v10  ;;  %v8924_v1 = vpop.f32.mrb[158].mxu0 }
 0x961   : > { %v8925_v35 = vpop.f32.mrb[159].mxu0 }
 0x962   : > { %v8926_v17 = vadd.f32 %v8925_v35, %v8924_v1 }
 0xa13   : > { %v8943_v44 = vpop.f32.mrb[136].mxu1 }
 0xa14   : > { %v8944_v31 = vpop.f32.mrb[137].mxu1 }
 0xa15   : > { %v8945_v59 = vadd.f32 %v8944_v31, %v8943_v44  ;;  %v8946_v5 = vpop.f32.mrb[138].mxu1 }
 0xa16   : > { %v8947_v46 = vpop.f32.mrb[139].mxu1 }
 0xa17   : > { %v7497_v18 = vadd.f32 %v8945_v59, %v8917_v45  ;;  %v8948_v4 = vadd.f32 %v8947_v46, %v8946_v5 }
 0xa19   : > { %v7500_v32 = vadd.f32 %v8948_v4, %v8920_v29 }
 0xa1b   : > { %v7511_v47 = vadd.f32 %v7500_v32, %v7497_v18  ;;  %v8949_v40 = vpop.f32.mrb[140].mxu1 }
 0xa1c   : > { %v8950_v13 = vpop.f32.mrb[141].mxu1 }
 0xa1d   : > { %v8951_v58 = vadd.f32 %v8950_v13, %v8949_v40  ;;  %v8952_v2 = vpop.f32.mrb[142].mxu1 }
 0xa1e   : > { %v8953_v20 = vpop.f32.mrb[143].mxu1 }
 0xa1f   : > { %v7505_v11 = vadd.f32 %v8951_v58, %v8923_v3  ;;  %v8954_v6 = vadd.f32 %v8953_v20, %v8952_v2 }
 0xa21   : > { %v7512_v51 = vadd.f32 %v7511_v47, %v7505_v11  ;;  %v7508_v9 = vadd.f32 %v8954_v6, %v8926_v17 }
 0xa23   : > { %v7513_v22 = vadd.f32 %v7512_v51, %v7508_v9 }
 0xa25   : > { %v7514_v50 = vrot.slane %v7513_v22, 4 }
 0xa27   : > { %v7515_v7 = vadd.f32 %v7514_v50, %v7513_v22 }
 0xa29   : > { %v7516_v8 = vrot.slane %v7515_v7, 2 }
 0xa2b   : > { %v7517_v55 = vadd.f32 %v7516_v8, %v7515_v7 }
 0xa2d   : > { %v7518_v14 = vrot.slane %v7517_v55, 1 }
 0xa2f   : > { %v7519_v52 = vadd.f32 %v7518_v14, %v7517_v55 }
 0xa31   : > { %v7520_v38 = vmul.f32 0.0625, %v7519_v52 }
 0xa33   : > { %v7522_v26 = vadd.f32 %v7521_v42, %v7520_v38 }
 0xa35   : > { %7523 = vst [vmem:[%s648_s26] sm:$0x1] %v7522_v26 }
 0xa36   : > { %9615 = shalt.err (!%p9612_p3)
}
 0xa37   : > { %s9616_s28 = scalar_lea.hbm %s12048_s2, 16  ;;  %s9620_s6 = scalar_lea.hbm %s12168_s7, 32 }
 0xa38   : > { %p9617_p4 = scmp.ne.s32.totalorder %s12048_s2, %s9616_s28  ;;  %p9621_p9 = scmp.lt.u32.totalorder %s12048_s2, %s12168_s7 }
 0xa39   : > { %p9622_p10 = scmp.lt.u32.totalorder %s9620_s6, %s9616_s28  ;;  %p9624_p12 = scmp.lt.u32.totalorder %s9616_s28, %s12048_s2 }
 0xa3a   : > { %p9618_p7 = pnand %p9617_p4, %p9816_p5 }
 0xa3b   : > { %p9623_p11 = por %p9622_p10, %p9621_p9 }
 0xa3c   : > { %p9619_p8 = pneg %p9618_p7 }
 0xa3d   : > { %p9625_p13 = por %p9624_p12, %p9623_p11 }
 0xa3f   : > { %p9626_p0 = pnand %p9625_p13, %p9619_p8 }
 0xa41   : > { %9629 = shalt.err (!%p9626_p0)
}
 0xa42   : > { %9115 = dma.vmem_to_hbm [thread:$0]  (%p9816_p5), %s12050_s21, 16, %s12048_s2, %s7525_s27  }
 0xa43 PF: > { %s12169_s22 = sld [smem:[#allocation7_spill]]  ;;  %s12170_s1 = sld [smem:[#allocation5_spill]] }
 0xa49   : > { %p9121_p1 = scmp.ge.s32.totalorder %s12169_s22, 2  ;;  %s7549_s4 = sand.u32 1, %s12170_s1  }
 0xa4a   : > { %s7550_s26 = scalar_lea.sflag [#allocation3], %s7549_s4 }
 0xa4b   : > { %p9118_p2 = pnand %p9121_p1, %p9820_p6 }
 0xa4d   : > { %9647 = dma.done.wait (!%p9118_p2), %s7550_s26, 16  }
 0xa4e   : > { %9649 = vsyncadd (!%p9118_p2), %s7550_s26, 4294967280  ;;  %s12172_s27 = sld [smem:[#allocation8_spill]]  ;;  %s12173_s28 = sld [smem:[#allocation6_spill]] }
 0xa4f   : > { %s12174_s26 = sld [smem:[#allocation9_spill]]  ;;  %s12175_s2 = smov %s9656_s25 }
 0xa54   : > { %p31_p3 = scmp.ge.s32.totalorder %s12172_s27, 4   ;;  %s12176_s25 = smov %s12173_s28 }
 0xa56   :  { %33 = sbr.rel (!%p31_p3) target bundleno = 13 (0xd), region = 139 }
 0xa5d   :  { %7554 = vsyncpa [#allocation3], 1 }
 0xa5e   :  { %7556 = vsyncpa [#allocation3 + $0x1], 1 }

</bundles_post_ra>
